<compile_context>
chip_gen: v7x
topology: tpu7x:2x2x1
jax: 0.10.0
libtpu: 0.0.40
codegen_flags: <defaults>
</compile_context>

<pallas_src>
import functools

import numpy as np
import jax
import jax.numpy as jnp
from jax.experimental import pallas as pl
from jax.experimental.pallas import tpu as pltpu


# ---------------------------------------------------------------------------
# Fused kernel: whole CBAMBasicBlock for one batch element.
# ---------------------------------------------------------------------------
def _cbam_block_kernel(x_ref, w1_ref, s1_ref, b1_ref, w2_ref, s2_ref, b2_ref,
                       mw1_ref, mb1_ref, mw2_ref, mb2_ref, wsp_ref, bsp_ref,
                       o_ref, xpad_ref, ppad_ref, *, H, W, C):
    x = x_ref[0].astype(jnp.float32)                   # (H, W, C)
    x_flat = x.reshape(H * W, C)

    # Zero the halo scratches once per grid step (interiors are overwritten
    # below, halos stay zero).
    xpad_ref[...] = jnp.zeros_like(xpad_ref)
    ppad_ref[...] = jnp.zeros_like(ppad_ref)

    def conv3x3_bn(inp_hwc, w_ref, s_ref, b_ref, relu):
        # inp_hwc: (H, W, C) f32 value.  One im2col matmul with K = 9*C.
        xpad_ref[1:H + 1, 1:W + 1, :] = inp_hwc
        xp = xpad_ref[...]                             # (H+2, W+2, C)
        taps = []
        for dh in range(3):
            for dw in range(3):
                taps.append(xp[dh:dh + H, dw:dw + W, :].reshape(H * W, C))
        cols = jnp.concatenate(taps, axis=1)           # (H*W, 9*C)
        out = jnp.dot(cols, w_ref[...], preferred_element_type=jnp.float32)
        out = out * s_ref[0] + b_ref[0]                # folded BatchNorm
        if relu:
            out = jnp.maximum(out, 0.0)
        return out                                      # (H*W, C)

    out1 = conv3x3_bn(x, w1_ref, s1_ref, b1_ref, relu=True)
    out2 = conv3x3_bn(out1.reshape(H, W, C), w2_ref, s2_ref, b2_ref, relu=False)

    # ---- ChannelGate: global avg/max pool -> shared MLP -> sigmoid scale ----
    avg = jnp.mean(out2, axis=0, keepdims=True)        # (1, C)
    mx = jnp.max(out2, axis=0, keepdims=True)          # (1, C)
    p = jnp.concatenate([avg, mx], axis=0)             # (2, C)
    h = jnp.maximum(
        jnp.dot(p, mw1_ref[...], preferred_element_type=jnp.float32)
        + mb1_ref[...], 0.0)                            # (2, Ch)
    a = jnp.dot(h, mw2_ref[...], preferred_element_type=jnp.float32) + mb2_ref[...]
    scale_c = jax.nn.sigmoid(a[0:1, :] + a[1:2, :])    # (1, C)  mlp(avg)+mlp(max)
    xg = out2 * scale_c                                 # (H*W, C)

    # ---- ChannelPool + SpatialGate: 7x7 conv over [max, mean] planes ----
    cmax = jnp.max(xg, axis=1, keepdims=True)           # (H*W, 1)
    cmean = jnp.mean(xg, axis=1, keepdims=True)         # (H*W, 1)
    pool = jnp.concatenate([cmax, cmean], axis=1).reshape(H, W, 2)
    ppad_ref[3:H + 3, 3:W + 3, :] = pool
    pp = ppad_ref[...]                                  # (H+6, W+6, 2)
    sp_taps = []
    for dh in range(7):
        for dw in range(7):
            sp_taps.append(pp[dh:dh + H, dw:dw + W, :].reshape(H * W, 2))
    cols_sp = jnp.concatenate(sp_taps, axis=1)          # (H*W, 98)
    sp = jnp.dot(cols_sp, wsp_ref[...], preferred_element_type=jnp.float32)
    scale_s = jax.nn.sigmoid(sp + bsp_ref[0])           # (H*W, 1)

    # ---- residual add + final ReLU ----
    y = jnp.maximum(xg * scale_s + x_flat, 0.0)
    o_ref[0] = y.reshape(H, W, C).astype(o_ref.dtype)


def cbam_basic_block_nhwc(x, p):
    N, H, W, C = x.shape
    Ch = p['mlp_w1'].shape[1]
    kernel = functools.partial(_cbam_block_kernel, H=H, W=W, C=C)
    return pl.pallas_call(
        kernel,
        out_shape=jax.ShapeDtypeStruct((N, H, W, C), x.dtype),
        grid=(N,),
        in_specs=[
            pl.BlockSpec((1, H, W, C), lambda n: (n, 0, 0, 0)),   # x / residual
            pl.BlockSpec((9 * C, C), lambda n: (0, 0)),           # conv1 im2col W
            pl.BlockSpec((1, C), lambda n: (0, 0)),               # bn1 scale
            pl.BlockSpec((1, C), lambda n: (0, 0)),               # bn1 bias
            pl.BlockSpec((9 * C, C), lambda n: (0, 0)),           # conv2 im2col W
            pl.BlockSpec((1, C), lambda n: (0, 0)),               # bn2 scale
            pl.BlockSpec((1, C), lambda n: (0, 0)),               # bn2 bias
            pl.BlockSpec((C, Ch), lambda n: (0, 0)),              # mlp w1
            pl.BlockSpec((1, Ch), lambda n: (0, 0)),              # mlp b1
            pl.BlockSpec((Ch, C), lambda n: (0, 0)),              # mlp w2
            pl.BlockSpec((1, C), lambda n: (0, 0)),               # mlp b2
            pl.BlockSpec((98, 1), lambda n: (0, 0)),              # 7x7 spatial W (im2col)
            pl.BlockSpec(memory_space=pltpu.MemorySpace.SMEM),    # spatial bias (1,)
        ],
        out_specs=pl.BlockSpec((1, H, W, C), lambda n: (n, 0, 0, 0)),
        scratch_shapes=[
            pltpu.VMEM((H + 2, W + 2, C), jnp.float32),           # 3x3 halo pad
            pltpu.VMEM((H + 6, W + 6, 2), jnp.float32),           # 7x7 halo pad
        ],
        compiler_params=pltpu.CompilerParams(
            dimension_semantics=("parallel",)),                   # v7x: 2 TCs
    )(x, p['w1_col'], p['bn1_scale'], p['bn1_bias'],
      p['w2_col'], p['bn2_scale'], p['bn2_bias'],
      p['mlp_w1'], p['mlp_b1'], p['mlp_w2'], p['mlp_b2'],
      p['w_sp_col'], p['b_sp'])


def cbam_basic_block(x_nchw, p):
    x = jnp.transpose(x_nchw, (0, 2, 3, 1))             # NCHW -> NHWC
    y = cbam_basic_block_nhwc(x, p)
    return jnp.transpose(y, (0, 3, 1, 2))               # NHWC -> NCHW


# ---------------------------------------------------------------------------
# Deterministic parameter construction + pure-JAX reference
# ---------------------------------------------------------------------------
def make_params(key, C, reduction=16, eps=1e-5):
    ks = jax.random.split(key, 7)

    def bn_fold(g, b, m, v):
        s = g / jnp.sqrt(v + eps)
        return s, b - m * s

    idx = jnp.arange(C, dtype=jnp.float32)
    w1 = jax.random.normal(ks[0], (3, 3, C, C), jnp.float32) / np.sqrt(9.0 * C)
    w2 = jax.random.normal(ks[1], (3, 3, C, C), jnp.float32) / np.sqrt(9.0 * C)
    s1, o1 = bn_fold(1.0 + 0.1 * jnp.cos(idx), 0.05 * jnp.sin(idx),
                     0.02 * jnp.sin(idx + 1.0), 1.0 + 0.2 * jnp.abs(jnp.sin(0.5 * idx)))
    s2, o2 = bn_fold(1.0 + 0.1 * jnp.sin(idx), 0.05 * jnp.cos(idx),
                     0.02 * jnp.cos(idx + 2.0), 1.0 + 0.2 * jnp.abs(jnp.cos(0.3 * idx)))

    Ch = max(C // reduction, 1)
    mlp_w1 = jax.random.normal(ks[2], (C, Ch), jnp.float32) / np.sqrt(C)
    mlp_b1 = 0.05 * jax.random.normal(ks[3], (1, Ch), jnp.float32)
    mlp_w2 = jax.random.normal(ks[4], (Ch, C), jnp.float32) / np.sqrt(max(Ch, 1))
    mlp_b2 = 0.05 * jax.random.normal(ks[5], (1, C), jnp.float32)

    w_sp = jax.random.normal(ks[6], (7, 7, 2), jnp.float32) / np.sqrt(98.0)
    g_sp, b_sp, m_sp, v_sp = 1.05, -0.02, 0.01, 0.9
    s_sp = g_sp / np.sqrt(v_sp + eps)
    w_sp_f = w_sp * s_sp                                 # fold BN scale into weights
    b_sp_f = np.float32(b_sp - m_sp * s_sp)

    return dict(
        w1_hwio=w1, w2_hwio=w2,
        w1_col=w1.reshape(9 * C, C), w2_col=w2.reshape(9 * C, C),
        bn1_scale=s1.reshape(1, C), bn1_bias=o1.reshape(1, C),
        bn2_scale=s2.reshape(1, C), bn2_bias=o2.reshape(1, C),
        mlp_w1=mlp_w1, mlp_b1=mlp_b1, mlp_w2=mlp_w2, mlp_b2=mlp_b2,
        w_sp_hwio=w_sp_f[..., None],                     # (7, 7, 2, 1)
        w_sp_col=w_sp_f.reshape(98, 1),
        b_sp=jnp.full((1,), b_sp_f, jnp.float32),
    )


def reference(x_nchw, p):
    x = jnp.transpose(x_nchw, (0, 2, 3, 1))
    conv = lambda a, w, pad: jax.lax.conv_general_dilated(
        a, w, (1, 1), ((pad, pad), (pad, pad)),
        dimension_numbers=('NHWC', 'HWIO', 'NHWC'))
    out = conv(x, p['w1_hwio'], 1) * p['bn1_scale'] + p['bn1_bias']
    out = jnp.maximum(out, 0.0)
    out = conv(out, p['w2_hwio'], 1) * p['bn2_scale'] + p['bn2_bias']
    avg = jnp.mean(out, axis=(1, 2))
    mx = jnp.max(out, axis=(1, 2))
    mlp = lambda v: jnp.maximum(v @ p['mlp_w1'] + p['mlp_b1'], 0.0) @ p['mlp_w2'] + p['mlp_b2']
    scale_c = jax.nn.sigmoid(mlp(avg) + mlp(mx))[:, None, None, :]
    xg = out * scale_c
    pool = jnp.concatenate([jnp.max(xg, axis=-1, keepdims=True),
                            jnp.mean(xg, axis=-1, keepdims=True)], axis=-1)
    sp = conv(pool, p['w_sp_hwio'], 3) + p['b_sp'][0]
    y = jnp.maximum(xg * jax.nn.sigmoid(sp) + x, 0.0)
    return jnp.transpose(y, (0, 3, 1, 2))


if __name__ == "__main__":
    N, C, H, W = 2, 32, 8, 8                             # planes=32 -> MLP hidden = 32//16 = 2
    key = jax.random.PRNGKey(0)
    kx, kp = jax.random.split(key)
    x = jax.random.normal(kx, (N, C, H, W), jnp.float32)
    params = make_params(kp, C)

    y = jax.jit(cbam_basic_block)(x, params)
    y = jax.block_until_ready(y)

    y_ref = reference(x, params)
    np.testing.assert_allclose(np.asarray(y), np.asarray(y_ref), rtol=2e-3, atol=2e-3)
    print("KERNEL_OK")
</pallas_src>

<mosaic_0001>
module attributes {stable_mosaic.version = 11 : i64} {
  func.func @_cbam_block_kernel(%arg0: i32, %arg1: memref<1x8x8x32xf32, #tpu.memory_space<vmem>>, %arg2: memref<288x32xf32, #tpu.memory_space<vmem>>, %arg3: memref<1x32xf32, #tpu.memory_space<vmem>>, %arg4: memref<1x32xf32, #tpu.memory_space<vmem>>, %arg5: memref<288x32xf32, #tpu.memory_space<vmem>>, %arg6: memref<1x32xf32, #tpu.memory_space<vmem>>, %arg7: memref<1x32xf32, #tpu.memory_space<vmem>>, %arg8: memref<32x2xf32, #tpu.memory_space<vmem>>, %arg9: memref<1x2xf32, #tpu.memory_space<vmem>>, %arg10: memref<2x32xf32, #tpu.memory_space<vmem>>, %arg11: memref<1x32xf32, #tpu.memory_space<vmem>>, %arg12: memref<98x1xf32, #tpu.memory_space<vmem>>, %arg13: memref<1xf32, #tpu.memory_space<smem>>, %arg14: memref<1x8x8x32xf32, #tpu.memory_space<vmem>>, %arg15: memref<10x10x32xf32, #tpu.memory_space<vmem>>, %arg16: memref<14x14x2xf32, #tpu.memory_space<vmem>>) attributes {dimension_semantics = [#tpu.dimension_semantics<parallel>], iteration_bounds = array<i64: 2>, scalar_prefetch = 0 : i64, scratch_operands = 2 : i64, tpu.core_type = #tpu.core_type<tc>, window_params = [{transform_indices = @transform_0, window_bounds = array<i64: 1, 8, 8, 32>}, {pipeline_mode = #tpu.pipeline_mode<synchronous>, transform_indices = @transform_1, window_bounds = array<i64: 288, 32>}, {pipeline_mode = #tpu.pipeline_mode<synchronous>, transform_indices = @transform_2, window_bounds = array<i64: 1, 32>}, {pipeline_mode = #tpu.pipeline_mode<synchronous>, transform_indices = @transform_3, window_bounds = array<i64: 1, 32>}, {pipeline_mode = #tpu.pipeline_mode<synchronous>, transform_indices = @transform_4, window_bounds = array<i64: 288, 32>}, {pipeline_mode = #tpu.pipeline_mode<synchronous>, transform_indices = @transform_5, window_bounds = array<i64: 1, 32>}, {pipeline_mode = #tpu.pipeline_mode<synchronous>, transform_indices = @transform_6, window_bounds = array<i64: 1, 32>}, {pipeline_mode = #tpu.pipeline_mode<synchronous>, transform_indices = @transform_7, window_bounds = array<i64: 32, 2>}, {pipeline_mode = #tpu.pipeline_mode<synchronous>, transform_indices = @transform_8, window_bounds = array<i64: 1, 2>}, {pipeline_mode = #tpu.pipeline_mode<synchronous>, transform_indices = @transform_9, window_bounds = array<i64: 2, 32>}, {pipeline_mode = #tpu.pipeline_mode<synchronous>, transform_indices = @transform_10, window_bounds = array<i64: 1, 32>}, {pipeline_mode = #tpu.pipeline_mode<synchronous>, transform_indices = @transform_11, window_bounds = array<i64: 98, 1>}, {transform_indices = @transform_12, window_bounds = array<i64: 1>}, {transform_indices = @transform_13, window_bounds = array<i64: 1, 8, 8, 32>}]} {
    %c0 = arith.constant 0 : index
    %c0_0 = arith.constant 0 : index
    %c0_1 = arith.constant 0 : index
    %c0_2 = arith.constant 0 : index
    %0 = vector.load %arg1[%c0, %c0_0, %c0_1, %c0_2] : memref<1x8x8x32xf32, #tpu.memory_space<vmem>>, vector<1x8x8x32xf32>
    %1 = vector.shape_cast %0 : vector<1x8x8x32xf32> to vector<8x8x32xf32>
    %2 = vector.shape_cast %1 : vector<8x8x32xf32> to vector<64x32xf32>
    %cst = arith.constant 0.000000e+00 : f32
    %3 = vector.broadcast %cst : f32 to vector<10x10x32xf32>
    %c0_3 = arith.constant 0 : index
    %c0_4 = arith.constant 0 : index
    %c0_5 = arith.constant 0 : index
    %4 = vector.load %arg15[%c0_3, %c0_4, %c0_5] : memref<10x10x32xf32, #tpu.memory_space<vmem>>, vector<10x10x32xf32>
    tpu.vector_store %arg15[%c0_3, %c0_4, %c0_5], %3 {strides = array<i32>} : memref<10x10x32xf32, #tpu.memory_space<vmem>>, vector<10x10x32xf32>,
    %cst_6 = arith.constant 0.000000e+00 : f32
    %5 = vector.broadcast %cst_6 : f32 to vector<14x14x2xf32>
    %c0_7 = arith.constant 0 : index
    %c0_8 = arith.constant 0 : index
    %c0_9 = arith.constant 0 : index
    %6 = vector.load %arg16[%c0_7, %c0_8, %c0_9] : memref<14x14x2xf32, #tpu.memory_space<vmem>>, vector<14x14x2xf32>
    tpu.vector_store %arg16[%c0_7, %c0_8, %c0_9], %5 {strides = array<i32>} : memref<14x14x2xf32, #tpu.memory_space<vmem>>, vector<14x14x2xf32>,
    %c1 = arith.constant 1 : index
    %c1_10 = arith.constant 1 : index
    %c0_11 = arith.constant 0 : index
    %7 = vector.load %arg15[%c1, %c1_10, %c0_11] : memref<10x10x32xf32, #tpu.memory_space<vmem>>, vector<8x8x32xf32>
    tpu.vector_store %arg15[%c1, %c1_10, %c0_11], %1 {strides = array<i32>} : memref<10x10x32xf32, #tpu.memory_space<vmem>>, vector<8x8x32xf32>,
    %c0_12 = arith.constant 0 : index
    %c0_13 = arith.constant 0 : index
    %c0_14 = arith.constant 0 : index
    %8 = vector.load %arg15[%c0_12, %c0_13, %c0_14] : memref<10x10x32xf32, #tpu.memory_space<vmem>>, vector<10x10x32xf32>
    %9 = vector.extract_strided_slice %8 {offsets = [0, 0, 0], sizes = [8, 8, 32], strides = [1, 1, 1]} : vector<10x10x32xf32> to vector<8x8x32xf32>
    %10 = vector.shape_cast %9 : vector<8x8x32xf32> to vector<64x32xf32>
    %11 = vector.extract_strided_slice %8 {offsets = [0, 1, 0], sizes = [8, 8, 32], strides = [1, 1, 1]} : vector<10x10x32xf32> to vector<8x8x32xf32>
    %12 = vector.shape_cast %11 : vector<8x8x32xf32> to vector<64x32xf32>
    %13 = vector.extract_strided_slice %8 {offsets = [0, 2, 0], sizes = [8, 8, 32], strides = [1, 1, 1]} : vector<10x10x32xf32> to vector<8x8x32xf32>
    %14 = vector.shape_cast %13 : vector<8x8x32xf32> to vector<64x32xf32>
    %15 = vector.extract_strided_slice %8 {offsets = [1, 0, 0], sizes = [8, 8, 32], strides = [1, 1, 1]} : vector<10x10x32xf32> to vector<8x8x32xf32>
    %16 = vector.shape_cast %15 : vector<8x8x32xf32> to vector<64x32xf32>
    %17 = vector.extract_strided_slice %8 {offsets = [1, 1, 0], sizes = [8, 8, 32], strides = [1, 1, 1]} : vector<10x10x32xf32> to vector<8x8x32xf32>
    %18 = vector.shape_cast %17 : vector<8x8x32xf32> to vector<64x32xf32>
    %19 = vector.extract_strided_slice %8 {offsets = [1, 2, 0], sizes = [8, 8, 32], strides = [1, 1, 1]} : vector<10x10x32xf32> to vector<8x8x32xf32>
    %20 = vector.shape_cast %19 : vector<8x8x32xf32> to vector<64x32xf32>
    %21 = vector.extract_strided_slice %8 {offsets = [2, 0, 0], sizes = [8, 8, 32], strides = [1, 1, 1]} : vector<10x10x32xf32> to vector<8x8x32xf32>
    %22 = vector.shape_cast %21 : vector<8x8x32xf32> to vector<64x32xf32>
    %23 = vector.extract_strided_slice %8 {offsets = [2, 1, 0], sizes = [8, 8, 32], strides = [1, 1, 1]} : vector<10x10x32xf32> to vector<8x8x32xf32>
    %24 = vector.shape_cast %23 : vector<8x8x32xf32> to vector<64x32xf32>
    %25 = vector.extract_strided_slice %8 {offsets = [2, 2, 0], sizes = [8, 8, 32], strides = [1, 1, 1]} : vector<10x10x32xf32> to vector<8x8x32xf32>
    %26 = vector.shape_cast %25 : vector<8x8x32xf32> to vector<64x32xf32>
    %27 = tpu.concatenate %10, %12, %14, %16, %18, %20, %22, %24, %26 in 1 : vector<64x32xf32>, vector<64x32xf32>, vector<64x32xf32>, vector<64x32xf32>, vector<64x32xf32>, vector<64x32xf32>, vector<64x32xf32>, vector<64x32xf32>, vector<64x32xf32> -> vector<64x288xf32>
    %c0_15 = arith.constant 0 : index
    %c0_16 = arith.constant 0 : index
    %28 = vector.load %arg2[%c0_15, %c0_16] : memref<288x32xf32, #tpu.memory_space<vmem>>, vector<288x32xf32>
    %cst_17 = arith.constant dense<0.000000e+00> : vector<64x32xf32>
    %29 = tpu.matmul %27, %28, %cst_17 {dimension_numbers = #tpu.dot_dimension_numbers<[1], [0], [0], [1], [0, 0, 1, 1], [], []>} : vector<64x288xf32>, vector<288x32xf32>, vector<64x32xf32> -> vector<64x32xf32>
    %c0_18 = arith.constant 0 : index
    %c0_19 = arith.constant 0 : index
    %30 = vector.load %arg3[%c0_18, %c0_19] : memref<1x32xf32, #tpu.memory_space<vmem>>, vector<1x32xf32>
    %31 = vector.shape_cast %30 : vector<1x32xf32> to vector<32xf32>
    %32 = vector.shape_cast %31 : vector<32xf32> to vector<1x32xf32>
    %33 = vector.broadcast %32 : vector<1x32xf32> to vector<64x32xf32>
    %34 = arith.mulf %29, %33 : vector<64x32xf32>
    %c0_20 = arith.constant 0 : index
    %c0_21 = arith.constant 0 : index
    %35 = vector.load %arg4[%c0_20, %c0_21] : memref<1x32xf32, #tpu.memory_space<vmem>>, vector<1x32xf32>
    %36 = vector.shape_cast %35 : vector<1x32xf32> to vector<32xf32>
    %37 = vector.shape_cast %36 : vector<32xf32> to vector<1x32xf32>
    %38 = vector.broadcast %37 : vector<1x32xf32> to vector<64x32xf32>
    %39 = arith.addf %34, %38 : vector<64x32xf32>
    %cst_22 = arith.constant 0.000000e+00 : f32
    %40 = vector.broadcast %cst_22 : f32 to vector<64x32xf32>
    %41 = arith.maximumf %39, %40 : vector<64x32xf32>
    %42 = vector.shape_cast %41 : vector<64x32xf32> to vector<8x8x32xf32>
    %c1_23 = arith.constant 1 : index
    %c1_24 = arith.constant 1 : index
    %c0_25 = arith.constant 0 : index
    %43 = vector.load %arg15[%c1_23, %c1_24, %c0_25] : memref<10x10x32xf32, #tpu.memory_space<vmem>>, vector<8x8x32xf32>
    tpu.vector_store %arg15[%c1_23, %c1_24, %c0_25], %42 {strides = array<i32>} : memref<10x10x32xf32, #tpu.memory_space<vmem>>, vector<8x8x32xf32>,
    %c0_26 = arith.constant 0 : index
    %c0_27 = arith.constant 0 : index
    %c0_28 = arith.constant 0 : index
    %44 = vector.load %arg15[%c0_26, %c0_27, %c0_28] : memref<10x10x32xf32, #tpu.memory_space<vmem>>, vector<10x10x32xf32>
    %45 = vector.extract_strided_slice %44 {offsets = [0, 0, 0], sizes = [8, 8, 32], strides = [1, 1, 1]} : vector<10x10x32xf32> to vector<8x8x32xf32>
    %46 = vector.shape_cast %45 : vector<8x8x32xf32> to vector<64x32xf32>
    %47 = vector.extract_strided_slice %44 {offsets = [0, 1, 0], sizes = [8, 8, 32], strides = [1, 1, 1]} : vector<10x10x32xf32> to vector<8x8x32xf32>
    %48 = vector.shape_cast %47 : vector<8x8x32xf32> to vector<64x32xf32>
    %49 = vector.extract_strided_slice %44 {offsets = [0, 2, 0], sizes = [8, 8, 32], strides = [1, 1, 1]} : vector<10x10x32xf32> to vector<8x8x32xf32>
    %50 = vector.shape_cast %49 : vector<8x8x32xf32> to vector<64x32xf32>
    %51 = vector.extract_strided_slice %44 {offsets = [1, 0, 0], sizes = [8, 8, 32], strides = [1, 1, 1]} : vector<10x10x32xf32> to vector<8x8x32xf32>
    %52 = vector.shape_cast %51 : vector<8x8x32xf32> to vector<64x32xf32>
    %53 = vector.extract_strided_slice %44 {offsets = [1, 1, 0], sizes = [8, 8, 32], strides = [1, 1, 1]} : vector<10x10x32xf32> to vector<8x8x32xf32>
    %54 = vector.shape_cast %53 : vector<8x8x32xf32> to vector<64x32xf32>
    %55 = vector.extract_strided_slice %44 {offsets = [1, 2, 0], sizes = [8, 8, 32], strides = [1, 1, 1]} : vector<10x10x32xf32> to vector<8x8x32xf32>
    %56 = vector.shape_cast %55 : vector<8x8x32xf32> to vector<64x32xf32>
    %57 = vector.extract_strided_slice %44 {offsets = [2, 0, 0], sizes = [8, 8, 32], strides = [1, 1, 1]} : vector<10x10x32xf32> to vector<8x8x32xf32>
    %58 = vector.shape_cast %57 : vector<8x8x32xf32> to vector<64x32xf32>
    %59 = vector.extract_strided_slice %44 {offsets = [2, 1, 0], sizes = [8, 8, 32], strides = [1, 1, 1]} : vector<10x10x32xf32> to vector<8x8x32xf32>
    %60 = vector.shape_cast %59 : vector<8x8x32xf32> to vector<64x32xf32>
    %61 = vector.extract_strided_slice %44 {offsets = [2, 2, 0], sizes = [8, 8, 32], strides = [1, 1, 1]} : vector<10x10x32xf32> to vector<8x8x32xf32>
    %62 = vector.shape_cast %61 : vector<8x8x32xf32> to vector<64x32xf32>
    %63 = tpu.concatenate %46, %48, %50, %52, %54, %56, %58, %60, %62 in 1 : vector<64x32xf32>, vector<64x32xf32>, vector<64x32xf32>, vector<64x32xf32>, vector<64x32xf32>, vector<64x32xf32>, vector<64x32xf32>, vector<64x32xf32>, vector<64x32xf32> -> vector<64x288xf32>
    %c0_29 = arith.constant 0 : index
    %c0_30 = arith.constant 0 : index
    %64 = vector.load %arg5[%c0_29, %c0_30] : memref<288x32xf32, #tpu.memory_space<vmem>>, vector<288x32xf32>
    %cst_31 = arith.constant dense<0.000000e+00> : vector<64x32xf32>
    %65 = tpu.matmul %63, %64, %cst_31 {dimension_numbers = #tpu.dot_dimension_numbers<[1], [0], [0], [1], [0, 0, 1, 1], [], []>} : vector<64x288xf32>, vector<288x32xf32>, vector<64x32xf32> -> vector<64x32xf32>
    %c0_32 = arith.constant 0 : index
    %c0_33 = arith.constant 0 : index
    %66 = vector.load %arg6[%c0_32, %c0_33] : memref<1x32xf32, #tpu.memory_space<vmem>>, vector<1x32xf32>
    %67 = vector.shape_cast %66 : vector<1x32xf32> to vector<32xf32>
    %68 = vector.shape_cast %67 : vector<32xf32> to vector<1x32xf32>
    %69 = vector.broadcast %68 : vector<1x32xf32> to vector<64x32xf32>
    %70 = arith.mulf %65, %69 : vector<64x32xf32>
    %c0_34 = arith.constant 0 : index
    %c0_35 = arith.constant 0 : index
    %71 = vector.load %arg7[%c0_34, %c0_35] : memref<1x32xf32, #tpu.memory_space<vmem>>, vector<1x32xf32>
    %72 = vector.shape_cast %71 : vector<1x32xf32> to vector<32xf32>
    %73 = vector.shape_cast %72 : vector<32xf32> to vector<1x32xf32>
    %74 = vector.broadcast %73 : vector<1x32xf32> to vector<64x32xf32>
    %75 = arith.addf %70, %74 : vector<64x32xf32>
    %cst_36 = arith.constant dense<0.000000e+00> : vector<32xf32>
    %76 = vector.multi_reduction <add>, %75, %cst_36 [0] : vector<64x32xf32> to vector<32xf32>
    %77 = vector.shape_cast %76 : vector<32xf32> to vector<1x32xf32>
    %cst_37 = arith.constant 6.400000e+01 : f32
    %78 = vector.broadcast %cst_37 : f32 to vector<1x32xf32>
    %79 = arith.divf %77, %78 : vector<1x32xf32>
    %cst_38 = arith.constant dense<0xFF800000> : vector<32xf32>
    %80 = vector.multi_reduction <maximumf>, %75, %cst_38 [0] : vector<64x32xf32> to vector<32xf32>
    %81 = vector.shape_cast %80 : vector<32xf32> to vector<1x32xf32>
    %82 = tpu.concatenate %79, %81 in 0 : vector<1x32xf32>, vector<1x32xf32> -> vector<2x32xf32>
    %c0_39 = arith.constant 0 : index
    %c0_40 = arith.constant 0 : index
    %83 = vector.load %arg8[%c0_39, %c0_40] : memref<32x2xf32, #tpu.memory_space<vmem>>, vector<32x2xf32>
    %cst_41 = arith.constant dense<0.000000e+00> : vector<2x2xf32>
    %84 = tpu.matmul %82, %83, %cst_41 {dimension_numbers = #tpu.dot_dimension_numbers<[1], [0], [0], [1], [0, 0, 1, 1], [], []>} : vector<2x32xf32>, vector<32x2xf32>, vector<2x2xf32> -> vector<2x2xf32>
    %c0_42 = arith.constant 0 : index
    %c0_43 = arith.constant 0 : index
    %85 = vector.load %arg9[%c0_42, %c0_43] : memref<1x2xf32, #tpu.memory_space<vmem>>, vector<1x2xf32>
    %86 = vector.broadcast %85 : vector<1x2xf32> to vector<2x2xf32>
    %87 = arith.addf %84, %86 : vector<2x2xf32>
    %cst_44 = arith.constant 0.000000e+00 : f32
    %88 = vector.broadcast %cst_44 : f32 to vector<2x2xf32>
    %89 = arith.maximumf %87, %88 : vector<2x2xf32>
    %c0_45 = arith.constant 0 : index
    %c0_46 = arith.constant 0 : index
    %90 = vector.load %arg10[%c0_45, %c0_46] : memref<2x32xf32, #tpu.memory_space<vmem>>, vector<2x32xf32>
    %cst_47 = arith.constant dense<0.000000e+00> : vector<2x32xf32>
    %91 = tpu.matmul %89, %90, %cst_47 {dimension_numbers = #tpu.dot_dimension_numbers<[1], [0], [0], [1], [0, 0, 1, 1], [], []>} : vector<2x2xf32>, vector<2x32xf32>, vector<2x32xf32> -> vector<2x32xf32>
    %c0_48 = arith.constant 0 : index
    %c0_49 = arith.constant 0 : index
    %92 = vector.load %arg11[%c0_48, %c0_49] : memref<1x32xf32, #tpu.memory_space<vmem>>, vector<1x32xf32>
    %93 = vector.broadcast %92 : vector<1x32xf32> to vector<2x32xf32>
    %94 = arith.addf %91, %93 : vector<2x32xf32>
    %95 = vector.extract_strided_slice %94 {offsets = [0, 0], sizes = [1, 32], strides = [1, 1]} : vector<2x32xf32> to vector<1x32xf32>
    %96 = vector.extract_strided_slice %94 {offsets = [1, 0], sizes = [1, 32], strides = [1, 1]} : vector<2x32xf32> to vector<1x32xf32>
    %97 = arith.addf %95, %96 : vector<1x32xf32>
    %98 = arith.negf %97 : vector<1x32xf32>
    %99 = math.exp %98 : vector<1x32xf32>
    %cst_50 = arith.constant 1.000000e+00 : f32
    %100 = vector.broadcast %cst_50 : f32 to vector<1x32xf32>
    %101 = arith.addf %100, %99 : vector<1x32xf32>
    %102 = arith.divf %100, %101 : vector<1x32xf32>
    %103 = vector.broadcast %102 : vector<1x32xf32> to vector<64x32xf32>
    %104 = arith.mulf %75, %103 : vector<64x32xf32>
    %cst_51 = arith.constant dense<0xFF800000> : vector<64xf32>
    %105 = vector.multi_reduction <maximumf>, %104, %cst_51 [1] : vector<64x32xf32> to vector<64xf32>
    %106 = vector.shape_cast %105 : vector<64xf32> to vector<64x1xf32>
    %cst_52 = arith.constant dense<0.000000e+00> : vector<64xf32>
    %107 = vector.multi_reduction <add>, %104, %cst_52 [1] : vector<64x32xf32> to vector<64xf32>
    %108 = vector.shape_cast %107 : vector<64xf32> to vector<64x1xf32>
    %cst_53 = arith.constant 3.200000e+01 : f32
    %109 = vector.broadcast %cst_53 : f32 to vector<64x1xf32>
    %110 = arith.divf %108, %109 : vector<64x1xf32>
    %111 = tpu.concatenate %106, %110 in 1 : vector<64x1xf32>, vector<64x1xf32> -> vector<64x2xf32>
    %112 = vector.shape_cast %111 : vector<64x2xf32> to vector<8x8x2xf32>
    %c3 = arith.constant 3 : index
    %c3_54 = arith.constant 3 : index
    %c0_55 = arith.constant 0 : index
    %113 = vector.load %arg16[%c3, %c3_54, %c0_55] : memref<14x14x2xf32, #tpu.memory_space<vmem>>, vector<8x8x2xf32>
    tpu.vector_store %arg16[%c3, %c3_54, %c0_55], %112 {strides = array<i32>} : memref<14x14x2xf32, #tpu.memory_space<vmem>>, vector<8x8x2xf32>,
    %c0_56 = arith.constant 0 : index
    %c0_57 = arith.constant 0 : index
    %c0_58 = arith.constant 0 : index
    %114 = vector.load %arg16[%c0_56, %c0_57, %c0_58] : memref<14x14x2xf32, #tpu.memory_space<vmem>>, vector<14x14x2xf32>
    %115 = vector.extract_strided_slice %114 {offsets = [0, 0, 0], sizes = [8, 8, 2], strides = [1, 1, 1]} : vector<14x14x2xf32> to vector<8x8x2xf32>
    %116 = vector.shape_cast %115 : vector<8x8x2xf32> to vector<64x2xf32>
    %117 = vector.extract_strided_slice %114 {offsets = [0, 1, 0], sizes = [8, 8, 2], strides = [1, 1, 1]} : vector<14x14x2xf32> to vector<8x8x2xf32>
    %118 = vector.shape_cast %117 : vector<8x8x2xf32> to vector<64x2xf32>
    %119 = vector.extract_strided_slice %114 {offsets = [0, 2, 0], sizes = [8, 8, 2], strides = [1, 1, 1]} : vector<14x14x2xf32> to vector<8x8x2xf32>
    %120 = vector.shape_cast %119 : vector<8x8x2xf32> to vector<64x2xf32>
    %121 = vector.extract_strided_slice %114 {offsets = [0, 3, 0], sizes = [8, 8, 2], strides = [1, 1, 1]} : vector<14x14x2xf32> to vector<8x8x2xf32>
    %122 = vector.shape_cast %121 : vector<8x8x2xf32> to vector<64x2xf32>
    %123 = vector.extract_strided_slice %114 {offsets = [0, 4, 0], sizes = [8, 8, 2], strides = [1, 1, 1]} : vector<14x14x2xf32> to vector<8x8x2xf32>
    %124 = vector.shape_cast %123 : vector<8x8x2xf32> to vector<64x2xf32>
    %125 = vector.extract_strided_slice %114 {offsets = [0, 5, 0], sizes = [8, 8, 2], strides = [1, 1, 1]} : vector<14x14x2xf32> to vector<8x8x2xf32>
    %126 = vector.shape_cast %125 : vector<8x8x2xf32> to vector<64x2xf32>
    %127 = vector.extract_strided_slice %114 {offsets = [0, 6, 0], sizes = [8, 8, 2], strides = [1, 1, 1]} : vector<14x14x2xf32> to vector<8x8x2xf32>
    %128 = vector.shape_cast %127 : vector<8x8x2xf32> to vector<64x2xf32>
    %129 = vector.extract_strided_slice %114 {offsets = [1, 0, 0], sizes = [8, 8, 2], strides = [1, 1, 1]} : vector<14x14x2xf32> to vector<8x8x2xf32>
    %130 = vector.shape_cast %129 : vector<8x8x2xf32> to vector<64x2xf32>
    %131 = vector.extract_strided_slice %114 {offsets = [1, 1, 0], sizes = [8, 8, 2], strides = [1, 1, 1]} : vector<14x14x2xf32> to vector<8x8x2xf32>
    %132 = vector.shape_cast %131 : vector<8x8x2xf32> to vector<64x2xf32>
    %133 = vector.extract_strided_slice %114 {offsets = [1, 2, 0], sizes = [8, 8, 2], strides = [1, 1, 1]} : vector<14x14x2xf32> to vector<8x8x2xf32>
    %134 = vector.shape_cast %133 : vector<8x8x2xf32> to vector<64x2xf32>
    %135 = vector.extract_strided_slice %114 {offsets = [1, 3, 0], sizes = [8, 8, 2], strides = [1, 1, 1]} : vector<14x14x2xf32> to vector<8x8x2xf32>
    %136 = vector.shape_cast %135 : vector<8x8x2xf32> to vector<64x2xf32>
    %137 = vector.extract_strided_slice %114 {offsets = [1, 4, 0], sizes = [8, 8, 2], strides = [1, 1, 1]} : vector<14x14x2xf32> to vector<8x8x2xf32>
    %138 = vector.shape_cast %137 : vector<8x8x2xf32> to vector<64x2xf32>
    %139 = vector.extract_strided_slice %114 {offsets = [1, 5, 0], sizes = [8, 8, 2], strides = [1, 1, 1]} : vector<14x14x2xf32> to vector<8x8x2xf32>
    %140 = vector.shape_cast %139 : vector<8x8x2xf32> to vector<64x2xf32>
    %141 = vector.extract_strided_slice %114 {offsets = [1, 6, 0], sizes = [8, 8, 2], strides = [1, 1, 1]} : vector<14x14x2xf32> to vector<8x8x2xf32>
    %142 = vector.shape_cast %141 : vector<8x8x2xf32> to vector<64x2xf32>
    %143 = vector.extract_strided_slice %114 {offsets = [2, 0, 0], sizes = [8, 8, 2], strides = [1, 1, 1]} : vector<14x14x2xf32> to vector<8x8x2xf32>
    %144 = vector.shape_cast %143 : vector<8x8x2xf32> to vector<64x2xf32>
    %145 = vector.extract_strided_slice %114 {offsets = [2, 1, 0], sizes = [8, 8, 2], strides = [1, 1, 1]} : vector<14x14x2xf32> to vector<8x8x2xf32>
    %146 = vector.shape_cast %145 : vector<8x8x2xf32> to vector<64x2xf32>
    %147 = vector.extract_strided_slice %114 {offsets = [2, 2, 0], sizes = [8, 8, 2], strides = [1, 1, 1]} : vector<14x14x2xf32> to vector<8x8x2xf32>
    %148 = vector.shape_cast %147 : vector<8x8x2xf32> to vector<64x2xf32>
    %149 = vector.extract_strided_slice %114 {offsets = [2, 3, 0], sizes = [8, 8, 2], strides = [1, 1, 1]} : vector<14x14x2xf32> to vector<8x8x2xf32>
    %150 = vector.shape_cast %149 : vector<8x8x2xf32> to vector<64x2xf32>
    %151 = vector.extract_strided_slice %114 {offsets = [2, 4, 0], sizes = [8, 8, 2], strides = [1, 1, 1]} : vector<14x14x2xf32> to vector<8x8x2xf32>
    %152 = vector.shape_cast %151 : vector<8x8x2xf32> to vector<64x2xf32>
    %153 = vector.extract_strided_slice %114 {offsets = [2, 5, 0], sizes = [8, 8, 2], strides = [1, 1, 1]} : vector<14x14x2xf32> to vector<8x8x2xf32>
    %154 = vector.shape_cast %153 : vector<8x8x2xf32> to vector<64x2xf32>
    %155 = vector.extract_strided_slice %114 {offsets = [2, 6, 0], sizes = [8, 8, 2], strides = [1, 1, 1]} : vector<14x14x2xf32> to vector<8x8x2xf32>
    %156 = vector.shape_cast %155 : vector<8x8x2xf32> to vector<64x2xf32>
    %157 = vector.extract_strided_slice %114 {offsets = [3, 0, 0], sizes = [8, 8, 2], strides = [1, 1, 1]} : vector<14x14x2xf32> to vector<8x8x2xf32>
    %158 = vector.shape_cast %157 : vector<8x8x2xf32> to vector<64x2xf32>
    %159 = vector.extract_strided_slice %114 {offsets = [3, 1, 0], sizes = [8, 8, 2], strides = [1, 1, 1]} : vector<14x14x2xf32> to vector<8x8x2xf32>
    %160 = vector.shape_cast %159 : vector<8x8x2xf32> to vector<64x2xf32>
    %161 = vector.extract_strided_slice %114 {offsets = [3, 2, 0], sizes = [8, 8, 2], strides = [1, 1, 1]} : vector<14x14x2xf32> to vector<8x8x2xf32>
    %162 = vector.shape_cast %161 : vector<8x8x2xf32> to vector<64x2xf32>
    %163 = vector.extract_strided_slice %114 {offsets = [3, 3, 0], sizes = [8, 8, 2], strides = [1, 1, 1]} : vector<14x14x2xf32> to vector<8x8x2xf32>
    %164 = vector.shape_cast %163 : vector<8x8x2xf32> to vector<64x2xf32>
    %165 = vector.extract_strided_slice %114 {offsets = [3, 4, 0], sizes = [8, 8, 2], strides = [1, 1, 1]} : vector<14x14x2xf32> to vector<8x8x2xf32>
    %166 = vector.shape_cast %165 : vector<8x8x2xf32> to vector<64x2xf32>
    %167 = vector.extract_strided_slice %114 {offsets = [3, 5, 0], sizes = [8, 8, 2], strides = [1, 1, 1]} : vector<14x14x2xf32> to vector<8x8x2xf32>
    %168 = vector.shape_cast %167 : vector<8x8x2xf32> to vector<64x2xf32>
    %169 = vector.extract_strided_slice %114 {offsets = [3, 6, 0], sizes = [8, 8, 2], strides = [1, 1, 1]} : vector<14x14x2xf32> to vector<8x8x2xf32>
    %170 = vector.shape_cast %169 : vector<8x8x2xf32> to vector<64x2xf32>
    %171 = vector.extract_strided_slice %114 {offsets = [4, 0, 0], sizes = [8, 8, 2], strides = [1, 1, 1]} : vector<14x14x2xf32> to vector<8x8x2xf32>
    %172 = vector.shape_cast %171 : vector<8x8x2xf32> to vector<64x2xf32>
    %173 = vector.extract_strided_slice %114 {offsets = [4, 1, 0], sizes = [8, 8, 2], strides = [1, 1, 1]} : vector<14x14x2xf32> to vector<8x8x2xf32>
    %174 = vector.shape_cast %173 : vector<8x8x2xf32> to vector<64x2xf32>
    %175 = vector.extract_strided_slice %114 {offsets = [4, 2, 0], sizes = [8, 8, 2], strides = [1, 1, 1]} : vector<14x14x2xf32> to vector<8x8x2xf32>
    %176 = vector.shape_cast %175 : vector<8x8x2xf32> to vector<64x2xf32>
    %177 = vector.extract_strided_slice %114 {offsets = [4, 3, 0], sizes = [8, 8, 2], strides = [1, 1, 1]} : vector<14x14x2xf32> to vector<8x8x2xf32>
    %178 = vector.shape_cast %177 : vector<8x8x2xf32> to vector<64x2xf32>
    %179 = vector.extract_strided_slice %114 {offsets = [4, 4, 0], sizes = [8, 8, 2], strides = [1, 1, 1]} : vector<14x14x2xf32> to vector<8x8x2xf32>
    %180 = vector.shape_cast %179 : vector<8x8x2xf32> to vector<64x2xf32>
    %181 = vector.extract_strided_slice %114 {offsets = [4, 5, 0], sizes = [8, 8, 2], strides = [1, 1, 1]} : vector<14x14x2xf32> to vector<8x8x2xf32>
    %182 = vector.shape_cast %181 : vector<8x8x2xf32> to vector<64x2xf32>
    %183 = vector.extract_strided_slice %114 {offsets = [4, 6, 0], sizes = [8, 8, 2], strides = [1, 1, 1]} : vector<14x14x2xf32> to vector<8x8x2xf32>
    %184 = vector.shape_cast %183 : vector<8x8x2xf32> to vector<64x2xf32>
    %185 = vector.extract_strided_slice %114 {offsets = [5, 0, 0], sizes = [8, 8, 2], strides = [1, 1, 1]} : vector<14x14x2xf32> to vector<8x8x2xf32>
    %186 = vector.shape_cast %185 : vector<8x8x2xf32> to vector<64x2xf32>
    %187 = vector.extract_strided_slice %114 {offsets = [5, 1, 0], sizes = [8, 8, 2], strides = [1, 1, 1]} : vector<14x14x2xf32> to vector<8x8x2xf32>
    %188 = vector.shape_cast %187 : vector<8x8x2xf32> to vector<64x2xf32>
    %189 = vector.extract_strided_slice %114 {offsets = [5, 2, 0], sizes = [8, 8, 2], strides = [1, 1, 1]} : vector<14x14x2xf32> to vector<8x8x2xf32>
    %190 = vector.shape_cast %189 : vector<8x8x2xf32> to vector<64x2xf32>
    %191 = vector.extract_strided_slice %114 {offsets = [5, 3, 0], sizes = [8, 8, 2], strides = [1, 1, 1]} : vector<14x14x2xf32> to vector<8x8x2xf32>
    %192 = vector.shape_cast %191 : vector<8x8x2xf32> to vector<64x2xf32>
    %193 = vector.extract_strided_slice %114 {offsets = [5, 4, 0], sizes = [8, 8, 2], strides = [1, 1, 1]} : vector<14x14x2xf32> to vector<8x8x2xf32>
    %194 = vector.shape_cast %193 : vector<8x8x2xf32> to vector<64x2xf32>
    %195 = vector.extract_strided_slice %114 {offsets = [5, 5, 0], sizes = [8, 8, 2], strides = [1, 1, 1]} : vector<14x14x2xf32> to vector<8x8x2xf32>
    %196 = vector.shape_cast %195 : vector<8x8x2xf32> to vector<64x2xf32>
    %197 = vector.extract_strided_slice %114 {offsets = [5, 6, 0], sizes = [8, 8, 2], strides = [1, 1, 1]} : vector<14x14x2xf32> to vector<8x8x2xf32>
    %198 = vector.shape_cast %197 : vector<8x8x2xf32> to vector<64x2xf32>
    %199 = vector.extract_strided_slice %114 {offsets = [6, 0, 0], sizes = [8, 8, 2], strides = [1, 1, 1]} : vector<14x14x2xf32> to vector<8x8x2xf32>
    %200 = vector.shape_cast %199 : vector<8x8x2xf32> to vector<64x2xf32>
    %201 = vector.extract_strided_slice %114 {offsets = [6, 1, 0], sizes = [8, 8, 2], strides = [1, 1, 1]} : vector<14x14x2xf32> to vector<8x8x2xf32>
    %202 = vector.shape_cast %201 : vector<8x8x2xf32> to vector<64x2xf32>
    %203 = vector.extract_strided_slice %114 {offsets = [6, 2, 0], sizes = [8, 8, 2], strides = [1, 1, 1]} : vector<14x14x2xf32> to vector<8x8x2xf32>
    %204 = vector.shape_cast %203 : vector<8x8x2xf32> to vector<64x2xf32>
    %205 = vector.extract_strided_slice %114 {offsets = [6, 3, 0], sizes = [8, 8, 2], strides = [1, 1, 1]} : vector<14x14x2xf32> to vector<8x8x2xf32>
    %206 = vector.shape_cast %205 : vector<8x8x2xf32> to vector<64x2xf32>
    %207 = vector.extract_strided_slice %114 {offsets = [6, 4, 0], sizes = [8, 8, 2], strides = [1, 1, 1]} : vector<14x14x2xf32> to vector<8x8x2xf32>
    %208 = vector.shape_cast %207 : vector<8x8x2xf32> to vector<64x2xf32>
    %209 = vector.extract_strided_slice %114 {offsets = [6, 5, 0], sizes = [8, 8, 2], strides = [1, 1, 1]} : vector<14x14x2xf32> to vector<8x8x2xf32>
    %210 = vector.shape_cast %209 : vector<8x8x2xf32> to vector<64x2xf32>
    %211 = vector.extract_strided_slice %114 {offsets = [6, 6, 0], sizes = [8, 8, 2], strides = [1, 1, 1]} : vector<14x14x2xf32> to vector<8x8x2xf32>
    %212 = vector.shape_cast %211 : vector<8x8x2xf32> to vector<64x2xf32>
    %213 = tpu.concatenate %116, %118, %120, %122, %124, %126, %128, %130, %132, %134, %136, %138, %140, %142, %144, %146 in 1 : vector<64x2xf32>, vector<64x2xf32>, vector<64x2xf32>, vector<64x2xf32>, vector<64x2xf32>, vector<64x2xf32>, vector<64x2xf32>, vector<64x2xf32>, vector<64x2xf32>, vector<64x2xf32>, vector<64x2xf32>, vector<64x2xf32>, vector<64x2xf32>, vector<64x2xf32>, vector<64x2xf32>, vector<64x2xf32> -> vector<64x32xf32>
    %214 = tpu.concatenate %148, %150, %152, %154, %156, %158, %160, %162, %164, %166, %168, %170, %172, %174, %176, %178 in 1 : vector<64x2xf32>, vector<64x2xf32>, vector<64x2xf32>, vector<64x2xf32>, vector<64x2xf32>, vector<64x2xf32>, vector<64x2xf32>, vector<64x2xf32>, vector<64x2xf32>, vector<64x2xf32>, vector<64x2xf32>, vector<64x2xf32>, vector<64x2xf32>, vector<64x2xf32>, vector<64x2xf32>, vector<64x2xf32> -> vector<64x32xf32>
    %215 = tpu.concatenate %180, %182, %184, %186, %188, %190, %192, %194, %196, %198, %200, %202, %204, %206, %208, %210 in 1 : vector<64x2xf32>, vector<64x2xf32>, vector<64x2xf32>, vector<64x2xf32>, vector<64x2xf32>, vector<64x2xf32>, vector<64x2xf32>, vector<64x2xf32>, vector<64x2xf32>, vector<64x2xf32>, vector<64x2xf32>, vector<64x2xf32>, vector<64x2xf32>, vector<64x2xf32>, vector<64x2xf32>, vector<64x2xf32> -> vector<64x32xf32>
    %216 = tpu.concatenate %213, %214, %215, %212 in 1 : vector<64x32xf32>, vector<64x32xf32>, vector<64x32xf32>, vector<64x2xf32> -> vector<64x98xf32>
    %c0_59 = arith.constant 0 : index
    %c0_60 = arith.constant 0 : index
    %217 = vector.load %arg12[%c0_59, %c0_60] : memref<98x1xf32, #tpu.memory_space<vmem>>, vector<98x1xf32>
    %cst_61 = arith.constant dense<0.000000e+00> : vector<64x1xf32>
    %218 = tpu.matmul %216, %217, %cst_61 {dimension_numbers = #tpu.dot_dimension_numbers<[1], [0], [0], [1], [0, 0, 1, 1], [], []>} : vector<64x98xf32>, vector<98x1xf32>, vector<64x1xf32> -> vector<64x1xf32>
    %c0_62 = arith.constant 0 : index
    %219 = memref.load %arg13[%c0_62] : memref<1xf32, #tpu.memory_space<smem>>
    %220 = vector.broadcast %219 : f32 to vector<64x1xf32>
    %221 = arith.addf %218, %220 : vector<64x1xf32>
    %222 = arith.negf %221 : vector<64x1xf32>
    %223 = math.exp %222 : vector<64x1xf32>
    %cst_63 = arith.constant 1.000000e+00 : f32
    %224 = vector.broadcast %cst_63 : f32 to vector<64x1xf32>
    %225 = arith.addf %224, %223 : vector<64x1xf32>
    %226 = arith.divf %224, %225 : vector<64x1xf32>
    %227 = vector.broadcast %226 : vector<64x1xf32> to vector<64x32xf32>
    %228 = arith.mulf %104, %227 : vector<64x32xf32>
    %229 = arith.addf %228, %2 : vector<64x32xf32>
    %cst_64 = arith.constant 0.000000e+00 : f32
    %230 = vector.broadcast %cst_64 : f32 to vector<64x32xf32>
    %231 = arith.maximumf %229, %230 : vector<64x32xf32>
    %232 = vector.shape_cast %231 : vector<64x32xf32> to vector<8x8x32xf32>
    %c0_65 = arith.constant 0 : index
    %c0_66 = arith.constant 0 : index
    %c0_67 = arith.constant 0 : index
    %c0_68 = arith.constant 0 : index
    %233 = vector.load %arg14[%c0_65, %c0_66, %c0_67, %c0_68] : memref<1x8x8x32xf32, #tpu.memory_space<vmem>>, vector<1x8x8x32xf32>
    %234 = vector.shape_cast %233 : vector<1x8x8x32xf32> to vector<8x8x32xf32>
    %235 = vector.shape_cast %232 : vector<8x8x32xf32> to vector<1x8x8x32xf32>
    tpu.vector_store %arg14[%c0_65, %c0_66, %c0_67, %c0_68], %235 {strides = array<i32>} : memref<1x8x8x32xf32, #tpu.memory_space<vmem>>, vector<1x8x8x32xf32>,
    return
  }
  func.func @transform_0(%arg0: i32) -> (i32, i32, i32, i32) {
    %c0_i32 = arith.constant 0 : i32
    %c0_i32_0 = arith.constant 0 : i32
    %c0_i32_1 = arith.constant 0 : i32
    %c0_i32_2 = arith.constant 0 : i32
    return %arg0, %c0_i32, %c0_i32_0, %c0_i32_1 : i32, i32, i32, i32
  }
  func.func @transform_1(%arg0: i32) -> (i32, i32) {
    %c0_i32 = arith.constant 0 : i32
    %c0_i32_0 = arith.constant 0 : i32
    %c0_i32_1 = arith.constant 0 : i32
    return %c0_i32, %c0_i32_0 : i32, i32
  }
  func.func @transform_2(%arg0: i32) -> (i32, i32) {
    %c0_i32 = arith.constant 0 : i32
    %c0_i32_0 = arith.constant 0 : i32
    %c0_i32_1 = arith.constant 0 : i32
    return %c0_i32, %c0_i32_0 : i32, i32
  }
  func.func @transform_3(%arg0: i32) -> (i32, i32) {
    %c0_i32 = arith.constant 0 : i32
    %c0_i32_0 = arith.constant 0 : i32
    %c0_i32_1 = arith.constant 0 : i32
    return %c0_i32, %c0_i32_0 : i32, i32
  }
  func.func @transform_4(%arg0: i32) -> (i32, i32) {
    %c0_i32 = arith.constant 0 : i32
    %c0_i32_0 = arith.constant 0 : i32
    %c0_i32_1 = arith.constant 0 : i32
    return %c0_i32, %c0_i32_0 : i32, i32
  }
  func.func @transform_5(%arg0: i32) -> (i32, i32) {
    %c0_i32 = arith.constant 0 : i32
    %c0_i32_0 = arith.constant 0 : i32
    %c0_i32_1 = arith.constant 0 : i32
    return %c0_i32, %c0_i32_0 : i32, i32
  }
  func.func @transform_6(%arg0: i32) -> (i32, i32) {
    %c0_i32 = arith.constant 0 : i32
    %c0_i32_0 = arith.constant 0 : i32
    %c0_i32_1 = arith.constant 0 : i32
    return %c0_i32, %c0_i32_0 : i32, i32
  }
  func.func @transform_7(%arg0: i32) -> (i32, i32) {
    %c0_i32 = arith.constant 0 : i32
    %c0_i32_0 = arith.constant 0 : i32
    %c0_i32_1 = arith.constant 0 : i32
    return %c0_i32, %c0_i32_0 : i32, i32
  }
  func.func @transform_8(%arg0: i32) -> (i32, i32) {
    %c0_i32 = arith.constant 0 : i32
    %c0_i32_0 = arith.constant 0 : i32
    %c0_i32_1 = arith.constant 0 : i32
    return %c0_i32, %c0_i32_0 : i32, i32
  }
  func.func @transform_9(%arg0: i32) -> (i32, i32) {
    %c0_i32 = arith.constant 0 : i32
    %c0_i32_0 = arith.constant 0 : i32
    %c0_i32_1 = arith.constant 0 : i32
    return %c0_i32, %c0_i32_0 : i32, i32
  }
  func.func @transform_10(%arg0: i32) -> (i32, i32) {
    %c0_i32 = arith.constant 0 : i32
    %c0_i32_0 = arith.constant 0 : i32
    %c0_i32_1 = arith.constant 0 : i32
    return %c0_i32, %c0_i32_0 : i32, i32
  }
  func.func @transform_11(%arg0: i32) -> (i32, i32) {
    %c0_i32 = arith.constant 0 : i32
    %c0_i32_0 = arith.constant 0 : i32
    %c0_i32_1 = arith.constant 0 : i32
    return %c0_i32, %c0_i32_0 : i32, i32
  }
  func.func @transform_12(%arg0: i32) -> i32 {
    %c0_i32 = arith.constant 0 : i32
    %c0_i32_0 = arith.constant 0 : i32
    return %c0_i32 : i32
  }
  func.func @transform_13(%arg0: i32) -> (i32, i32, i32, i32) {
    %c0_i32 = arith.constant 0 : i32
    %c0_i32_0 = arith.constant 0 : i32
    %c0_i32_1 = arith.constant 0 : i32
    %c0_i32_2 = arith.constant 0 : i32
    return %arg0, %c0_i32, %c0_i32_0, %c0_i32_1 : i32, i32, i32, i32
  }
}

</mosaic_0001>

<bundles_post_ra>
// kernel: cbam_basic_block.1
= control target key start
LH: loop header
LB: loop body
LE: loop exit
PB: predicated region body
PF: predicated region fallthrough
CT: control target
= control target key end

     0   :  { %s8958_s0 = inlined_call_operand.vmem [shape: f32[2,8,8,32], index: 0, kind: input, shape index: {}]   ;;  %s8959_s1 = inlined_call_operand.vmem [shape: f32[288,32], index: 1, kind: input, shape index: {}]   ;;  %s8960_s2 = inlined_call_operand.vmem [shape: f32[1,32], index: 2, kind: input, shape index: {}]   ;;  %s8961_s3 = inlined_call_operand.vmem [shape: f32[1,32], index: 3, kind: input, shape index: {}]   ;;  %s8962_s4 = inlined_call_operand.vmem [shape: f32[288,32], index: 4, kind: input, shape index: {}]   ;;  %s8963_s5 = inlined_call_operand.vmem [shape: f32[1,32], index: 5, kind: input, shape index: {}]   ;;  %s8964_s6 = inlined_call_operand.vmem [shape: f32[1,32], index: 6, kind: input, shape index: {}]   ;;  %s8965_s7 = inlined_call_operand.vmem [shape: f32[32,2], index: 7, kind: input, shape index: {}]   ;;  %s8966_s8 = inlined_call_operand.vmem [shape: f32[1,2], index: 8, kind: input, shape index: {}]   ;;  %s8967_s9 = inlined_call_operand.vmem [shape: f32[2,32], index: 9, kind: input, shape index: {}]   ;;  %s8968_s10 = inlined_call_operand.vmem [shape: f32[1,32], index: 10, kind: input, shape index: {}]   ;;  %s8969_s11 = inlined_call_operand.vmem [shape: f32[98,1], index: 11, kind: input, shape index: {}]   ;;  %s8970_s12 = inlined_call_operand.<no memory space> [shape: f32[1], index: 12, kind: input, shape index: {}]   ;;  %s8971_s13 = inlined_call_operand.hbm [shape: f32[2,8,8,32], index: 13, kind: output, shape index: {}]  }
   0x1   :  { %9044 = sst [smem:[#allocation286_spill]] %s8958_s0 }
   0x2   :  { %9045 = sst [smem:[#allocation287_spill]] %s8959_s1 }
   0x3   :  { %18 = sst [smem:[#allocation4]] %s8970_s12 }
   0x4   :  { %19 = vsyncpa [#allocation6], 0 }
   0x5   :  { %21 = vsyncpa [#allocation6 + $0x1], 0  ;;  %s5200_s27 = smov 0   ;;  %s5202_s28 = smov 0  }
   0x6   :  { %s5204_s29 = smov 0   ;;  %s5206_s30 = smov 0  }
   0x7 LB: > { %9046 = sst [smem:[#allocation8_spill]] %s5097_s29  ;;  %s5221_s12 = sadd.s32 4294967295, %s5101_s30   ;;  %s5101_s30 = sphi %s5206_s30, %s9670_s30   ;;  %s5097_s29 = sphi %s5204_s29, %s9675_s29   ;;  %s5093_s28 = sphi %s5202_s28, %s9674_s28   ;;  %s5089_s27 = sphi %s5200_s27, %s9673_s27  }
   0x8   : > { %s4263_s14 = sadd.s32 4294967294, %s5101_s30   ;;  %s5225_s15 = sadd.s32 1, %s5101_s30  }
   0x9   : > { %9047 = sst [smem:[#allocation9_spill]] %s5225_s15  ;;  %s312_s16 = sadd.s32 1, %s5097_s29 }
   0xa   : > { %s309_s17 = ssub.s32 %s5101_s30, %s5225_s15  ;;  %p322_p0 = scmp.ne.s32.totalorder %s5097_s29, %s5093_s28 }
   0xb   : > { %p310_p1 = scmp.eq.s32.totalorder %s309_s17, 0  ;;  %p323_p2 = scmp.eq.s32.totalorder %s5221_s12, 1 }
   0xc   : > { %p328_p3 = scmp.ne.s32.totalorder %s5093_s28, %s5089_s27  ;;  %p329_p4 = scmp.eq.s32.totalorder %s4263_s14, 1 }
   0xd   : > { %s5236_s18 = scalar_select %p310_p1, %s5097_s29, %s312_s16  }
   0xe   : > { %p5238_p5 = por %p323_p2, %p322_p0  ;;  %p5242_p6 = por %p329_p4, %p328_p3 }
   0xf   : > { %9048 = sst [smem:[#allocation10_spill]] %s5236_s18  ;;  %p4266_p7 = scmp.ge.s32.totalorder %s5101_s30, 1 }
  0x10   : > { %s9050_s20 = scalar_select %p5242_p6, 1, 0 }
  0x11   : > { %p391_p8 = scmp.lt.s32.totalorder %s5101_s30, 3 }
  0x12   : > { %9051 = sst [smem:[#allocation11_spill]] %s9050_s20 }
  0x13   : > { %p392_p9 = pnand %p4266_p7, %p391_p8 }
  0x15   : > { %395 = sbr.rel (%p392_p9) target bundleno = 2721 (0xaa1), region = 72 }
  0x1c   : > { %p435_p10 = scmp.lt.s32.totalorder %s5221_s12, 1  ;;  %vm9039_vm0 = vcmask 261120   ;;  %vm450_vm1 = vcmask 254976   ;;  %v5103_v0 = vmov 0.0   ;;  %s9052_s1 = sld [smem:[#allocation287_spill]]  ;;  %vm570_vm2 = vcmask 1045504  }
  0x1d   : > { %449 = vst.msk [vmem:[#allocation2] sm:$0xff] %vm9039_vm0, %v5103_v0  ;;  %454 = vst.msk [vmem:[#allocation2 + $0x20] sm:$0xff] %vm9039_vm0, %v5103_v0  ;;  %s9053_s0 = sld [smem:[#allocation286_spill]]  ;;  %vm545_vm3 = vcmask 1046528   ;;  %s8978_s22 = smov 64   ;;  %vm9038_vm4 = vcmask 523264  }
  0x1e   : > { %451 = vst.msk [vmem:[#allocation2 + $0x8] sm:$0x3] %vm450_vm1, %v5103_v0  ;;  %455 = vst.msk [vmem:[#allocation2 + $0x28] sm:$0x3] %vm450_vm1, %v5103_v0  ;;  %s436_s14 = scalar_select %p435_p10, %s5221_s12, 1  ;;  %vm9037_vm5 = vcmask 785408  }
  0x1f   : > { %452 = vst.msk [vmem:[#allocation2 + $0x10] sm:$0xff] %vm9039_vm0, %v5103_v0  ;;  %456 = vst.msk [vmem:[#allocation2 + $0x30] sm:$0xff] %vm9039_vm0, %v5103_v0  ;;  %s8976_s17 = smov 96   ;;  %vm5108_vm6 = vmmov 0   ;;  %vm1757_vm7 = vcmask 1040384   ;;  %vm470_vm8 = vcmask 15360  }
  0x20   : > { %453 = vst.msk [vmem:[#allocation2 + $0x18] sm:$0x3] %vm450_vm1, %v5103_v0  ;;  %457 = vst.msk [vmem:[#allocation2 + $0x38] sm:$0x3] %vm450_vm1, %v5103_v0  ;;  %s4318_s29 = sshll.u32 %s436_s14, 6  ;;  %vm472_vm9 = vcmask 13312  }
  0x21   : > { %458 = vst.msk [vmem:[#allocation2 + $0x40] sm:$0xff] %vm9039_vm0, %v5103_v0  ;;  %460 = vst.msk [vmem:[#allocation2 + $0x50] sm:$0xff] %vm9039_vm0, %v5103_v0  ;;  %vm9040_vm10 = vcmask 1041408   ;;  %s8994_s25 = smov 2   ;;  %s8992_s26 = smov 4   ;;  %vm2118_vm11 = vcmask 1044480  }
  0x22   : > { %459 = vst.msk [vmem:[#allocation2 + $0x48] sm:$0x3] %vm450_vm1, %v5103_v0  ;;  %461 = vst.msk [vmem:[#allocation2 + $0x58] sm:$0x3] %vm450_vm1, %v5103_v0  ;;  %v829_v1 = vld [vmem:[%s9052_s1 + $0x80] sm:$0xff]  ;;  %v830_v2 = vld [vmem:[%s9052_s1 + $0x88] sm:$0xff] }
  0x23   : > { %462 = vst.msk [vmem:[#allocation2 + $0x60] sm:$0xff] %vm9039_vm0, %v5103_v0  ;;  %464 = vst.msk [vmem:[#allocation2 + $0x70] sm:$0xff] %vm9039_vm0, %v5103_v0  ;;  %v813_v3 = vld [vmem:[%s9052_s1] sm:$0xff]  ;;  %v4578_v4 = vpack.c.bf16 %v830_v2, %v829_v1  ;;  %v814_v5 = vld [vmem:[%s9052_s1 + $0x8] sm:$0xff]  ;;  %s439_s20 = scalar_lea.vmem %s9053_s0, %s4318_s29  ;;  %s8980_s29 = smov 32   ;;  %vm2143_vm12 = vcmask 1043456  }
  0x24   : > { %463 = vst.msk [vmem:[#allocation2 + $0x68] sm:$0x3] %vm450_vm1, %v5103_v0  ;;  %465 = vst.msk [vmem:[#allocation2 + $0x78] sm:$0x3] %vm450_vm1, %v5103_v0  ;;  %v831_v6 = vld [vmem:[%s9052_s1 + $0x90] sm:$0xff]  ;;  %v832_v7 = vld [vmem:[%s9052_s1 + $0x98] sm:$0xff]  ;;  %v4580_v8 = vpack.c.bf16 %v814_v5, %v813_v3 }
  0x25   : > { %466 = vst.msk [vmem:[#allocation2 + $0x80] sm:$0xff] %vm9039_vm0, %v5103_v0  ;;  %468 = vst.msk [vmem:[#allocation2 + $0x90] sm:$0xff] %vm9039_vm0, %v5103_v0  ;;  %v4582_v9 = vpack.c.bf16 %v832_v7, %v831_v6  ;;  %v815_v10 = vld [vmem:[%s9052_s1 + $0x10] sm:$0xff]  ;;  %v816_v11 = vld [vmem:[%s9052_s1 + $0x18] sm:$0xff]  ;;  %4579 = vmatprep.subr.bf16.mxu0 %v4578_v4  ;;  %s5111_s14 = smov 6   ;;  %s8990_s16 = smov 8  }
  0x26   : > { %467 = vst.msk [vmem:[#allocation2 + $0x88] sm:$0x3] %vm450_vm1, %v5103_v0  ;;  %469 = vst.msk [vmem:[#allocation2 + $0x98] sm:$0x3] %vm450_vm1, %v5103_v0  ;;  %v833_v12 = vld [vmem:[%s9052_s1 + $0xa0] sm:$0xff]  ;;  %v834_v13 = vld [vmem:[%s9052_s1 + $0xa8] sm:$0xff]  ;;  %4581 = vmatpush3.bf16.msra.mxu0 %v4580_v8  ;;  %v4584_v15 = vpack.c.bf16 %v816_v11, %v815_v10 }
  0x27   : > { %v817_v14 = vld [vmem:[%s9052_s1 + $0x20] sm:$0xff]  ;;  %v818_v16 = vld [vmem:[%s9052_s1 + $0x28] sm:$0xff]  ;;  %v835_v17 = vld [vmem:[%s9052_s1 + $0xb0] sm:$0xff]  ;;  %4583 = vmatprep.subr.bf16.mxu0 %v4582_v9  ;;  %v4586_v22 = vpack.c.bf16 %v834_v13, %v833_v12  ;;  %474 = vst.msk [vmem:[#allocation3 + $0x10] sm:$0xff] %vm470_vm8, %v5103_v0  ;;  %vm2168_vm13 = vcmask 1042432   ;;  %s8988_s15 = smov 12  }
  0x28   : > { %v836_v18 = vld [vmem:[%s9052_s1 + $0xb8] sm:$0xff]  ;;  %v5337_v19 = vld [vmem:[%s439_s20 + $0x8] sm:$0xff]  ;;  %v5339_v20 = vld [vmem:[%s439_s20] sm:$0xff]  ;;  %v4588_v32 = vpack.c.bf16 %v818_v16, %v817_v14  ;;  %475 = vst.msk [vmem:[#allocation3 + $0x18] sm:$0x3f] %vm472_vm9, %v5103_v0  ;;  %s9017_s18 = smov 14  }
  0x29   : > { %9054 = vst [vmem:[#allocation12_spill] sm:$0xff] %v5337_v19  ;;  %9055 = vst [vmem:[#allocation13_spill] sm:$0xff] %v5339_v20  ;;  %v5341_v21 = vld [vmem:[%s439_s20 + $0x10] sm:$0xff]  ;;  %v5349_v23 = vld [vmem:[%s439_s20 + $0x18] sm:$0xff]  ;;  %v4590_v35 = vpack.c.bf16 %v836_v18, %v835_v17  ;;  %s8982_s21 = smov 16   ;;  %s9023_s23 = smov 18  }
  0x2a   : > { %9056 = vst [vmem:[#allocation14_spill] sm:$0xff] %v5341_v21  ;;  %502 = vst.msk [vmem:[#allocation2 + $0x21] sm:$0xff] %vm9039_vm0, %v5337_v19  ;;  %v5351_v24 = vld [vmem:[%s439_s20 + $0x20] sm:$0xff]  ;;  %v5353_v25 = vld [vmem:[%s439_s20 + $0x28] sm:$0xff]  ;;  %4585 = vmatpush3.bf16.msra.mxu0 %v4584_v15  ;;  %s8996_s24 = smov 20   ;;  %vm2008_vm14 = vcmask 7168  }
  0x2b   : > { %501 = vst.msk [vmem:[#allocation2 + $0x11] sm:$0xff] %vm9039_vm0, %v5339_v20  ;;  %503 = vst.msk [vmem:[#allocation2 + $0x31] sm:$0xff] %vm9039_vm0, %v5341_v21  ;;  %v5355_v26 = vld [vmem:[#allocation2] sm:$0xff]  ;;  %v510_v27 = vld [vmem:[#allocation2 + $0x8] sm:$0x3]  ;;  %4587 = vmatprep.subr.bf16.mxu0 %v4586_v22  ;;  %s9270_s0 = smov 22  }
  0x2c   : > { %9057 = vst [vmem:[#allocation15_spill] sm:$0xff] %v5349_v23  ;;  %9058 = vst [vmem:[#allocation16_spill] sm:$0xff] %v5351_v24  ;;  %v5363_v28 = vld [vmem:[%s439_s20 + $0x30] sm:$0xff]  ;;  %v571_v29 = vrot.slane %v5355_v26, 2  ;;  %v572_v30 = vrot.slane %v510_v27, 2  ;;  %v5368_v31 = vld [vmem:[%s439_s20 + $0x38] sm:$0xff] }
  0x2d   : > { %9059 = vst [vmem:[#allocation17_spill] sm:$0xff] %v5353_v25  ;;  %504 = vst.msk [vmem:[#allocation2 + $0x41] sm:$0xff] %vm9039_vm0, %v5349_v23  ;;  %v547_v33 = vrot.slane %v510_v27, 1  ;;  %v546_v34 = vrot.slane %v5355_v26, 1  ;;  %v819_v36 = vld [vmem:[%s9052_s1 + $0x30] sm:$0xff]  ;;  %v820_v37 = vld [vmem:[%s9052_s1 + $0x38] sm:$0xff] }
  0x2e   : > { %505 = vst.msk [vmem:[#allocation2 + $0x51] sm:$0xff] %vm9039_vm0, %v5351_v24  ;;  %506 = vst.msk [vmem:[#allocation2 + $0x61] sm:$0xff] %vm9039_vm0, %v5353_v25  ;;  %v837_v38 = vld [vmem:[%s9052_s1 + $0xc0] sm:$0xff]  ;;  %v838_v39 = vld [vmem:[%s9052_s1 + $0xc8] sm:$0xff]  ;;  %v573_v42 = vsel %vm570_vm2, %v571_v29, %v572_v30  ;;  %4589 = vmatpush3.bf16.msra.mxu0 %v4588_v32  ;;  %v4592_v45 = vpack.c.bf16 %v820_v37, %v819_v36  ;;  %s9062_s20 = smov 96   ;;  %vm2721_vm15 = vcmask 31744  }
  0x2f   : > { %9060 = vst [vmem:[#allocation18_spill] sm:$0xff] %v5363_v28  ;;  %507 = vst.msk [vmem:[#allocation2 + $0x71] sm:$0xff] %vm9039_vm0, %v5363_v28  ;;  %v821_v40 = vld [vmem:[%s9052_s1 + $0x40] sm:$0xff]  ;;  %v822_v41 = vld [vmem:[%s9052_s1 + $0x48] sm:$0xff]  ;;  %v548_v49 = vsel %vm545_vm3, %v546_v34, %v547_v33  ;;  %4591 = vmatprep.subr.bf16.mxu0 %v4590_v35  ;;  %v4594_v50 = vpack.c.bf16 %v838_v39, %v837_v38  ;;  %vm2730_vm1 = vcmask 48128  }
  0x30   : > { %9061 = vst [vmem:[#allocation19_spill] sm:$0xff] %v5368_v31  ;;  %508 = vst.msk [vmem:[#allocation2 + $0x81] sm:$0xff] %vm9039_vm0, %v5368_v31  ;;  %v839_v43 = vld [vmem:[%s9052_s1 + $0xd0] sm:$0xff]  ;;  %v840_v44 = vld [vmem:[%s9052_s1 + $0xd8] sm:$0xff]  ;;  %v4596_v51 = vpack.c.bf16 %v822_v41, %v821_v40 }
  0x31   : > { %v5400_v46 = vld [vmem:[#allocation2 + $0x20] sm:$0xff]  ;;  %v514_v48 = vld [vmem:[#allocation2 + $0x28] sm:$0x3]  ;;  %v4598_v52 = vpack.c.bf16 %v840_v44, %v839_v43  ;;  %v823_v9 = vld [vmem:[%s9052_s1 + $0x50] sm:$0xff]  ;;  %471 = vst.msk [vmem:[#allocation3] sm:$0xff] %vm470_vm8, %v5103_v0 }
  0x32   : > { %v5402_v47 = vld [vmem:[#allocation2 + $0x10] sm:$0xff]  ;;  %v4750_v53 = vpack.i.bf16 %v573_v42, %v5400_v46  ;;  %v552_v54 = vrot.slane %v5400_v46, 1  ;;  %v553_v55 = vrot.slane %v514_v48, 1  ;;  %v512_v56 = vld [vmem:[#allocation2 + $0x18] sm:$0x3]  ;;  %v577_v62 = vrot.slane %v5400_v46, 2  ;;  %4593 = vmatpush3.bf16.msra.mxu0 %v4592_v45 }
  0x33   : > { %v574_v57 = vrot.slane %v5402_v47, 2  ;;  %v5410_v58 = vld [vmem:[#allocation2 + $0x30] sm:$0xff]  ;;  %v575_v59 = vrot.slane %v512_v56, 2  ;;  %v549_v60 = vrot.slane %v5402_v47, 1  ;;  %v550_v61 = vrot.slane %v512_v56, 1  ;;  %4595 = vmatprep.subr.bf16.mxu0 %v4594_v50  ;;  %v824_v10 = vld [vmem:[%s9052_s1 + $0x58] sm:$0xff] }
  0x34   : > { %v516_v63 = vld [vmem:[#allocation2 + $0x38] sm:$0x3]  ;;  %4751 = vrot.lane.b32.xlu0 %v4750_v53, %s8978_s22  ;;  %v5416_v1 = vsel %vm545_vm3, %v552_v54, %v553_v55  ;;  %v578_v2 = vrot.slane %v514_v48, 2  ;;  %v555_v3 = vrot.slane %v5410_v58, 1  ;;  %v580_v8 = vrot.slane %v5410_v58, 2  ;;  %v841_v11 = vld [vmem:[%s9052_s1 + $0xe0] sm:$0xff] }
  0x35   : > { %v556_v4 = vrot.slane %v516_v63, 1  ;;  %v4760_v5 = vpack.i.bf16 %v5402_v47, %v5416_v1  ;;  %v576_v6 = vsel %vm570_vm2, %v574_v57, %v575_v59  ;;  %v5423_v7 = vsel %vm545_vm3, %v549_v60, %v550_v61  ;;  %v5436_v14 = vld [vmem:[#allocation2 + $0x40] sm:$0xff]  ;;  %v518_v15 = vld [vmem:[#allocation2 + $0x48] sm:$0x3]  ;;  %v5463_v42 = vld [vmem:[#allocation2 + $0x50] sm:$0xff]  ;;  %476 = vst.msk [vmem:[#allocation3 + $0x20] sm:$0xff] %vm470_vm8, %v5103_v0 }
  0x36   : > { %v4755_v12 = vpack.i.bf16 %v548_v49, %v576_v6  ;;  %v579_v13 = vsel %vm570_vm2, %v577_v62, %v578_v2  ;;  %v842_v16 = vld [vmem:[%s9052_s1 + $0xe8] sm:$0xff]  ;;  %v581_v18 = vrot.slane %v516_v63, 2  ;;  %v4770_v22 = vpack.i.bf16 %v576_v6, %v5410_v58  ;;  %4597 = vmatpush3.bf16.msra.mxu0 %v4596_v51  ;;  %v520_v43 = vld [vmem:[#allocation2 + $0x58] sm:$0x3]  ;;  %v825_v45 = vld [vmem:[%s9052_s1 + $0x60] sm:$0xff]  ;;  %478 = vst.msk [vmem:[#allocation3 + $0x30] sm:$0xff] %vm470_vm8, %v5103_v0 }
  0x37   : > { %4761 = vrot.lane.b32.xlu1 %v4760_v5, %s8976_s17  ;;  %v4765_v17 = vpack.i.bf16 %v5423_v7, %v579_v13  ;;  %4492 = vmatprep.mubr.msk.f32.mxu1 %vm9039_vm0, %v579_v13  ;;  %v5447_v27 = vsel %vm545_vm3, %v555_v3, %v556_v4  ;;  %v4600_v30 = vpack.c.bf16 %v824_v10, %v823_v9  ;;  %v558_v33 = vrot.slane %v5436_v14, 1  ;;  %v826_v48 = vld [vmem:[%s9052_s1 + $0x68] sm:$0xff]  ;;  %v845_v49 = vld [vmem:[%s9052_s1 + $0x100] sm:$0xff]  ;;  %v843_v55 = vld [vmem:[%s9052_s1 + $0xf0] sm:$0xff] }
  0x38   : > { %4756 = vrot.lane.b32.xlu0 %v4755_v12, %s8980_s29  ;;  %v5450_v32 = vsel %vm570_vm2, %v580_v8, %v581_v18  ;;  %v559_v35 = vrot.slane %v518_v15, 1  ;;  %4599 = vmatprep.subr.bf16.mxu0 %v4598_v52  ;;  %v4602_v36 = vpack.c.bf16 %v842_v16, %v841_v11  ;;  %v4775_v37 = vpack.i.bf16 %v5400_v46, %v5447_v27  ;;  %v846_v54 = vld [vmem:[%s9052_s1 + $0x108] sm:$0xff]  ;;  %v844_v56 = vld [vmem:[%s9052_s1 + $0xf8] sm:$0xff]  ;;  %v5491_v60 = vld [vmem:[#allocation2 + $0x60] sm:$0xff] }
  0x39   : > { %v4780_v38 = vpack.i.bf16 %v5416_v1, %v5450_v32  ;;  %v583_v39 = vrot.slane %v5436_v14, 2  ;;  %v584_v40 = vrot.slane %v518_v15, 2  ;;  %v4785_v44 = vpack.i.bf16 %v579_v13, %v5436_v14  ;;  %v847_v61 = vld [vmem:[%s9052_s1 + $0x110] sm:$0xff]  ;;  %v848_v62 = vld [vmem:[%s9052_s1 + $0x118] sm:$0xff]  ;;  %v522_v63 = vld [vmem:[#allocation2 + $0x68] sm:$0x3] }
  0x3a   : > { %4601 = vmatpush3.bf16.msra.mxu0 %v4600_v30  ;;  %v5461_v41 = vsel %vm545_vm3, %v558_v33, %v559_v35  ;;  %v561_v52 = vrot.slane %v5463_v42, 1  ;;  %v562_v53 = vrot.slane %v520_v43, 1  ;;  %v586_v57 = vrot.slane %v5463_v42, 2  ;;  %v827_v2 = vld [vmem:[%s9052_s1 + $0x70] sm:$0xff]  ;;  %v828_v3 = vld [vmem:[%s9052_s1 + $0x78] sm:$0xff]  ;;  %480 = vst.msk [vmem:[#allocation3 + $0x40] sm:$0xff] %vm470_vm8, %v5103_v0 }
  0x3b   : > { %4766 = vrot.lane.b32.xlu1 %v4765_v17, %s8980_s29  ;;  %4603 = vmatprep.subr.bf16.mxu0 %v4602_v36  ;;  %v4790_v50 = vpack.i.bf16 %v5410_v58, %v5461_v41  ;;  %v585_v51 = vsel %vm570_vm2, %v583_v39, %v584_v40  ;;  %v587_v59 = vrot.slane %v520_v43, 2  ;;  %v4604_v5 = vpack.c.bf16 %v826_v48, %v825_v45  ;;  %v5524_v35 = vld [vmem:[#allocation2 + $0x70] sm:$0xff]  ;;  %v524_v36 = vld [vmem:[#allocation2 + $0x78] sm:$0x3]  ;;  %v525_v48 = vld [vmem:[#allocation2 + $0x80] sm:$0xff]  ;;  %s9297_s1 = smov 10  }
  0x3c   : > { %4771 = vrot.lane.b32.xlu0 %v4770_v22, %s8978_s22  ;;  %v4795_v4 = vpack.i.bf16 %v5447_v27, %v585_v51  ;;  %v4610_v6 = vpack.c.bf16 %v846_v54, %v845_v49  ;;  %v4606_v8 = vpack.c.bf16 %v844_v56, %v843_v55  ;;  %v4800_v9 = vpack.i.bf16 %v5450_v32, %v5463_v42  ;;  %v526_v49 = vld [vmem:[#allocation2 + $0x88] sm:$0x3] }
  0x3d   : > { %v5511_v10 = vsel %vm545_vm3, %v561_v52, %v562_v53  ;;  %v4614_v11 = vpack.c.bf16 %v848_v62, %v847_v61  ;;  %v588_v12 = vsel %vm570_vm2, %v586_v57, %v587_v59  ;;  %v564_v13 = vrot.slane %v5491_v60, 1  ;;  %v5545_v59 = vld [vmem:[#allocation2 + $0x90] sm:$0xff]  ;;  %473 = vst.msk [vmem:[#allocation3 + $0x8] sm:$0x3f] %vm472_vm9, %v5103_v0  ;;  %477 = vst.msk [vmem:[#allocation3 + $0x28] sm:$0x3f] %vm472_vm9, %v5103_v0 }
  0x3e   : > { %v565_v15 = vrot.slane %v522_v63, 1  ;;  %4605 = vmatpush3.bf16.msra.mxu0 %v4604_v5  ;;  %4611 = vmatprep.subr.bf16.mxu1 %v4610_v6  ;;  %v4608_v16 = vpack.c.bf16 %v828_v3, %v827_v2  ;;  %v4805_v17 = vpack.i.bf16 %v5436_v14, %v5511_v10  ;;  %v4810_v18 = vpack.i.bf16 %v5461_v41, %v588_v12 }
  0x3f   : > { %4776 = vrot.lane.b32.xlu1 %v4775_v37, %s8976_s17  ;;  %4613 = vmatpush3.bf16.msra.mxu1 %v4610_v6  ;;  %v589_v22 = vrot.slane %v5491_v60, 2  ;;  %v590_v30 = vrot.slane %v522_v63, 2  ;;  %v4815_v37 = vpack.i.bf16 %v585_v51, %v5491_v60  ;;  %v567_v40 = vrot.slane %v5524_v35, 1  ;;  %479 = vst.msk [vmem:[#allocation3 + $0x38] sm:$0x3f] %vm472_vm9, %v5103_v0 }
  0x40   : > { %4781 = vrot.lane.b32.xlu0 %v4780_v38, %s8980_s29  ;;  %4607 = vmatprep.subr.bf16.mxu0 %v4606_v8  ;;  %v5522_v33 = vsel %vm545_vm3, %v564_v13, %v565_v15  ;;  %v568_v43 = vrot.slane %v524_v36, 1  ;;  %v593_v45 = vrot.slane %v524_v36, 2  ;;  %v4830_v52 = vpack.i.bf16 %v588_v12, %v5524_v35  ;;  %481 = vst.msk [vmem:[#allocation3 + $0x48] sm:$0x3f] %vm472_vm9, %v5103_v0 }
  0x41   : > { %4615 = vmatprep.subr.bf16.mxu1 %v4614_v11  ;;  %v4820_v38 = vpack.i.bf16 %v5463_v42, %v5522_v33  ;;  %v591_v39 = vsel %vm570_vm2, %v589_v22, %v590_v30  ;;  %v597_v54 = vrot.slane %v525_v48, 1  ;;  %v598_v56 = vrot.slane %v526_v49, 1  ;;  %482 = vst.msk [vmem:[#allocation3 + $0x50] sm:$0xff] %vm470_vm8, %v5103_v0  ;;  %484 = vst.msk [vmem:[#allocation3 + $0x60] sm:$0xff] %vm470_vm8, %v5103_v0 }
  0x42   : > { %4609 = vmatpush3.bf16.msra.mxu0 %v4608_v16  ;;  %v5542_v53 = vsel %vm545_vm3, %v567_v40, %v568_v43  ;;  %v608_v57 = vrot.slane %v525_v48, 2  ;;  %v616_v61 = vrot.slane %v5545_v59, 2  ;;  %v4845_v6 = vpack.i.bf16 %v591_v39, %v525_v48  ;;  %483 = vst.msk [vmem:[#allocation3 + $0x58] sm:$0x3f] %vm472_vm9, %v5103_v0  ;;  %485 = vst.msk [vmem:[#allocation3 + $0x68] sm:$0x3f] %vm472_vm9, %v5103_v0 }
  0x43   : > { %4786 = vrot.lane.b32.xlu1 %v4785_v44, %s8978_s22  ;;  %4617 = vmatpush3.bf16.msra.mxu1 %v4614_v11  ;;  %v592_v44 = vrot.slane %v5524_v35, 2  ;;  %v4835_v63 = vpack.i.bf16 %v5491_v60, %v5542_v53  ;;  %v5556_v3 = vsel %vm545_vm3, %v597_v54, %v598_v56  ;;  %486 = vst.msk [vmem:[#allocation3 + $0x70] sm:$0xff] %vm470_vm8, %v5103_v0  ;;  %488 = vst.msk [vmem:[#allocation3 + $0x80] sm:$0xff] %vm470_vm8, %v5103_v0 }
  0x44   : > { %4791 = vrot.lane.b32.xlu0 %v4790_v50, %s8976_s17  ;;  %v4825_v50 = vpack.i.bf16 %v5511_v10, %v591_v39  ;;  %v4850_v8 = vpack.i.bf16 %v5524_v35, %v5556_v3  ;;  %487 = vst.msk [vmem:[#allocation3 + $0x78] sm:$0x3f] %vm472_vm9, %v5103_v0  ;;  %489 = vst.msk [vmem:[#allocation3 + $0x88] sm:$0x3f] %vm472_vm9, %v5103_v0 }
  0x45   : > { %v594_v55 = vsel %vm570_vm2, %v592_v44, %v593_v45  ;;  %490 = vst.msk [vmem:[#allocation3 + $0x90] sm:$0xff] %vm470_vm8, %v5103_v0  ;;  %492 = vst.msk [vmem:[#allocation3 + $0xa0] sm:$0xff] %vm470_vm8, %v5103_v0 }
  0x46   : > { %4493 = vmatmul.mubr.msk.f32.vlgmr.msra.gmra.mrb[0].mxu1 %vm9039_vm0, %v5450_v32  ;;  %v609_v32 = vrot.slane %v526_v49, 2  ;;  %v4840_v2 = vpack.i.bf16 %v5522_v33, %v594_v55  ;;  %v4860_v13 = vpack.i.bf16 %v594_v55, %v5545_v59  ;;  %491 = vst.msk [vmem:[#allocation3 + $0x98] sm:$0x3f] %vm472_vm9, %v5103_v0  ;;  %493 = vst.msk [vmem:[#allocation3 + $0xa8] sm:$0x3f] %vm472_vm9, %v5103_v0 }
  0x47   : > { %4796 = vrot.lane.b32.xlu1 %v4795_v4, %s8980_s29  ;;  %4495 = vmatprep.mubr.msk.f32.mxu1 %vm9039_vm0, %v585_v51  ;;  %v528_v51 = vld [vmem:[#allocation2 + $0x98] sm:$0x3]  ;;  %494 = vst.msk [vmem:[#allocation3 + $0xb0] sm:$0xff] %vm470_vm8, %v5103_v0  ;;  %496 = vst.msk [vmem:[#allocation3 + $0xc0] sm:$0xff] %vm470_vm8, %v5103_v0 }
  0x48   : > { %4801 = vrot.lane.b32.xlu0 %v4800_v9, %s8978_s22  ;;  %v617_v62 = vrot.slane %v528_v51, 2  ;;  %v610_v4 = vsel %vm570_vm2, %v608_v57, %v609_v32  ;;  %v613_v9 = vrot.slane %v5545_v59, 1  ;;  %v614_v11 = vrot.slane %v528_v51, 1  ;;  %495 = vst.msk [vmem:[#allocation3 + $0xb8] sm:$0x3f] %vm472_vm9, %v5103_v0 }
  0x49   : > { %497 = vst.msk [vmem:[#allocation3 + $0xc8] sm:$0x3f] %vm472_vm9, %v5103_v0  ;;  %499 = vst.msk [vmem:[#allocation3 + $0xd8] sm:$0x3f] %vm472_vm9, %v5103_v0  ;;  %vm9042_vm9 = vcmask 130048  }
  0x4a   : > { %4496 = vmatmul.mubr.msk.f32.gmra.mrb[2].mxu1 %vm9039_vm0, %v588_v12  ;;  %v618_v5 = vsel %vm570_vm2, %v616_v61, %v617_v62  ;;  %v4855_v12 = vpack.i.bf16 %v5542_v53, %v610_v4  ;;  %v615_v15 = vsel %vm545_vm3, %v613_v9, %v614_v11  ;;  %498 = vst.msk [vmem:[#allocation3 + $0xd0] sm:$0xff] %vm470_vm8, %v5103_v0 }
  0x4b   : > { %4806 = vrot.lane.b32.xlu1 %v4805_v17, %s8976_s17  ;;  %4498 = vmatprep.mubr.msk.f32.mxu1 %vm9039_vm0, %v591_v39  ;;  %v4865_v16 = vpack.i.bf16 %v525_v48, %v615_v15 }
  0x4c   : > { %4811 = vrot.lane.b32.xlu0 %v4810_v18, %s8980_s29 }
  0x4e   : > { %4499 = vmatmul.mubr.msk.f32.gmra.mrb[4].mxu1 %vm9039_vm0, %v594_v55 }
  0x4f   : > { %4816 = vrot.lane.b32.xlu1 %v4815_v37, %s8978_s22  ;;  %4501 = vmatprep.mubr.msk.f32.mxu1 %vm9039_vm0, %v610_v4 }
  0x50   : > { %4821 = vrot.lane.b32.xlu0 %v4820_v38, %s8976_s17 }
  0x52   : > { %4502 = vmatmul.mubr.msk.f32.gmra.mrb[6].mxu1 %vm9039_vm0, %v618_v5 }
  0x53   : > { %4826 = vrot.lane.b32.xlu1 %v4825_v50, %s8980_s29 }
  0x54   : > { %4831 = vrot.lane.b32.xlu0 %v4830_v52, %s8978_s22 }
  0x57   : > { %4836 = vrot.lane.b32.xlu1 %v4835_v63, %s8976_s17 }
  0x58   : > { %4841 = vrot.lane.b32.xlu0 %v4840_v2, %s8980_s29 }
  0x5b   : > { %4846 = vrot.lane.b32.xlu1 %v4845_v6, %s8978_s22 }
  0x5c   : > { %4851 = vrot.lane.b32.xlu0 %v4850_v8, %s8976_s17 }
  0x5f   : > { %4856 = vrot.lane.b32.xlu1 %v4855_v12, %s8980_s29 }
  0x60   : > { %4861 = vrot.lane.b32.xlu0 %v4860_v13, %s8978_s22 }
  0x63   : > { %4866 = vrot.lane.b32.xlu1 %v4865_v16, %s8976_s17  ;;  %s9028_s17 = smov 10  }
  0xa6   : > { %v4752_v17 = vpop.permute.xlu0 %4751 }
  0xa7   : > { %v4754_v37 = vunpack.i.h.bf16 %v4752_v17  ;;  %v4753_v38 = vunpack.i.l.bf16 %v4752_v17 }
  0xa9   : > { %v4762_v18 = vpop.permute.xlu1 %4761 }
  0xaa   : > { %v4757_v22 = vpop.permute.xlu0 %4756  ;;  %v4764_v39 = vunpack.i.h.bf16 %v4762_v18  ;;  %v4763_v40 = vunpack.i.l.bf16 %v4762_v18 }
  0xab   : > { %v4759_v30 = vunpack.i.h.bf16 %v4757_v22  ;;  %v4758_v36 = vunpack.i.l.bf16 %v4757_v22 }
  0xad   : > { %v4767_v43 = vpop.permute.xlu1 %4766  ;;  %v789_v44 = vsel %vm9039_vm0, %v5423_v7, %v4758_v36  ;;  %v763_v45 = vsel %vm9039_vm0, %v5355_v26, %v4759_v30 }
  0xae   : > { %v4769_v48 = vunpack.i.h.bf16 %v4767_v43  ;;  %v4768_v49 = vunpack.i.l.bf16 %v4767_v43  ;;  %v4772_v50 = vpop.permute.xlu0 %4771  ;;  %v797_v52 = vsel %vm9038_vm4, %v789_v44, %v4753_v38  ;;  %v772_v54 = vsel %vm9038_vm4, %v763_v45, %v4754_v37 }
  0xaf   : > { %v4774_v55 = vunpack.i.h.bf16 %v4772_v50  ;;  %v4773_v56 = vunpack.i.l.bf16 %v4772_v50  ;;  %v805_v57 = vsel %vm9037_vm5, %v797_v52, %v4763_v40  ;;  %v781_v32 = vsel %vm9037_vm5, %v772_v54, %v4764_v39 }
  0xb0   : > { %929 = vmatprep.mubr.f32.mxu0 %v805_v57  ;;  %v790_v7 = vsel %vm9039_vm0, %v5416_v1, %v4768_v49  ;;  %v764_v51 = vsel %vm9039_vm0, %v5402_v47, %v4769_v48 }
  0xb1   : > { %v4777_v62 = vpop.permute.xlu1 %4776  ;;  %930 = vmatmul.mubr.f32.vlgmr.msra.gmra.mrb[0].mxu0 %v781_v32  ;;  %v798_v8 = vsel %vm9038_vm4, %v790_v7, %v4773_v56  ;;  %v773_v11 = vsel %vm9038_vm4, %v764_v51, %v4774_v55 }
  0xb2   : > { %v4779_v63 = vunpack.i.h.bf16 %v4777_v62  ;;  %v4778_v2 = vunpack.i.l.bf16 %v4777_v62  ;;  %v4782_v4 = vpop.permute.xlu0 %4781 }
  0xb3   : > { %v4784_v5 = vunpack.i.h.bf16 %v4782_v4  ;;  %v4783_v6 = vunpack.i.l.bf16 %v4782_v4 }
  0xb4   : > { %v806_v12 = vsel %vm9037_vm5, %v798_v8, %v4778_v2  ;;  %v782_v13 = vsel %vm9037_vm5, %v773_v11, %v4779_v63 }
  0xb5   : > { %v4787_v15 = vpop.permute.xlu1 %4786  ;;  %934 = vmatprep.mubr.f32.mxu0 %v806_v12  ;;  %v791_v22 = vsel %vm9039_vm0, %v5447_v27, %v4783_v6  ;;  %v765_v30 = vsel %vm9039_vm0, %v5400_v46, %v4784_v5 }
  0xb6   : > { %v4789_v1 = vunpack.i.h.bf16 %v4787_v15  ;;  %v4788_v16 = vunpack.i.l.bf16 %v4787_v15  ;;  %v4792_v47 = vpop.permute.xlu0 %4791  ;;  %935 = vmatmul.mubr.f32.gmra.mrb[2].mxu0 %v782_v13 }
  0xb7   : > { %v4794_v17 = vunpack.i.h.bf16 %v4792_v47  ;;  %v4793_v18 = vunpack.i.l.bf16 %v4792_v47 }
  0xb8   : > { %v799_v36 = vsel %vm9038_vm4, %v791_v22, %v4788_v16  ;;  %v774_v37 = vsel %vm9038_vm4, %v765_v30, %v4789_v1 }
  0xb9   : > { %v4797_v38 = vpop.permute.xlu1 %4796  ;;  %v807_v39 = vsel %vm9037_vm5, %v799_v36, %v4793_v18  ;;  %v783_v40 = vsel %vm9037_vm5, %v774_v37, %v4794_v17 }
  0xba   : > { %v4799_v43 = vunpack.i.h.bf16 %v4797_v38  ;;  %v4798_v44 = vunpack.i.l.bf16 %v4797_v38  ;;  %v4802_v45 = vpop.permute.xlu0 %4801  ;;  %939 = vmatprep.mubr.f32.mxu0 %v807_v39 }
  0xbb   : > { %v4804_v48 = vunpack.i.h.bf16 %v4802_v45  ;;  %v4803_v49 = vunpack.i.l.bf16 %v4802_v45  ;;  %940 = vmatmul.mubr.f32.gmra.mrb[4].mxu0 %v783_v40 }
  0xbc   : > { %v792_v27 = vsel %vm9039_vm0, %v5461_v41, %v4798_v44  ;;  %v766_v46 = vsel %vm9039_vm0, %v5410_v58, %v4799_v43 }
  0xbd   : > { %v4807_v50 = vpop.permute.xlu1 %4806  ;;  %v800_v32 = vsel %vm9038_vm4, %v792_v27, %v4803_v49  ;;  %v775_v7 = vsel %vm9038_vm4, %v766_v46, %v4804_v48 }
  0xbe   : > { %v4809_v52 = vunpack.i.h.bf16 %v4807_v50  ;;  %v4808_v54 = vunpack.i.l.bf16 %v4807_v50  ;;  %v4812_v55 = vpop.permute.xlu0 %4811 }
  0xbf   : > { %v4814_v56 = vunpack.i.h.bf16 %v4812_v55  ;;  %v4813_v57 = vunpack.i.l.bf16 %v4812_v55 }
  0xc0   : > { %v808_v51 = vsel %vm9037_vm5, %v800_v32, %v4808_v54  ;;  %v784_v62 = vsel %vm9037_vm5, %v775_v7, %v4809_v52 }
  0xc1   : > { %v4817_v63 = vpop.permute.xlu1 %4816  ;;  %944 = vmatprep.mubr.f32.mxu0 %v808_v51  ;;  %v793_v6 = vsel %vm9039_vm0, %v5511_v10, %v4813_v57  ;;  %v767_v8 = vsel %vm9039_vm0, %v5436_v14, %v4814_v56 }
  0xc2   : > { %v4819_v41 = vunpack.i.h.bf16 %v4817_v63  ;;  %v4818_v2 = vunpack.i.l.bf16 %v4817_v63  ;;  %v4822_v4 = vpop.permute.xlu0 %4821  ;;  %945 = vmatmul.mubr.f32.gmra.mrb[6].mxu0 %v784_v62 }
  0xc3   : > { %v4824_v58 = vunpack.i.h.bf16 %v4822_v4  ;;  %v4823_v5 = vunpack.i.l.bf16 %v4822_v4 }
  0xc4   : > { %v801_v11 = vsel %vm9038_vm4, %v793_v6, %v4818_v2  ;;  %v776_v12 = vsel %vm9038_vm4, %v767_v8, %v4819_v41 }
  0xc5   : > { %v4827_v13 = vpop.permute.xlu1 %4826  ;;  %v809_v15 = vsel %vm9037_vm5, %v801_v11, %v4823_v5  ;;  %v785_v1 = vsel %vm9037_vm5, %v776_v12, %v4824_v58 }
  0xc6   : > { %v4829_v16 = vunpack.i.h.bf16 %v4827_v13  ;;  %v4828_v47 = vunpack.i.l.bf16 %v4827_v13  ;;  %v4832_v17 = vpop.permute.xlu0 %4831  ;;  %949 = vmatprep.mubr.f32.mxu0 %v809_v15 }
  0xc7   : > { %v4834_v18 = vunpack.i.h.bf16 %v4832_v17  ;;  %v4833_v22 = vunpack.i.l.bf16 %v4832_v17  ;;  %950 = vmatmul.mubr.f32.gmra.mrb[8].mxu0 %v785_v1 }
  0xc8   : > { %v794_v10 = vsel %vm9039_vm0, %v5522_v33, %v4828_v47  ;;  %v768_v14 = vsel %vm9039_vm0, %v5463_v42, %v4829_v16 }
  0xc9   : > { %v4837_v30 = vpop.permute.xlu1 %4836  ;;  %v802_v43 = vsel %vm9038_vm4, %v794_v10, %v4833_v22  ;;  %v777_v44 = vsel %vm9038_vm4, %v768_v14, %v4834_v18  ;;  %v1437_v18 = vld [vmem:[%s8962_s4 + $0x80] sm:$0xff]  ;;  %v1438_v22 = vld [vmem:[%s8962_s4 + $0x88] sm:$0xff] }
  0xca   : > { %v4839_v36 = vunpack.i.h.bf16 %v4837_v30  ;;  %v4838_v37 = vunpack.i.l.bf16 %v4837_v30  ;;  %v4842_v38 = vpop.permute.xlu0 %4841  ;;  %v1421_v10 = vld [vmem:[%s8962_s4] sm:$0xff]  ;;  %v4618_v14 = vpack.c.bf16 %v1438_v22, %v1437_v18  ;;  %v1422_v30 = vld [vmem:[%s8962_s4 + $0x8] sm:$0xff] }
  0xcb   : > { %v4844_v39 = vunpack.i.h.bf16 %v4842_v38  ;;  %v4843_v40 = vunpack.i.l.bf16 %v4842_v38  ;;  %v4620_v38 = vpack.c.bf16 %v1422_v30, %v1421_v10  ;;  %v5738_v18 = vld [vmem:[%s8961_s3] ss:$0 sm:$0xff] }
  0xcc   : > { %v810_v45 = vsel %vm9037_vm5, %v802_v43, %v4838_v37  ;;  %v786_v48 = vsel %vm9037_vm5, %v777_v44, %v4839_v36  ;;  %v1439_v36 = vld [vmem:[%s8962_s4 + $0x90] sm:$0xff]  ;;  %v1440_v37 = vld [vmem:[%s8962_s4 + $0x98] sm:$0xff]  ;;  %v1441_v44 = vld [vmem:[%s8962_s4 + $0xa0] sm:$0xff]  ;;  %4619 = vmatprep.subr.bf16.mxu1 %v4618_v14 }
  0xcd   : > { %v4847_v49 = vpop.permute.xlu1 %4846  ;;  %954 = vmatprep.mubr.f32.mxu0 %v810_v45  ;;  %v795_v52 = vsel %vm9039_vm0, %v5542_v53, %v4843_v40  ;;  %v769_v54 = vsel %vm9039_vm0, %v5491_v60, %v4844_v39  ;;  %v4622_v39 = vpack.c.bf16 %v1440_v37, %v1439_v36  ;;  %v1423_v40 = vld [vmem:[%s8962_s4 + $0x10] sm:$0xff]  ;;  %v1424_v43 = vld [vmem:[%s8962_s4 + $0x18] sm:$0xff]  ;;  %v1442_v45 = vld [vmem:[%s8962_s4 + $0xa8] sm:$0xff]  ;;  %4621 = vmatpush3.bf16.msra.mxu1 %v4620_v38 }
  0xce   : > { %v4849_v33 = vunpack.i.h.bf16 %v4847_v49  ;;  %v4848_v27 = vunpack.i.l.bf16 %v4847_v49  ;;  %v4852_v46 = vpop.permute.xlu0 %4851  ;;  %955 = vmatmul.mubr.f32.gmra.mrb[10].mxu0 %v786_v48  ;;  %v4624_v48 = vpack.c.bf16 %v1424_v43, %v1423_v40  ;;  %v4626_v49 = vpack.c.bf16 %v1442_v45, %v1441_v44  ;;  %v1450_v44 = vld [vmem:[%s8962_s4 + $0xe8] sm:$0xff] }
  0xcf   : > { %v4854_v42 = vunpack.i.h.bf16 %v4852_v46  ;;  %v4853_v50 = vunpack.i.l.bf16 %v4852_v46  ;;  %4623 = vmatprep.subr.bf16.mxu1 %v4622_v39  ;;  %v1443_v46 = vld [vmem:[%s8962_s4 + $0xb0] sm:$0xff] }
  0xd0   : > { %v803_v55 = vsel %vm9038_vm4, %v795_v52, %v4848_v27  ;;  %v778_v56 = vsel %vm9038_vm4, %v769_v54, %v4849_v33  ;;  %v1425_v33 = vld [vmem:[%s8962_s4 + $0x20] sm:$0xff]  ;;  %v1426_v27 = vld [vmem:[%s8962_s4 + $0x28] sm:$0xff]  ;;  %v1427_v54 = vld [vmem:[%s8962_s4 + $0x30] sm:$0xff] }
  0xd1   : > { %v4857_v57 = vpop.permute.xlu1 %4856  ;;  %v811_v32 = vsel %vm9037_vm5, %v803_v55, %v4853_v50  ;;  %v787_v7 = vsel %vm9037_vm5, %v778_v56, %v4854_v42  ;;  %v1444_v42 = vld [vmem:[%s8962_s4 + $0xb8] sm:$0xff]  ;;  %4625 = vmatpush3.bf16.msra.mxu1 %v4624_v48  ;;  %v4628_v50 = vpack.c.bf16 %v1426_v27, %v1425_v33  ;;  %v1445_v56 = vld [vmem:[%s8962_s4 + $0xc0] sm:$0xff]  ;;  %v1122_v27 = vld [vmem:[#allocation2 + $0x8] sm:$0x3] }
  0xd2   : > { %v4859_v51 = vunpack.i.h.bf16 %v4857_v57  ;;  %v4858_v62 = vunpack.i.l.bf16 %v4857_v57  ;;  %v4862_v63 = vpop.permute.xlu0 %4861  ;;  %959 = vmatprep.mubr.f32.mxu0 %v811_v32  ;;  %4627 = vmatprep.subr.bf16.mxu1 %v4626_v49  ;;  %v4630_v52 = vpack.c.bf16 %v1444_v42, %v1443_v46  ;;  %v1428_v55 = vld [vmem:[%s8962_s4 + $0x38] sm:$0xff]  ;;  %v1446_v57 = vld [vmem:[%s8962_s4 + $0xc8] sm:$0xff] }
  0xd3   : > { %v4864_v41 = vunpack.i.h.bf16 %v4862_v63  ;;  %v4863_v2 = vunpack.i.l.bf16 %v4862_v63  ;;  %960 = vmatmul.mubr.f32.gmra.mrb[12].mxu0 %v787_v7  ;;  %v4632_v32 = vpack.c.bf16 %v1428_v55, %v1427_v54  ;;  %v4634_v7 = vpack.c.bf16 %v1446_v57, %v1445_v56  ;;  %v1447_v63 = vld [vmem:[%s8962_s4 + $0xd0] sm:$0xff]  ;;  %v1434_v49 = vld [vmem:[%s8962_s4 + $0x68] sm:$0xff]  ;;  %v1452_v54 = vld [vmem:[%s8962_s4 + $0xf8] sm:$0xff] }
  0xd4   : > { %v796_v53 = vsel %vm9039_vm0, %v5556_v3, %v4858_v62  ;;  %v770_v60 = vsel %vm9039_vm0, %v5524_v35, %v4859_v51  ;;  %v1429_v51 = vld [vmem:[%s8962_s4 + $0x40] sm:$0xff]  ;;  %v1430_v62 = vld [vmem:[%s8962_s4 + $0x48] sm:$0xff]  ;;  %v1158_v56 = vrot.slane %v1122_v27, 1 }
  0xd5   : > { %v4867_v4 = vpop.permute.xlu1 %4866  ;;  %v804_v6 = vsel %vm9038_vm4, %v796_v53, %v4863_v2  ;;  %v779_v8 = vsel %vm9038_vm4, %v770_v60, %v4864_v41  ;;  %4629 = vmatpush3.bf16.msra.mxu1 %v4628_v50  ;;  %v1448_v41 = vld [vmem:[%s8962_s4 + $0xd8] sm:$0xff]  ;;  %v4636_v2 = vpack.c.bf16 %v1430_v62, %v1429_v51  ;;  %v1431_v60 = vld [vmem:[%s8962_s4 + $0x50] sm:$0xff] }
  0xd6   : > { %v4869_v58 = vunpack.i.h.bf16 %v4867_v4  ;;  %v4868_v5 = vunpack.i.l.bf16 %v4867_v4  ;;  %4631 = vmatprep.subr.bf16.mxu1 %v4630_v52  ;;  %v4638_v53 = vpack.c.bf16 %v1448_v41, %v1447_v63  ;;  %v1432_v4 = vld [vmem:[%s8962_s4 + $0x58] sm:$0xff]  ;;  %v1451_v52 = vld [vmem:[%s8962_s4 + $0xf0] sm:$0xff]  ;;  %v1182_v41 = vrot.slane %v1122_v27, 2 }
  0xd7   : > { %v4646_v57 = vpack.c.bf16 %v1452_v54, %v1451_v52 }
  0xd8   : > { %v812_v11 = vsel %vm9037_vm5, %v804_v6, %v4868_v5  ;;  %v788_v12 = vsel %vm9037_vm5, %v779_v8, %v4869_v58  ;;  %v4640_v58 = vpack.c.bf16 %v1432_v4, %v1431_v60 }
  0xd9   : > { %964 = vmatprep.mubr.f32.mxu0 %v812_v11  ;;  %4633 = vmatpush3.bf16.msra.mxu1 %v4632_v32  ;;  %v5733_v11 = vld [vmem:[%s8960_s2] ss:$0 sm:$0xff]  ;;  %v1435_v32 = vld [vmem:[%s8962_s4 + $0x70] sm:$0xff] }
  0xda   : > { %965 = vmatmul.mubr.f32.gmra.mrb[14].mxu0 %v788_v12  ;;  %4635 = vmatprep.subr.bf16.mxu1 %v4634_v7 }
  0xdd   : > { %4637 = vmatpush3.bf16.msra.mxu1 %v4636_v2 }
  0xde   : > { %4639 = vmatprep.subr.bf16.mxu1 %v4638_v53 }
  0xe1   : > { %4641 = vmatpush3.bf16.msra.mxu1 %v4640_v58  ;;  %v1159_v58 = vsel %vm545_vm3, %v546_v34, %v1158_v56 }
 0x119   : > { %v5644_v13 = vpop.f32.mrb[0].mxu1 }
 0x11a   : > { %v1036_v15 = vpop.f32.mrb[1].mxu1 }
 0x11d   : > { %v5646_v3 = vpop.f32.mrb[2].mxu1 }
 0x11e   : > { %v5648_v1 = vpop.f32.mrb[3].mxu1 }
 0x121   : > { %v5650_v35 = vpop.f32.mrb[4].mxu1 }
 0x122   : > { %v5652_v16 = vpop.f32.mrb[5].mxu1 }
 0x125   : > { %v5654_v47 = vpop.f32.mrb[6].mxu1 }
 0x126   : > { %v5656_v17 = vpop.f32.mrb[7].mxu1 }
 0x184   : > { %v4352_v5 = vpop.f32.mrb[0].mxu0 }
 0x185   : > { %v4353_v6 = vpop.f32.mrb[1].mxu0 }
 0x186   : > { %v4354_v8 = vadd.f32 %v4353_v6, %v4352_v5 }
 0x188   : > { %v1037_v12 = vadd.f32 %v4354_v8, %v1036_v15  ;;  %v1449_v15 = vld [vmem:[%s8962_s4 + $0xe0] sm:$0xff] }
 0x189   : > { %v4355_v22 = vpop.f32.mrb[2].mxu0  ;;  %v4642_v48 = vpack.c.bf16 %v1450_v44, %v1449_v15 }
 0x18a   : > { %v1082_v10 = vmul.f32 %v5733_v11, %v1037_v12  ;;  %v4356_v14 = vpop.f32.mrb[3].mxu0 }
 0x18b   : > { %v4357_v30 = vadd.f32 %v4356_v14, %v4355_v22  ;;  %4643 = vmatprep.subr.bf16.mxu1 %v4642_v48 }
 0x18c   : > { %v1097_v36 = vadd.f32 %v5738_v18, %v1082_v10  ;;  %v1183_v10 = vsel %vm570_vm2, %v571_v29, %v1182_v41 }
 0x18d   : > { %v1042_v37 = vadd.f32 %v5644_v13, %v4357_v30  ;;  %v1433_v13 = vld [vmem:[%s8962_s4 + $0x60] sm:$0xff] }
 0x18e   : > { %v1105_v38 = vmax.f32 %v1097_v36, 0.0  ;;  %v4358_v39 = vpop.f32.mrb[4].mxu0  ;;  %v4644_v46 = vpack.c.bf16 %v1434_v49, %v1433_v13 }
 0x18f   : > { %v1083_v40 = vmul.f32 %v5733_v11, %v1042_v37  ;;  %v4359_v43 = vpop.f32.mrb[5].mxu0 }
 0x190   : > { %1113 = vst.msk [vmem:[#allocation2 + $0x11] sm:$0xff] %vm9039_vm0, %v1105_v38  ;;  %v4360_v45 = vadd.f32 %v4359_v43, %v4358_v39  ;;  %4645 = vmatpush3.bf16.msra.mxu1 %v4644_v46 }
 0x191   : > { %v1098_v33 = vadd.f32 %v5738_v18, %v1083_v40  ;;  %4647 = vmatprep.subr.bf16.mxu1 %v4646_v57 }
 0x192   : > { %v1047_v42 = vadd.f32 %v4360_v45, %v5648_v1  ;;  %v1436_v1 = vld [vmem:[%s8962_s4 + $0x78] sm:$0xff] }
 0x193   : > { %v1106_v50 = vmax.f32 %v1098_v33, 0.0  ;;  %v4648_v51 = vpack.c.bf16 %v1436_v1, %v1435_v32 }
 0x194   : > { %v1084_v55 = vmul.f32 %v5733_v11, %v1047_v42 }
 0x195   : > { %1114 = vst.msk [vmem:[#allocation2 + $0x21] sm:$0xff] %vm9039_vm0, %v1106_v50  ;;  %v4361_v7 = vpop.f32.mrb[6].mxu0  ;;  %4649 = vmatpush3.bf16.msra.mxu1 %v4648_v51 }
 0x196   : > { %v1099_v62 = vadd.f32 %v5738_v18, %v1084_v55  ;;  %v4362_v63 = vpop.f32.mrb[7].mxu0 }
 0x197   : > { %v4363_v2 = vadd.f32 %v4362_v63, %v4361_v7  ;;  %v5774_v53 = vld [vmem:[#allocation2 + $0x10] sm:$0xff]  ;;  %v1124_v60 = vld [vmem:[#allocation2 + $0x18] sm:$0x3] }
 0x198   : > { %v1107_v4 = vmax.f32 %v1099_v62, 0.0  ;;  %v1184_v5 = vrot.slane %v5774_v53, 2  ;;  %v1185_v6 = vrot.slane %v1124_v60, 2  ;;  %v1160_v39 = vrot.slane %v5774_v53, 1 }
 0x199   : > { %v1052_v8 = vadd.f32 %v5646_v3, %v4363_v2  ;;  %v1161_v3 = vrot.slane %v1124_v60, 1 }
 0x19a   : > { %1115 = vst.msk [vmem:[#allocation2 + $0x31] sm:$0xff] %vm9039_vm0, %v1107_v4  ;;  %v4364_v12 = vpop.f32.mrb[8].mxu0  ;;  %v1186_v22 = vsel %vm570_vm2, %v1184_v5, %v1185_v6  ;;  %v1453_v4 = vld [vmem:[%s8962_s4 + $0x100] sm:$0xff] }
 0x19b   : > { %v1085_v14 = vmul.f32 %v5733_v11, %v1052_v8  ;;  %v4365_v30 = vpop.f32.mrb[9].mxu0  ;;  %v4870_v36 = vpack.i.bf16 %v1159_v58, %v1186_v22  ;;  %v5804_v27 = vsel %vm545_vm3, %v1160_v39, %v1161_v3  ;;  %v1454_v58 = vld [vmem:[%s8962_s4 + $0x108] sm:$0xff] }
 0x19c   : > { %v4366_v37 = vadd.f32 %v4365_v30, %v4364_v12  ;;  %v5787_v34 = vld [vmem:[#allocation2 + $0x20] sm:$0xff]  ;;  %v1126_v38 = vld [vmem:[#allocation2 + $0x28] sm:$0x3] }
 0x19d   : > { %v1100_v40 = vadd.f32 %v5738_v18, %v1085_v14  ;;  %4871 = vrot.lane.b32.xlu0 %v4870_v36, %s8980_s29  ;;  %v4875_v43 = vpack.i.bf16 %v1183_v10, %v5787_v34  ;;  %v1163_v26 = vrot.slane %v5787_v34, 1  ;;  %v1164_v29 = vrot.slane %v1126_v38, 1 }
 0x19e   : > { %v1057_v15 = vadd.f32 %v4366_v37, %v5652_v16  ;;  %v1187_v44 = vrot.slane %v5787_v34, 2  ;;  %v1188_v45 = vrot.slane %v1126_v38, 2 }
 0x19f   : > { %v1108_v48 = vmax.f32 %v1100_v40, 0.0  ;;  %4876 = vrot.lane.b32.xlu1 %v4875_v43, %s8978_s22  ;;  %v5798_v13 = vsel %vm545_vm3, %v1163_v26, %v1164_v29 }
 0x1a0   : > { %v1086_v49 = vmul.f32 %v5733_v11, %v1057_v15  ;;  %v4880_v33 = vpack.i.bf16 %v5774_v53, %v5798_v13  ;;  %v5807_v46 = vsel %vm570_vm2, %v1187_v44, %v1188_v45 }
 0x1a1   : > { %1116 = vst.msk [vmem:[#allocation2 + $0x41] sm:$0xff] %vm9039_vm0, %v1108_v48  ;;  %v4367_v16 = vpop.f32.mrb[10].mxu0  ;;  %v4885_v42 = vpack.i.bf16 %v5804_v27, %v5807_v46  ;;  %v5812_v50 = vld [vmem:[#allocation2 + $0x30] sm:$0xff]  ;;  %v1128_v52 = vld [vmem:[#allocation2 + $0x38] sm:$0x3] }
 0x1a2   : > { %v1101_v54 = vadd.f32 %v5738_v18, %v1086_v49  ;;  %v4368_v55 = vpop.f32.mrb[11].mxu0  ;;  %4881 = vrot.lane.b32.xlu0 %v4880_v33, %s9062_s20  ;;  %v1166_v56 = vrot.slane %v5812_v50, 1  ;;  %v1167_v57 = vrot.slane %v1128_v52, 1  ;;  %v1190_v1 = vrot.slane %v5812_v50, 2 }
 0x1a3   : > { %v4369_v32 = vadd.f32 %v4368_v55, %v4367_v16  ;;  %4886 = vrot.lane.b32.xlu1 %v4885_v42, %s8980_s29  ;;  %v1191_v7 = vrot.slane %v1128_v52, 2  ;;  %v4890_v62 = vpack.i.bf16 %v1186_v22, %v5812_v50 }
 0x1a4   : > { %v1109_v51 = vmax.f32 %v1101_v54, 0.0  ;;  %v5821_v63 = vsel %vm545_vm3, %v1166_v56, %v1167_v57 }
 0x1a5   : > { %v1062_v41 = vadd.f32 %v5650_v35, %v4369_v32  ;;  %v4895_v2 = vpack.i.bf16 %v5787_v34, %v5821_v63  ;;  %v5827_v60 = vsel %vm570_vm2, %v1190_v1, %v1191_v7  ;;  %v5837_v35 = vpack.c.bf16 %v1454_v58, %v1453_v4 }
 0x1a6   : > { %1117 = vst.msk [vmem:[#allocation2 + $0x51] sm:$0xff] %vm9039_vm0, %v1109_v51  ;;  %v4370_v5 = vpop.f32.mrb[12].mxu0  ;;  %4891 = vrot.lane.b32.xlu0 %v4890_v62, %s8978_s22  ;;  %v4900_v22 = vpack.i.bf16 %v5798_v13, %v5827_v60 }
 0x1a7   : > { %v1087_v6 = vmul.f32 %v5733_v11, %v1062_v41  ;;  %v4371_v8 = vpop.f32.mrb[13].mxu0  ;;  %4896 = vrot.lane.b32.xlu1 %v4895_v2, %s9062_s20  ;;  %4651 = vmatprep.subr.bf16.mxu1 %v5837_v35 }
 0x1a8   : > { %v4372_v12 = vadd.f32 %v4371_v8, %v4370_v5  ;;  %v5843_v10 = vld [vmem:[#allocation2 + $0x40] sm:$0xff]  ;;  %v1130_v14 = vld [vmem:[#allocation2 + $0x48] sm:$0x3] }
 0x1a9   : > { %v1102_v30 = vadd.f32 %v5738_v18, %v1087_v6  ;;  %v4905_v36 = vpack.i.bf16 %v5807_v46, %v5843_v10  ;;  %v1169_v37 = vrot.slane %v5843_v10, 1  ;;  %v1170_v38 = vrot.slane %v1130_v14, 1 }
 0x1aa   : > { %v1067_v39 = vadd.f32 %v4372_v12, %v5656_v17  ;;  %4901 = vrot.lane.b32.xlu0 %v4900_v22, %s8980_s29  ;;  %v1193_v3 = vrot.slane %v5843_v10, 2  ;;  %v1194_v40 = vrot.slane %v1130_v14, 2 }
 0x1ab   : > { %v1110_v43 = vmax.f32 %v1102_v30, 0.0  ;;  %4906 = vrot.lane.b32.xlu1 %v4905_v36, %s8978_s22  ;;  %v5855_v26 = vsel %vm545_vm3, %v1169_v37, %v1170_v38 }
 0x1ac   : > { %v1088_v29 = vmul.f32 %v5733_v11, %v1067_v39  ;;  %v4910_v15 = vpack.i.bf16 %v5812_v50, %v5855_v26  ;;  %v5861_v44 = vsel %vm570_vm2, %v1193_v3, %v1194_v40 }
 0x1ad   : > { %1118 = vst.msk [vmem:[#allocation2 + $0x61] sm:$0xff] %vm9039_vm0, %v1110_v43  ;;  %v4373_v17 = vpop.f32.mrb[14].mxu0  ;;  %v4915_v45 = vpack.i.bf16 %v5821_v63, %v5861_v44  ;;  %v5866_v48 = vld [vmem:[#allocation2 + $0x50] sm:$0xff]  ;;  %v1132_v49 = vld [vmem:[#allocation2 + $0x58] sm:$0x3] }
 0x1ae   : > { %v1103_v33 = vadd.f32 %v5738_v18, %v1088_v29  ;;  %v4374_v16 = vpop.f32.mrb[15].mxu0  ;;  %4911 = vrot.lane.b32.xlu0 %v4910_v15, %s9062_s20  ;;  %v1172_v42 = vrot.slane %v5866_v48, 1  ;;  %v1173_v52 = vrot.slane %v1132_v49, 1  ;;  %v1196_v55 = vrot.slane %v5866_v48, 2 }
 0x1af   : > { %v4375_v54 = vadd.f32 %v4374_v16, %v4373_v17  ;;  %4916 = vrot.lane.b32.xlu1 %v4915_v45, %s8980_s29  ;;  %v1197_v56 = vrot.slane %v1132_v49, 2  ;;  %v4920_v32 = vpack.i.bf16 %v5827_v60, %v5866_v48  ;;  %v5928_v49 = vld [vmem:[#allocation2 + $0x98] sm:$0x3] }
 0x1b0   : > { %v1111_v57 = vmax.f32 %v1103_v33, 0.0  ;;  %v5876_v1 = vsel %vm545_vm3, %v1172_v42, %v1173_v52 }
 0x1b1   : > { %v1072_v7 = vadd.f32 %v5654_v47, %v4375_v54  ;;  %v4925_v51 = vpack.i.bf16 %v5843_v10, %v5876_v1  ;;  %v5882_v62 = vsel %vm570_vm2, %v1196_v55, %v1197_v56 }
 0x1b2   : > { %1119 = vst.msk [vmem:[#allocation2 + $0x71] sm:$0xff] %vm9039_vm0, %v1111_v57  ;;  %4921 = vrot.lane.b32.xlu0 %v4920_v32, %s8978_s22  ;;  %v4930_v2 = vpack.i.bf16 %v5855_v26, %v5882_v62  ;;  %v1224_v32 = vrot.slane %v5928_v49, 1 }
 0x1b3   : > { %v1089_v41 = vmul.f32 %v5733_v11, %v1072_v7  ;;  %4926 = vrot.lane.b32.xlu1 %v4925_v51, %s9062_s20 }
 0x1b4   : > { %v5890_v4 = vld [vmem:[#allocation2 + $0x60] sm:$0xff]  ;;  %v1134_v47 = vld [vmem:[#allocation2 + $0x68] sm:$0x3] }
 0x1b5   : > { %v1104_v58 = vadd.f32 %v5738_v18, %v1089_v41  ;;  %v4935_v5 = vpack.i.bf16 %v5861_v44, %v5890_v4  ;;  %v1175_v6 = vrot.slane %v5890_v4, 1  ;;  %v1176_v8 = vrot.slane %v1134_v47, 1 }
 0x1b6   : > { %4931 = vrot.lane.b32.xlu0 %v4930_v2, %s8980_s29  ;;  %v1199_v11 = vrot.slane %v5890_v4, 2  ;;  %v1200_v12 = vrot.slane %v1134_v47, 2  ;;  %v1225_v47 = vsel %vm545_vm3, %v613_v9, %v1224_v32 }
 0x1b7   : > { %v1112_v22 = vmax.f32 %v1104_v58, 0.0  ;;  %4936 = vrot.lane.b32.xlu1 %v4935_v5, %s8978_s22  ;;  %v5900_v14 = vsel %vm545_vm3, %v1175_v6, %v1176_v8 }
 0x1b8   : > { %v4940_v18 = vpack.i.bf16 %v5866_v48, %v5900_v14  ;;  %v5905_v30 = vsel %vm570_vm2, %v1199_v11, %v1200_v12 }
 0x1b9   : > { %1120 = vst.msk [vmem:[#allocation2 + $0x81] sm:$0xff] %vm9039_vm0, %v1112_v22  ;;  %v4945_v36 = vpack.i.bf16 %v5876_v1, %v5905_v30  ;;  %v5910_v37 = vld [vmem:[#allocation2 + $0x70] sm:$0xff]  ;;  %v1136_v38 = vld [vmem:[#allocation2 + $0x78] sm:$0x3] }
 0x1ba   : > { %4941 = vrot.lane.b32.xlu0 %v4940_v18, %s9062_s20  ;;  %v1178_v39 = vrot.slane %v5910_v37, 1  ;;  %v1179_v3 = vrot.slane %v1136_v38, 1  ;;  %v1202_v40 = vrot.slane %v5910_v37, 2  ;;  %v1203_v43 = vrot.slane %v1136_v38, 2 }
 0x1bb   : > { %4946 = vrot.lane.b32.xlu1 %v4945_v36, %s8980_s29  ;;  %v4950_v29 = vpack.i.bf16 %v5882_v62, %v5910_v37  ;;  %v5028_v36 = vld [vmem:[#allocation2] sm:$0xff] }
 0x1bc   : > { %v5919_v15 = vsel %vm545_vm3, %v1178_v39, %v1179_v3  ;;  %v5924_v45 = vsel %vm570_vm2, %v1202_v40, %v1203_v43  ;;  %v1455_v3 = vld [vmem:[%s8962_s4 + $0x110] sm:$0xff]  ;;  %v1456_v40 = vld [vmem:[%s8962_s4 + $0x118] sm:$0xff] }
 0x1bd   : > { %v4955_v17 = vpack.i.bf16 %v5890_v4, %v5919_v15  ;;  %v4960_v33 = vpack.i.bf16 %v5900_v14, %v5924_v45  ;;  %v4975_v58 = vpack.i.bf16 %v5924_v45, %v5545_v59  ;;  %v1762_v59 = vld [vmem:[%s8965_s7 + $0x18] sm:$0xff] }
 0x1be   : > { %4951 = vrot.lane.b32.xlu0 %v4950_v29, %s8978_s22 }
 0x1bf   : > { %4956 = vrot.lane.b32.xlu1 %v4955_v17, %s9062_s20 }
 0x1c0   : > { %v1137_v16 = vld [vmem:[#allocation2 + $0x80] sm:$0xff]  ;;  %v1138_v42 = vld [vmem:[#allocation2 + $0x88] sm:$0x3] }
 0x1c1   : > { %v4965_v52 = vpack.i.bf16 %v5905_v30, %v1137_v16  ;;  %v1207_v54 = vrot.slane %v1137_v16, 1  ;;  %v1208_v55 = vrot.slane %v1138_v42, 1  ;;  %v1218_v56 = vrot.slane %v1137_v16, 2 }
 0x1c2   : > { %4961 = vrot.lane.b32.xlu0 %v4960_v33, %s8980_s29  ;;  %v1219_v57 = vrot.slane %v1138_v42, 2  ;;  %v4985_v5 = vpack.i.bf16 %v1137_v16, %v1225_v47 }
 0x1c3   : > { %4966 = vrot.lane.b32.xlu1 %v4965_v52, %s8978_s22  ;;  %v5937_v7 = vsel %vm545_vm3, %v1207_v54, %v1208_v55  ;;  %v4654_v55 = vpack.c.bf16 %v1456_v40, %v1455_v3 }
 0x1c4   : > { %v4970_v51 = vpack.i.bf16 %v5910_v37, %v5937_v7  ;;  %v5942_v41 = vsel %vm570_vm2, %v1218_v56, %v1219_v57 }
 0x1c5   : > { %v4980_v2 = vpack.i.bf16 %v5919_v15, %v5942_v41 }
 0x1c6   : > { %4971 = vrot.lane.b32.xlu0 %v4970_v51, %s9062_s20 }
 0x1c7   : > { %4981 = vrot.lane.b32.xlu1 %v4980_v2, %s8980_s29  ;;  %s8984_s29 = smov 24  }
 0x1ca   : > { %4976 = vrot.lane.b32.xlu0 %v4975_v58, %s8978_s22  ;;  %s9025_s22 = smov 22  }
 0x1cb   : > { %4986 = vrot.lane.b32.xlu1 %v4985_v5, %s9062_s20 }
 0x20f   : > { %v4872_v6 = vpop.permute.xlu0 %4871 }
 0x210   : > { %v4874_v8 = vunpack.i.h.bf16 %v4872_v6  ;;  %v4873_v11 = vunpack.i.l.bf16 %v4872_v6 }
 0x211   : > { %v4877_v12 = vpop.permute.xlu1 %4876 }
 0x212   : > { %v4879_v22 = vunpack.i.h.bf16 %v4877_v12  ;;  %v4878_v18 = vunpack.i.l.bf16 %v4877_v12  ;;  %v1373_v38 = vsel %vm9039_vm0, %v5028_v36, %v4874_v8  ;;  %v1397_v9 = vsel %vm9039_vm0, %v5804_v27, %v4873_v11 }
 0x214   : > { %v4882_v39 = vpop.permute.xlu0 %4881  ;;  %v1405_v42 = vsel %vm9038_vm4, %v1397_v9, %v4878_v18  ;;  %v1381_v52 = vsel %vm9038_vm4, %v1373_v38, %v4879_v22 }
 0x215   : > { %v4884_v43 = vunpack.i.h.bf16 %v4882_v39  ;;  %v4883_v29 = vunpack.i.l.bf16 %v4882_v39  ;;  %v4887_v17 = vpop.permute.xlu1 %4886 }
 0x216   : > { %v4889_v33 = vunpack.i.h.bf16 %v4887_v17  ;;  %v4888_v16 = vunpack.i.l.bf16 %v4887_v17 }
 0x217   : > { %v1413_v27 = vsel %vm9037_vm5, %v1405_v42, %v4883_v29  ;;  %v1389_v54 = vsel %vm9037_vm5, %v1381_v52, %v4884_v43 }
 0x218   : > { %v4892_v56 = vpop.permute.xlu0 %4891  ;;  %1537 = vmatprep.mubr.f32.mxu1 %v1413_v27  ;;  %v1398_v58 = vsel %vm9039_vm0, %v5798_v13, %v4888_v16  ;;  %v1374_v5 = vsel %vm9039_vm0, %v5774_v53, %v4889_v33 }
 0x219   : > { %v4894_v57 = vunpack.i.h.bf16 %v4892_v56  ;;  %v4893_v32 = vunpack.i.l.bf16 %v4892_v56  ;;  %v4897_v51 = vpop.permute.xlu1 %4896  ;;  %1538 = vmatmul.mubr.f32.vlgmr.msra.gmra.mrb[8].mxu1 %v1389_v54 }
 0x21a   : > { %v4899_v2 = vunpack.i.h.bf16 %v4897_v51  ;;  %v4898_v47 = vunpack.i.l.bf16 %v4897_v51  ;;  %4653 = vmatpush3.bf16.msra.mxu1 %v5837_v35 }
 0x21b   : > { %v1406_v6 = vsel %vm9038_vm4, %v1398_v58, %v4893_v32  ;;  %v1382_v8 = vsel %vm9038_vm4, %v1374_v5, %v4894_v57  ;;  %4655 = vmatprep.subr.bf16.mxu1 %v4654_v55 }
 0x21c   : > { %v4902_v11 = vpop.permute.xlu0 %4901  ;;  %v1414_v12 = vsel %vm9037_vm5, %v1406_v6, %v4898_v47  ;;  %v1390_v22 = vsel %vm9037_vm5, %v1382_v8, %v4899_v2 }
 0x21d   : > { %v4904_v18 = vunpack.i.h.bf16 %v4902_v11  ;;  %v4903_v36 = vunpack.i.l.bf16 %v4902_v11  ;;  %v4907_v38 = vpop.permute.xlu1 %4906  ;;  %1542 = vmatprep.mubr.f32.mxu1 %v1414_v12 }
 0x21e   : > { %v4909_v13 = vunpack.i.h.bf16 %v4907_v38  ;;  %v4908_v9 = vunpack.i.l.bf16 %v4907_v38  ;;  %1543 = vmatmul.mubr.f32.gmra.mrb[10].mxu1 %v1390_v22 }
 0x21f   : > { %v1399_v53 = vsel %vm9039_vm0, %v5821_v63, %v4903_v36  ;;  %v1375_v35 = vsel %vm9039_vm0, %v5787_v34, %v4904_v18  ;;  %4657 = vmatpush3.bf16.msra.mxu1 %v4654_v55 }
 0x220   : > { %v4912_v39 = vpop.permute.xlu0 %4911  ;;  %v1407_v33 = vsel %vm9038_vm4, %v1399_v53, %v4908_v9  ;;  %v1383_v16 = vsel %vm9038_vm4, %v1375_v35, %v4909_v13 }
 0x221   : > { %v4914_v3 = vunpack.i.h.bf16 %v4912_v39  ;;  %v4913_v40 = vunpack.i.l.bf16 %v4912_v39  ;;  %v4917_v43 = vpop.permute.xlu1 %4916 }
 0x222   : > { %v4919_v29 = vunpack.i.h.bf16 %v4917_v43  ;;  %v4918_v17 = vunpack.i.l.bf16 %v4917_v43 }
 0x223   : > { %v1415_v42 = vsel %vm9037_vm5, %v1407_v33, %v4913_v40  ;;  %v1391_v52 = vsel %vm9037_vm5, %v1383_v16, %v4914_v3 }
 0x224   : > { %v4922_v27 = vpop.permute.xlu0 %4921  ;;  %1547 = vmatprep.mubr.f32.mxu1 %v1415_v42  ;;  %v1400_v57 = vsel %vm9039_vm0, %v5855_v26, %v4918_v17  ;;  %v1376_v32 = vsel %vm9039_vm0, %v5812_v50, %v4919_v29 }
 0x225   : > { %v4924_v63 = vunpack.i.h.bf16 %v4922_v27  ;;  %v4923_v54 = vunpack.i.l.bf16 %v4922_v27  ;;  %v4927_v34 = vpop.permute.xlu1 %4926  ;;  %1548 = vmatmul.mubr.f32.gmra.mrb[12].mxu1 %v1391_v52 }
 0x226   : > { %v4929_v55 = vunpack.i.h.bf16 %v4927_v34  ;;  %v4928_v56 = vunpack.i.l.bf16 %v4927_v34 }
 0x227   : > { %v1408_v51 = vsel %vm9038_vm4, %v1400_v57, %v4923_v54  ;;  %v1384_v2 = vsel %vm9038_vm4, %v1376_v32, %v4924_v63 }
 0x228   : > { %v4932_v47 = vpop.permute.xlu0 %4931  ;;  %v1416_v58 = vsel %vm9037_vm5, %v1408_v51, %v4928_v56  ;;  %v1392_v5 = vsel %vm9037_vm5, %v1384_v2, %v4929_v55 }
 0x229   : > { %v4934_v6 = vunpack.i.h.bf16 %v4932_v47  ;;  %v4933_v8 = vunpack.i.l.bf16 %v4932_v47  ;;  %v4937_v11 = vpop.permute.xlu1 %4936  ;;  %1552 = vmatprep.mubr.f32.mxu1 %v1416_v58 }
 0x22a   : > { %v4939_v12 = vunpack.i.h.bf16 %v4937_v11  ;;  %v4938_v22 = vunpack.i.l.bf16 %v4937_v11  ;;  %1553 = vmatmul.mubr.f32.gmra.mrb[14].mxu1 %v1392_v5 }
 0x22b   : > { %v1401_v26 = vsel %vm9039_vm0, %v5876_v1, %v4933_v8  ;;  %v1377_v50 = vsel %vm9039_vm0, %v5843_v10, %v4934_v6 }
 0x22c   : > { %v4942_v18 = vpop.permute.xlu0 %4941  ;;  %v1409_v35 = vsel %vm9038_vm4, %v1401_v26, %v4938_v22  ;;  %v1385_v39 = vsel %vm9038_vm4, %v1377_v50, %v4939_v12 }
 0x22d   : > { %v4944_v36 = vunpack.i.h.bf16 %v4942_v18  ;;  %v4943_v38 = vunpack.i.l.bf16 %v4942_v18  ;;  %v4947_v13 = vpop.permute.xlu1 %4946 }
 0x22e   : > { %v4949_v9 = vunpack.i.h.bf16 %v4947_v13  ;;  %v4948_v53 = vunpack.i.l.bf16 %v4947_v13 }
 0x22f   : > { %v1417_v3 = vsel %vm9037_vm5, %v1409_v35, %v4943_v38  ;;  %v1393_v40 = vsel %vm9037_vm5, %v1385_v39, %v4944_v36 }
 0x230   : > { %v4952_v43 = vpop.permute.xlu0 %4951  ;;  %1557 = vmatprep.mubr.f32.mxu1 %v1417_v3  ;;  %v1402_v16 = vsel %vm9039_vm0, %v5900_v14, %v4948_v53  ;;  %v1378_v42 = vsel %vm9039_vm0, %v5866_v48, %v4949_v9 }
 0x231   : > { %v4954_v1 = vunpack.i.h.bf16 %v4952_v43  ;;  %v4953_v29 = vunpack.i.l.bf16 %v4952_v43  ;;  %v4957_v17 = vpop.permute.xlu1 %4956  ;;  %1558 = vmatmul.mubr.f32.gmra.mrb[16].mxu1 %v1393_v40 }
 0x232   : > { %v4959_v10 = vunpack.i.h.bf16 %v4957_v17  ;;  %v4958_v33 = vunpack.i.l.bf16 %v4957_v17 }
 0x233   : > { %v1410_v52 = vsel %vm9038_vm4, %v1402_v16, %v4953_v29  ;;  %v1386_v27 = vsel %vm9038_vm4, %v1378_v42, %v4954_v1 }
 0x234   : > { %v4962_v63 = vpop.permute.xlu0 %4961  ;;  %v1418_v54 = vsel %vm9037_vm5, %v1410_v52, %v4958_v33  ;;  %v1394_v34 = vsel %vm9037_vm5, %v1386_v27, %v4959_v10 }
 0x235   : > { %v4964_v55 = vunpack.i.h.bf16 %v4962_v63  ;;  %v4963_v56 = vunpack.i.l.bf16 %v4962_v63  ;;  %v4967_v57 = vpop.permute.xlu1 %4966  ;;  %1562 = vmatprep.mubr.f32.mxu1 %v1418_v54 }
 0x236   : > { %v4969_v32 = vunpack.i.h.bf16 %v4967_v57  ;;  %v4968_v51 = vunpack.i.l.bf16 %v4967_v57  ;;  %1563 = vmatmul.mubr.f32.gmra.mrb[18].mxu1 %v1394_v34 }
 0x237   : > { %v1403_v14 = vsel %vm9039_vm0, %v5919_v15, %v4963_v56  ;;  %v1379_v48 = vsel %vm9039_vm0, %v5890_v4, %v4964_v55 }
 0x238   : > { %v4972_v2 = vpop.permute.xlu0 %4971  ;;  %v1411_v11 = vsel %vm9038_vm4, %v1403_v14, %v4968_v51  ;;  %v1387_v12 = vsel %vm9038_vm4, %v1379_v48, %v4969_v32 }
 0x239   : > { %v4974_v47 = vunpack.i.h.bf16 %v4972_v2  ;;  %v4973_v58 = vunpack.i.l.bf16 %v4972_v2  ;;  %v4982_v5 = vpop.permute.xlu1 %4981 }
 0x23a   : > { %v4984_v6 = vunpack.i.h.bf16 %v4982_v5  ;;  %v4983_v8 = vunpack.i.l.bf16 %v4982_v5 }
 0x23b   : > { %v1419_v22 = vsel %vm9037_vm5, %v1411_v11, %v4973_v58  ;;  %v1395_v26 = vsel %vm9037_vm5, %v1387_v12, %v4974_v47  ;;  %v4288_v47 = vld [vmem:[%s8963_s5] ss:$0 sm:$0xff] }
 0x23c   : > { %v4977_v50 = vpop.permute.xlu0 %4976  ;;  %1567 = vmatprep.mubr.f32.mxu1 %v1419_v22  ;;  %v1404_v13 = vsel %vm9039_vm0, %v5937_v7, %v4983_v8  ;;  %v1380_v9 = vsel %vm9039_vm0, %v5910_v37, %v4984_v6  ;;  %v1227_v37 = vrot.slane %v5928_v49, 2  ;;  %v4289_v6 = vld [vmem:[%s8964_s6] ss:$0 sm:$0xff] }
 0x23d   : > { %v4979_v15 = vunpack.i.h.bf16 %v4977_v50  ;;  %v4978_v18 = vunpack.i.l.bf16 %v4977_v50  ;;  %v4987_v36 = vpop.permute.xlu1 %4986  ;;  %1568 = vmatmul.mubr.f32.gmra.mrb[20].mxu1 %v1395_v26 }
 0x23e   : > { %v4989_v4 = vunpack.i.h.bf16 %v4987_v36  ;;  %v4988_v38 = vunpack.i.l.bf16 %v4987_v36 }
 0x23f   : > { %v1412_v53 = vsel %vm9038_vm4, %v1404_v13, %v4978_v18  ;;  %v1388_v35 = vsel %vm9038_vm4, %v1380_v9, %v4979_v15  ;;  %vm2820_vm4 = vcmask 211968  }
 0x240   : > { %v1420_v39 = vsel %vm9037_vm5, %v1412_v53, %v4988_v38  ;;  %v1396_v3 = vsel %vm9037_vm5, %v1388_v35, %v4989_v4  ;;  %vm2811_vm5 = vcmask 195584  }
 0x241   : > { %1572 = vmatprep.mubr.f32.mxu1 %v1420_v39 }
 0x242   : > { %1573 = vmatmul.mubr.f32.gmra.mrb[22].mxu1 %v1396_v3 }
 0x243   : > { %4512 = vmatprep.mubr.msk.f32.mxu1 %vm9039_vm0, %v5807_v46  ;;  %v1228_v46 = vsel %vm570_vm2, %v616_v61, %v1227_v37 }
 0x246   : > { %4513 = vmatmul.mubr.msk.f32.vlgmr.msra.gmra.mrb[24].mxu1 %vm9039_vm0, %v5827_v60  ;;  %v1759_v60 = vld [vmem:[%s8965_s7] sm:$0xff] }
 0x247   : > { %4515 = vmatprep.mubr.msk.f32.mxu1 %vm9039_vm0, %v5861_v44  ;;  %v1760_v44 = vld [vmem:[%s8965_s7 + $0x8] sm:$0xff] }
 0x24a   : > { %4516 = vmatmul.mubr.msk.f32.gmra.mrb[26].mxu1 %vm9039_vm0, %v5882_v62  ;;  %v1761_v62 = vld [vmem:[%s8965_s7 + $0x10] sm:$0xff] }
 0x24b   : > { %4518 = vmatprep.mubr.msk.f32.mxu1 %vm9039_vm0, %v5905_v30  ;;  %v5107_v30 = vmov 0.0|0.0   ;;  %v4662_v61 = vpack.c.bf16 %v1762_v59, %v1761_v62 }
 0x24c   : > { %4658 = vmatprep.subr.bf16.mxu1 %v5107_v30 }
 0x24e   : > { %4519 = vmatmul.mubr.msk.f32.gmra.mrb[28].mxu1 %vm9039_vm0, %v5924_v45  ;;  %v4659_v45 = vpack.c.bf16 %v1760_v44, %v1759_v60 }
 0x24f   : > { %4521 = vmatprep.mubr.msk.f32.mxu1 %vm9039_vm0, %v5942_v41 }
 0x250   : > { %4660 = vmatpush3.bf16.msra.mxu1 %v4659_v45 }
 0x251   : > { %4661 = vmatprep.subr.bf16.mxu1 %v5107_v30 }
 0x252   : > { %4522 = vmatmul.mubr.msk.f32.gmra.mrb[30].mxu1 %vm9039_vm0, %v1228_v46 }
 0x253   : > { %4532 = vmatprep.mubr.msk.f32.mxu1 %vm5108_vm6, %v5103_v0 }
 0x254   : > { %4663 = vmatpush3.bf16.msra.mxu1 %v4662_v61 }
 0x255   : > { %4535 = vmatprep.subr.mxu1 %v5103_v0 }
 0x2ec   : > { %v4420_v49 = vpop.f32.mrb[8].mxu1 }
 0x2ed   : > { %v4421_v7 = vpop.f32.mrb[9].mxu1 }
 0x2ee   : > { %v4422_v41 = vadd.f32 %v4421_v7, %v4420_v49 }
 0x2f1   : > { %v4423_v40 = vpop.f32.mrb[10].mxu1 }
 0x2f2   : > { %v4424_v43 = vpop.f32.mrb[11].mxu1 }
 0x2f3   : > { %v4425_v1 = vadd.f32 %v4424_v43, %v4423_v40 }
 0x2f8   : > { %v4426_v29 = vpop.f32.mrb[12].mxu1 }
 0x2f9   : > { %v4427_v17 = vpop.f32.mrb[13].mxu1 }
 0x2fa   : > { %v4428_v10 = vadd.f32 %v4427_v17, %v4426_v29 }
 0x2fd   : > { %v4429_v33 = vpop.f32.mrb[14].mxu1 }
 0x2fe   : > { %v4430_v16 = vpop.f32.mrb[15].mxu1 }
 0x2ff   : > { %v4431_v42 = vadd.f32 %v4430_v16, %v4429_v33 }
 0x304   : > { %v4432_v52 = vpop.f32.mrb[16].mxu1 }
 0x305   : > { %v4433_v27 = vpop.f32.mrb[17].mxu1 }
 0x306   : > { %v4434_v63 = vadd.f32 %v4433_v27, %v4432_v52 }
 0x309   : > { %v4435_v54 = vpop.f32.mrb[18].mxu1 }
 0x30a   : > { %v4436_v34 = vpop.f32.mrb[19].mxu1 }
 0x30b   : > { %v4437_v55 = vadd.f32 %v4436_v34, %v4435_v54 }
 0x310   : > { %v4438_v56 = vpop.f32.mrb[20].mxu1 }
 0x311   : > { %v4439_v57 = vpop.f32.mrb[21].mxu1 }
 0x312   : > { %v4440_v32 = vadd.f32 %v4439_v57, %v4438_v56 }
 0x315   : > { %v4441_v51 = vpop.f32.mrb[22].mxu1 }
 0x316   : > { %v4442_v14 = vpop.f32.mrb[23].mxu1 }
 0x317   : > { %v4443_v48 = vadd.f32 %v4442_v14, %v4441_v51 }
 0x319   : > { %v4514_v2 = vpop.f32.mrb[24].mxu1 }
 0x31a   : > { %v1650_v58 = vadd.f32 %v4514_v2, %v4425_v1  ;;  %v1644_v5 = vpop.f32.mrb[25].mxu1 }
 0x31b   : > { %v1645_v8 = vadd.f32 %v4422_v41, %v1644_v5 }
 0x31c   : > { %v1691_v11 = vmul.f32 %v4288_v47, %v1650_v58 }
 0x31d   : > { %v1690_v12 = vmul.f32 %v4288_v47, %v1645_v8  ;;  %v4517_v22 = vpop.f32.mrb[26].mxu1 }
 0x31e   : > { %v6065_v26 = vadd.f32 %v4289_v6, %v1691_v11  ;;  %v1660_v50 = vadd.f32 %v4517_v22, %v4431_v42  ;;  %v1654_v15 = vpop.f32.mrb[27].mxu1 }
 0x31f   : > { %v6067_v18 = vadd.f32 %v4289_v6, %v1690_v12  ;;  %v1655_v36 = vadd.f32 %v4428_v10, %v1654_v15 }
 0x320   : > { %v1693_v4 = vmul.f32 %v4288_v47, %v1660_v50  ;;  %v1714_v38 = vsel %vm9039_vm0, %v6065_v26, 0.0  ;;  %v1737_v42 = vsel %vm9039_vm0, %v6065_v26, -inf }
 0x321   : > { %v1713_v13 = vsel %vm9039_vm0, %v6067_v18, 0.0  ;;  %v1692_v9 = vmul.f32 %v4288_v47, %v1655_v36  ;;  %v4520_v53 = vpop.f32.mrb[28].mxu1 }
 0x322   : > { %v1670_v35 = vadd.f32 %v4520_v53, %v4437_v55  ;;  %v1664_v39 = vpop.f32.mrb[29].mxu1  ;;  %v6073_v3 = vadd.f32 %v4289_v6, %v1693_v4  ;;  %v1715_v60 = vadd.f32 %v1714_v38, %v1713_v13 }
 0x323   : > { %v6075_v37 = vadd.f32 %v4289_v6, %v1692_v9  ;;  %v1665_v46 = vadd.f32 %v4434_v63, %v1664_v39  ;;  %v1736_v63 = vsel %vm9039_vm0, %v6067_v18, -inf }
 0x324   : > { %v1695_v44 = vmul.f32 %v4288_v47, %v1670_v35  ;;  %v1718_v41 = vsel %vm9039_vm0, %v6073_v3, 0.0  ;;  %v1739_v54 = vsel %vm9039_vm0, %v6073_v3, -inf }
 0x325   : > { %v1716_v62 = vsel %vm9039_vm0, %v6075_v37, 0.0  ;;  %v1694_v30 = vmul.f32 %v4288_v47, %v1665_v46  ;;  %v4523_v45 = vpop.f32.mrb[30].mxu1  ;;  %v1738_v14 = vsel %vm9039_vm0, %v6075_v37, -inf }
 0x326   : > { %v1717_v59 = vadd.f32 %v1716_v62, %v1715_v60  ;;  %v6079_v61 = vadd.f32 %v4289_v6, %v1695_v44  ;;  %v1680_v49 = vadd.f32 %v4523_v45, %v4443_v48  ;;  %v1674_v7 = vpop.f32.mrb[31].mxu1  ;;  %v6174_v45 = vld [vmem:[#allocation3 + $0x18] sm:$0x3f] }
 0x327   : > { %v6083_v40 = vadd.f32 %v4289_v6, %v1694_v30  ;;  %v1675_v43 = vadd.f32 %v4440_v32, %v1674_v7  ;;  %v6172_v30 = vld [vmem:[#allocation3 + $0x10] sm:$0xff]  ;;  %v1844_v7 = vld [vmem:[%s8967_s9] sm:$0x3] }
 0x328   : > { %v1719_v1 = vadd.f32 %v1718_v41, %v1717_v59  ;;  %v1697_v29 = vmul.f32 %v4288_v47, %v1680_v49  ;;  %v1742_v17 = vsel %vm9039_vm0, %v6079_v61, -inf  ;;  %v1722_v34 = vsel %vm9039_vm0, %v6079_v61, 0.0 }
 0x329   : > { %v1720_v10 = vsel %vm9039_vm0, %v6083_v40, 0.0  ;;  %v1740_v33 = vsel %vm9039_vm0, %v6083_v40, -inf  ;;  %v1696_v16 = vmul.f32 %v4288_v47, %v1675_v43  ;;  %v1743_v56 = vmax.f32 %v1737_v42, %v1742_v17  ;;  %v6189_v43 = vld [vmem:[#allocation3 + $0x8] sm:$0x3f] }
 0x32a   : > { %v1721_v52 = vadd.f32 %v1720_v10, %v1719_v1  ;;  %v6093_v27 = vadd.f32 %v4289_v6, %v1697_v29  ;;  %v1741_v57 = vmax.f32 %v1736_v63, %v1740_v33  ;;  %v2073_v59 = vrot.slane %v6172_v30, 1  ;;  %v6191_v1 = vld [vmem:[#allocation3 + $0x20] sm:$0xff]  ;;  %v6195_v10 = vld [vmem:[#allocation3 + $0x28] sm:$0x3f] }
 0x32b   : > { %v6101_v55 = vadd.f32 %v4289_v6, %v1696_v16  ;;  %v2074_v49 = vrot.slane %v6174_v45, 1  ;;  %v2095_v17 = vrot.slane %v6189_v43, 2  ;;  %v2100_v33 = vrot.slane %v6191_v1, 2 }
 0x32c   : > { %v1746_v32 = vsel %vm9039_vm0, %v6093_v27, -inf  ;;  %v1723_v51 = vadd.f32 %v1722_v34, %v1721_v52  ;;  %v1726_v6 = vsel %vm9039_vm0, %v6093_v27, 0.0  ;;  %v1748_v8 = vmax.f32 %v1741_v57, %v1743_v56 }
 0x32d   : > { %v1747_v48 = vmax.f32 %v1739_v54, %v1746_v32  ;;  %v1724_v2 = vsel %vm9039_vm0, %v6101_v55, 0.0  ;;  %v1744_v47 = vsel %vm9039_vm0, %v6101_v55, -inf  ;;  %v6183_v41 = vsel %vm545_vm3, %v2073_v59, %v2074_v49 }
 0x32e   : > { %v1725_v58 = vadd.f32 %v1724_v2, %v1723_v51  ;;  %v1745_v5 = vmax.f32 %v1738_v14, %v1744_v47  ;;  %2355 = vrot.lane.b32.xlu0 %v6183_v41, %s8994_s25  ;;  %v2101_v16 = vrot.slane %v6195_v10, 2  ;;  %v2071_v63 = vrot.slane %v6189_v43, 1 }
 0x32f   : > { %v2120_v34 = vrot.slane %v6189_v43, 3  ;;  %v2076_v32 = vrot.slane %v6191_v1, 1  ;;  %v2077_v51 = vrot.slane %v6195_v10, 1  ;;  %v2098_v2 = vrot.slane %v6174_v45, 2 }
 0x330   : > { %v1727_v11 = vadd.f32 %v1726_v6, %v1725_v58  ;;  %v1749_v12 = vmax.f32 %v1745_v5, %v1747_v48  ;;  %v6206_v56 = vsel %vm570_vm2, %v2100_v33, %v2101_v16  ;;  %v2097_v48 = vrot.slane %v6172_v30, 2 }
 0x331   : > { %v6213_v14 = vsel %vm545_vm3, %v2076_v32, %v2077_v51  ;;  %v2125_v58 = vrot.slane %v6191_v1, 3  ;;  %v2126_v5 = vrot.slane %v6195_v10, 3  ;;  %v2196_v59 = vrot.slane %v6172_v30, 6  ;;  %v6312_v51 = vld [vmem:[#allocation3 + $0xc0] sm:$0xff] }
 0x332   : > { %v1728_v22 = vrot.slane %v1727_v11, 4  ;;  %v1750_v50 = vmax.f32 %v1748_v8, %v1749_v12  ;;  %v2099_v6 = vsel %vm570_vm2, %v2097_v48, %v2098_v2  ;;  %v2122_v8 = vrot.slane %v6172_v30, 3  ;;  %v6314_v48 = vld [vmem:[#allocation3 + $0xc8] sm:$0x3f] }
 0x333   : > { %v6229_v12 = vsel %vm2118_vm11, %v2125_v58, %v2126_v5  ;;  %v2197_v49 = vrot.slane %v6174_v45, 6  ;;  %v2316_v58 = vrot.slane %v6314_v48, 1 }
 0x334   : > { %v1729_v15 = vadd.f32 %v1728_v22, %v1727_v11  ;;  %v1751_v36 = vrot.slane %v1750_v50, 4  ;;  %v2123_v11 = vrot.slane %v6174_v45, 3 }
 0x335   : > { %v2198_v33 = vsel %vm9040_vm10, %v2196_v59, %v2197_v49  ;;  %v2053_v59 = vld [vmem:[#allocation3 + $0xd8] sm:$0x3f] }
 0x336   : > { %v1730_v4 = vrot.slane %v1729_v15, 2  ;;  %v1752_v38 = vmax.f32 %v1750_v50, %v1751_v36  ;;  %v2145_v50 = vrot.slane %v6189_v43, 4  ;;  %v2147_v36 = vrot.slane %v6172_v30, 4 }
 0x338   : > { %v1731_v13 = vadd.f32 %v1730_v4, %v1729_v15  ;;  %v1753_v9 = vrot.slane %v1752_v38, 2  ;;  %v2124_v15 = vsel %vm2118_vm11, %v2122_v8, %v2123_v11  ;;  %v2148_v4 = vrot.slane %v6174_v45, 4 }
 0x33a   : > { %v1732_v53 = vrot.slane %v1731_v13, 1  ;;  %v1754_v35 = vmax.f32 %v1752_v38, %v1753_v9  ;;  %v2151_v9 = vrot.slane %v6195_v10, 4 }
 0x33c   : > { %v1733_v39 = vadd.f32 %v1732_v53, %v1731_v13  ;;  %v1755_v46 = vrot.slane %v1754_v35, 1  ;;  %v2150_v13 = vrot.slane %v6191_v1, 4  ;;  %v2149_v53 = vsel %vm2143_vm12, %v2147_v36, %v2148_v4 }
 0x33d   : > { %v2325_v36 = vrot.slane %v6314_v48, 4 }
 0x33e   : > { %v1735_v60 = vmul.f32 0.015625, %v1733_v39  ;;  %v1756_v44 = vmax.f32 %v1754_v35, %v1755_v46  ;;  %v2172_v35 = vrot.slane %v6172_v30, 5  ;;  %v2173_v39 = vrot.slane %v6174_v45, 5 }
 0x33f   : > { %v6248_v46 = vsel %vm2143_vm12, %v2150_v13, %v2151_v9 }
 0x340   : > { %v1758_v62 = vsel %vm1757_vm7, %v1735_v60, %v1756_v44  ;;  %v2170_v44 = vrot.slane %v6189_v43, 5  ;;  %vm9043_vm7 = vcmask 113664  }
 0x341   : > { %4533 = vmatmul.mubr.msk.f32.vlgmr.msra.gmra.mrb[32].mxu1 %vm9039_vm0, %v1758_v62  ;;  %v2174_v62 = vsel %vm2168_vm13, %v2172_v35, %v2173_v39  ;;  %v2318_v35 = vrot.slane %v6312_v51, 2  ;;  %v2319_v39 = vrot.slane %v6314_v48, 2 }
 0x342   : > { %4537 = vmatprep.mubr.msk.f32.mxu1 %vm5108_vm6, %v5103_v0  ;;  %4536 = vmatpush3.msk.msra.mxu1 %vm9040_vm10, %v1844_v7  ;;  %v6187_v0 = vld [vmem:[#allocation3] sm:$0xff]  ;;  %vm2757_vm6 = vcmask 97280  }
 0x343   : > { %v2094_v29 = vrot.slane %v6187_v0, 2  ;;  %v2070_v52 = vrot.slane %v6187_v0, 1  ;;  %v2119_v54 = vrot.slane %v6187_v0, 3  ;;  %v2144_v22 = vrot.slane %v6187_v0, 4 }
 0x344   : > { %v2169_v60 = vrot.slane %v6187_v0, 5  ;;  %v2193_v45 = vrot.slane %v6187_v0, 6 }
 0x345   : > { %v2096_v42 = vsel %vm570_vm2, %v2094_v29, %v2095_v17  ;;  %v2072_v57 = vsel %vm545_vm3, %v2070_v52, %v2071_v63  ;;  %v2121_v47 = vsel %vm2118_vm11, %v2119_v54, %v2120_v34  ;;  %v2146_v38 = vsel %vm2143_vm12, %v2144_v22, %v2145_v50 }
 0x346   : > { %2377 = vrot.lane.b32.xlu0 %v2096_v42, %s8992_s26  ;;  %2353 = vrot.lane.b32.xlu1 %v2072_v57, %s8994_s25  ;;  %v2171_v7 = vsel %vm2168_vm13, %v2169_v60, %v2170_v44  ;;  %v2175_v29 = vrot.slane %v6191_v1, 5  ;;  %v2176_v17 = vrot.slane %v6195_v10, 5  ;;  %v2194_v42 = vrot.slane %v6189_v43, 6  ;;  %v6293_v43 = vld [vmem:[#allocation3 + $0xb0] sm:$0xff] }
 0x347   : > { %v2199_v63 = vrot.slane %v6191_v1, 6  ;;  %v2200_v54 = vrot.slane %v6195_v10, 6  ;;  %v6295_v10 = vld [vmem:[#allocation3 + $0xb8] sm:$0x3f]  ;;  %v2287_v57 = vrot.slane %v6293_v43, 1  ;;  %v2321_v22 = vrot.slane %v6312_v51, 3 }
 0x348   : > { %v6265_v16 = vsel %vm2168_vm13, %v2175_v29, %v2176_v17  ;;  %v2195_v52 = vsel %vm9040_vm10, %v2193_v45, %v2194_v42  ;;  %v2308_v34 = vrot.slane %v6295_v10, 5  ;;  %v2288_v32 = vrot.slane %v6295_v10, 1  ;;  %v4290_v42 = vld [vmem:[%s8966_s8] ss:$0 sm:$0xff] }
 0x349   : > { %v2201_v0 = vsel %vm9040_vm10, %v2199_v63, %v2200_v54  ;;  %v2294_v8 = vrot.slane %v6295_v10, 3  ;;  %v2322_v50 = vrot.slane %v6314_v48, 3  ;;  %v2310_v4 = vrot.slane %v6293_v43, 6 }
 0x34a   : > { %2381 = vrot.lane.b32.xlu0 %v6206_v56, %s8992_s26  ;;  %2357 = vrot.lane.b32.xlu1 %v6213_v14, %s8994_s25  ;;  %v6319_v2 = vsel %vm545_vm3, %v2287_v57, %v2288_v32  ;;  %v2290_v13 = vrot.slane %v6293_v43, 2  ;;  %v2291_v9 = vrot.slane %v6295_v10, 2  ;;  %v2320_v60 = vsel %vm570_vm2, %v2318_v35, %v2319_v39 }
 0x34b   : > { %v2296_v44 = vrot.slane %v6293_v43, 4  ;;  %v2336_v29 = vrot.slane %v2053_v59, 1  ;;  %v2327_v17 = vrot.slane %v6312_v51, 5  ;;  %v2331_v63 = vrot.slane %v6314_v48, 6 }
 0x34c   : > { %v2345_v57 = vrot.slane %v2053_v59, 4 }
 0x34e   : > { %2401 = vrot.lane.b32.xlu0 %v2121_v47, %s5111_s14  ;;  %2379 = vrot.lane.b32.xlu1 %v2099_v6, %s8992_s26  ;;  %v2315_v47 = vrot.slane %v6312_v51, 1 }
 0x350   : > { %v6327_v5 = vsel %vm545_vm3, %v2315_v47, %v2316_v58  ;;  %v2342_v58 = vrot.slane %v2053_v59, 3 }
 0x352   : > { %2405 = vrot.lane.b32.xlu0 %v6229_v12, %s5111_s14  ;;  %2403 = vrot.lane.b32.xlu1 %v2124_v15, %s5111_s14 }
 0x356   : > { %2425 = vrot.lane.b32.xlu0 %v2146_v38, %s8990_s16  ;;  %2427 = vrot.lane.b32.xlu1 %v2149_v53, %s8990_s16 }
 0x35a   : > { %2429 = vrot.lane.b32.xlu0 %v6248_v46, %s8990_s16  ;;  %2451 = vrot.lane.b32.xlu1 %v2174_v62, %s9028_s17 }
 0x35e   : > { %2449 = vrot.lane.b32.xlu0 %v2171_v7, %s9028_s17  ;;  %2475 = vrot.lane.b32.xlu1 %v2198_v33, %s8988_s15 }
 0x362   : > { %2453 = vrot.lane.b32.xlu0 %v6265_v16, %s9028_s17  ;;  %2499 = vrot.lane.b32.xlu1 %v6191_v1, %s9017_s18 }
 0x366   : > { %2473 = vrot.lane.b32.xlu0 %v2195_v52, %s8988_s15  ;;  %2523 = vrot.lane.b32.xlu1 %v6213_v14, %s8982_s21  ;;  %v2330_v52 = vrot.slane %v6312_v51, 6 }
 0x36a   : > { %2477 = vrot.lane.b32.xlu0 %v2201_v0, %s8988_s15  ;;  %2547 = vrot.lane.b32.xlu1 %v6206_v56, %s9023_s23 }
 0x36e   : > { %2497 = vrot.lane.b32.xlu0 %v6172_v30, %s9017_s18  ;;  %2571 = vrot.lane.b32.xlu1 %v6229_v12, %s8996_s24  ;;  %v2307_v30 = vrot.slane %v6293_v43, 5 }
 0x372   : > { %2521 = vrot.lane.b32.xlu0 %v6183_v41, %s8982_s21  ;;  %2595 = vrot.lane.b32.xlu1 %v6248_v46, %s9025_s22  ;;  %s8986_s21 = smov 26   ;;  %v6304_v41 = vsel %vm2168_vm13, %v2307_v30, %v2308_v34 }
 0x376   : > { %2545 = vrot.lane.b32.xlu0 %v2099_v6, %s9023_s23  ;;  %2619 = vrot.lane.b32.xlu1 %v6265_v16, %s8984_s29  ;;  %v2293_v6 = vrot.slane %v6293_v43, 3 }
 0x378   : > { %v6336_v11 = vsel %vm2118_vm11, %v2293_v6, %v2294_v8 }
 0x37a   : > { %2569 = vrot.lane.b32.xlu0 %v2124_v15, %s8996_s24  ;;  %2643 = vrot.lane.b32.xlu1 %v2201_v0, %s8986_s21  ;;  %v2323_v15 = vsel %vm2118_vm11, %v2321_v22, %v2322_v50 }
 0x37e   : > { %2593 = vrot.lane.b32.xlu0 %v2149_v53, %s9025_s22  ;;  %3341 = vrot.lane.b32.xlu1 %v6304_v41, %s8994_s25  ;;  %v2292_v53 = vsel %vm570_vm2, %v2290_v13, %v2291_v9  ;;  %v4292_v9 = vld [vmem:[%s8968_s10] ss:$0 sm:$0xff] }
 0x382   : > { %2617 = vrot.lane.b32.xlu0 %v2174_v62, %s8984_s29  ;;  %3387 = vrot.lane.b32.xlu1 %v6293_v43, %s5111_s14  ;;  %s9015_s29 = smov 28   ;;  %v2297_v62 = vrot.slane %v6295_v10, 4 }
 0x384   : > { %v6386_v49 = vsel %vm2143_vm12, %v2296_v44, %v2297_v62 }
 0x385   : > { %9064 = vst [vmem:[#allocation21_spill] sm:$0xff] %v6386_v49 }
 0x386   : > { %2641 = vrot.lane.b32.xlu0 %v2198_v33, %s8986_s21  ;;  %3411 = vrot.lane.b32.xlu1 %v6319_v2, %s8990_s16  ;;  %s9019_s21 = smov 30   ;;  %v2328_v33 = vrot.slane %v6314_v48, 5 }
 0x388   : > { %v6400_v45 = vsel %vm2168_vm13, %v2327_v17, %v2328_v33 }
 0x38a   : > { %2665 = vrot.lane.b32.xlu0 %v6191_v1, %s9015_s29  ;;  %3413 = vrot.lane.b32.xlu1 %v6327_v5, %s8990_s16  ;;  %v2324_v1 = vrot.slane %v6312_v51, 4 }
 0x38e   : > { %2689 = vrot.lane.b32.xlu0 %v6213_v14, %s9019_s21  ;;  %3459 = vrot.lane.b32.xlu1 %v6336_v11, %s8988_s15  ;;  %v2326_v14 = vsel %vm2143_vm12, %v2324_v1, %v2325_v36 }
 0x392   : > { %2847 = vrot.lane.b32.xlu0 %v6229_v12, %s8994_s25  ;;  %3461 = vrot.lane.b32.xlu1 %v2323_v15, %s8988_s15  ;;  %v2311_v12 = vrot.slane %v6295_v10, 6  ;;  %s9065_s15 = smov 24   ;;  %v6414_v10 = vsel %vm9040_vm10, %v2330_v52, %v2331_v63  ;;  %s9149_s25 = smov 20  }
 0x393   : > { %9067 = vst [vmem:[#allocation22_spill] sm:$0xff] %v6414_v10 }
 0x394   : > { %v6362_v38 = vsel %vm9040_vm10, %v2310_v4, %v2311_v12 }
 0x395   : > { %9063 = vst [vmem:[#allocation20_spill] sm:$0xff] %v6362_v38 }
 0x396   : > { %2871 = vrot.lane.b32.xlu0 %v6248_v46, %s8992_s26  ;;  %3553 = vrot.lane.b32.xlu1 %v6293_v43, %s8996_s24  ;;  %v2052_v46 = vld [vmem:[#allocation3 + $0xd0] sm:$0xff] }
 0x397   : > { %v2335_v7 = vrot.slane %v2052_v46, 1  ;;  %v2344_v34 = vrot.slane %v2052_v46, 4  ;;  %v2338_v32 = vrot.slane %v2052_v46, 2  ;;  %v2341_v47 = vrot.slane %v2052_v46, 3 }
 0x399   : > { %v2343_v6 = vsel %vm2118_vm11, %v2341_v47, %v2342_v58 }
 0x39a   : > { %2895 = vrot.lane.b32.xlu0 %v6265_v16, %s5111_s14  ;;  %3485 = vrot.lane.b32.xlu1 %v2326_v14, %s9017_s18  ;;  %v2337_v16 = vsel %vm545_vm3, %v2335_v7, %v2336_v29 }
 0x39e   : > { %2919 = vrot.lane.b32.xlu0 %v2201_v0, %s8990_s16  ;;  %3577 = vrot.lane.b32.xlu1 %v6319_v2, %s9025_s22  ;;  %s9066_s16 = smov 16  }
 0x3a2   : > { %3365 = vrot.lane.b32.xlu0 %v6362_v38, %s8992_s26  ;;  %3531 = vrot.lane.b32.xlu1 %v6362_v38, %s9023_s23  ;;  %s9150_s26 = smov 2  }
 0x3a6   : > { %3389 = vrot.lane.b32.xlu0 %v6312_v51, %s5111_s14  ;;  %3555 = vrot.lane.b32.xlu1 %v6312_v51, %s8996_s24  ;;  %v2339_v51 = vrot.slane %v2053_v59, 2 }
 0x3a8   : > { %v2340_v48 = vsel %vm570_vm2, %v2338_v32, %v2339_v51 }
 0x3aa   : > { %3435 = vrot.lane.b32.xlu0 %v2292_v53, %s9028_s17  ;;  %3557 = vrot.lane.b32.xlu1 %v2052_v46, %s8996_s24  ;;  %s9068_s24 = smov 26  }
 0x3ae   : > { %3437 = vrot.lane.b32.xlu0 %v2320_v60, %s9028_s17  ;;  %3649 = vrot.lane.b32.xlu1 %v6386_v49, %s9015_s29 }
 0x3b2   : > { %3483 = vrot.lane.b32.xlu0 %v6386_v49, %s9017_s18  ;;  %3125 = vrot.lane.b32.xlu1 %v6293_v43, %s9065_s15 }
 0x3b6   : > { %3507 = vrot.lane.b32.xlu0 %v6304_v41, %s9066_s16  ;;  %3581 = vrot.lane.b32.xlu1 %v2337_v16, %s9025_s22 }
 0x3ba   : > { %3509 = vrot.lane.b32.xlu0 %v6400_v45, %s9066_s16  ;;  %3673 = vrot.lane.b32.xlu1 %v6304_v41, %s9019_s21  ;;  %v2346_v41 = vsel %vm2143_vm12, %v2344_v34, %v2345_v57 }
 0x3be   : > { %3601 = vrot.lane.b32.xlu0 %v2292_v53, %s9065_s15  ;;  %3627 = vrot.lane.b32.xlu1 %v2323_v15, %s9068_s24 }
 0x3c2   : > { %3533 = vrot.lane.b32.xlu0 %v6414_v10, %s9023_s23  ;;  %3651 = vrot.lane.b32.xlu1 %v2326_v14, %s9015_s29  ;;  %v6453_v14 = vpop.permute.xlu1 %2353 }
 0x3c3   : > { %9077 = vst [vmem:[#allocation31_spill] sm:$0xff] %v6453_v14 }
 0x3c6   : > { %3625 = vrot.lane.b32.xlu0 %v6336_v11, %s9068_s24  ;;  %3653 = vrot.lane.b32.xlu1 %v2346_v41, %s9015_s29 }
 0x3ca   : > { %3579 = vrot.lane.b32.xlu0 %v6327_v5, %s9025_s22  ;;  %v6437_v5 = vpop.permute.xlu0 %2355 }
 0x3cb   : > { %9069 = vst [vmem:[#allocation23_spill] sm:$0xff] %v6437_v5 }
 0x3ce   : > { %3603 = vrot.lane.b32.xlu0 %v2320_v60, %s9065_s15  ;;  %v6439_v8 = vpop.permute.xlu0 %2377 }
 0x3cf   : > { %9070 = vst [vmem:[#allocation24_spill] sm:$0xff] %v6439_v8 }
 0x3d2   : > { %3149 = vrot.lane.b32.xlu0 %v6319_v2, %s9068_s24  ;;  %v6441_v2 = vpop.permute.xlu0 %2381 }
 0x3d3   : > { %9071 = vst [vmem:[#allocation25_spill] sm:$0xff] %v6441_v2 }
 0x3d6   : > { %3605 = vrot.lane.b32.xlu0 %v2340_v48, %s9065_s15  ;;  %v6443_v22 = vpop.permute.xlu0 %2401 }
 0x3d7   : > { %9072 = vst [vmem:[#allocation26_spill] sm:$0xff] %v6443_v22 }
 0x3da   : > { %3173 = vrot.lane.b32.xlu0 %v2292_v53, %s9015_s29  ;;  %v6445_v50 = vpop.permute.xlu0 %2405 }
 0x3db   : > { %9073 = vst [vmem:[#allocation27_spill] sm:$0xff] %v6445_v50 }
 0x3de   : > { %3629 = vrot.lane.b32.xlu0 %v2343_v6, %s9068_s24  ;;  %v6447_v15 = vpop.permute.xlu0 %2425 }
 0x3df   : > { %9074 = vst [vmem:[#allocation28_spill] sm:$0xff] %v6447_v15 }
 0x3e2   : > { %3197 = vrot.lane.b32.xlu0 %v6336_v11, %s9019_s21  ;;  %v6449_v1 = vpop.permute.xlu0 %2429  ;;  %v6457_v11 = vpop.permute.xlu1 %2357  ;;  %s9159_s21 = smov 12  }
 0x3e3   : > { %9075 = vst [vmem:[#allocation29_spill] sm:$0xff] %v6449_v1  ;;  %9079 = vst [vmem:[#allocation33_spill] sm:$0xff] %v6457_v11 }
 0x3e6   : > { %v6451_v36 = vpop.permute.xlu0 %2449  ;;  %v6461_v13 = vpop.permute.xlu1 %2379 }
 0x3e7   : > { %9076 = vst [vmem:[#allocation30_spill] sm:$0xff] %v6451_v36  ;;  %9081 = vst [vmem:[#allocation35_spill] sm:$0xff] %v6461_v13 }
 0x3ea   : > { %v6455_v4 = vpop.permute.xlu0 %2453  ;;  %v6468_v60 = vpop.permute.xlu1 %2403 }
 0x3eb   : > { %9078 = vst [vmem:[#allocation32_spill] sm:$0xff] %v6455_v4  ;;  %9083 = vst [vmem:[#allocation37_spill] sm:$0xff] %v6468_v60 }
 0x3ee   : > { %v6459_v12 = vpop.permute.xlu0 %2473  ;;  %v6472_v29 = vpop.permute.xlu1 %2427 }
 0x3ef   : > { %9080 = vst [vmem:[#allocation34_spill] sm:$0xff] %v6459_v12  ;;  %9085 = vst [vmem:[#allocation39_spill] sm:$0xff] %v6472_v29 }
 0x3f2   : > { %v6466_v53 = vpop.permute.xlu0 %2477  ;;  %v6476_v33 = vpop.permute.xlu1 %2451 }
 0x3f3   : > { %9082 = vst [vmem:[#allocation36_spill] sm:$0xff] %v6466_v53  ;;  %9087 = vst [vmem:[#allocation41_spill] sm:$0xff] %v6476_v33 }
 0x3f6   : > { %v6470_v62 = vpop.permute.xlu0 %2497  ;;  %v6480_v63 = vpop.permute.xlu1 %2475 }
 0x3f7   : > { %9084 = vst [vmem:[#allocation38_spill] sm:$0xff] %v6470_v62  ;;  %9089 = vst [vmem:[#allocation43_spill] sm:$0xff] %v6480_v63 }
 0x3fa   : > { %v6474_v17 = vpop.permute.xlu0 %2521 }
 0x3fb   : > { %9086 = vst [vmem:[#allocation40_spill] sm:$0xff] %v6474_v17 }
 0x3fe   : > { %v6478_v16 = vpop.permute.xlu0 %2545 }
 0x3ff   : > { %9088 = vst [vmem:[#allocation42_spill] sm:$0xff] %v6478_v16 }
 0x414   : > { %v1839_v54 = vpop.f32.mrb[32].mxu1 }
 0x415   : > { %v1840_v0 = vadd.f32 %v4290_v42, %v1839_v54  ;;  %v4534_v43 = vpop.f32.mrb[33].mxu1  ;;  %v1939_v54 = vlaneseq }
 0x417   : > { %v1843_v30 = vmax.f32 %v1840_v0, 0.0  ;;  %v6482_v0 = vpop.permute.xlu0 %2569  ;;  %v1940_v43 = vshrl.u32 %v1939_v54, 7 }
 0x418   : > { %9090 = vst [vmem:[#allocation44_spill] sm:$0xff] %v6482_v0 }
 0x419   : > { %4538 = vmatmul.mubr.msk.f32.vlgmr.msra.gmra.mrb[34].mxu1 %vm470_vm8, %v1843_v30  ;;  %v6484_v30 = vpop.permute.xlu1 %2499  ;;  %v1941_v57 = vsub.s32 0, %v1940_v43 }
 0x41a   : > { %9091 = vst [vmem:[#allocation45_spill] sm:$0xff] %v6484_v30 }
 0x41b   : > { %v6486_v34 = vpop.permute.xlu0 %2593 }
 0x41c   : > { %9092 = vst [vmem:[#allocation46_spill] sm:$0xff] %v6486_v34 }
 0x41d   : > { %v6488_v32 = vpop.permute.xlu1 %2523 }
 0x41e   : > { %9093 = vst [vmem:[#allocation47_spill] sm:$0xff] %v6488_v32 }
 0x41f   : > { %v6490_v48 = vpop.permute.xlu0 %2617 }
 0x420   : > { %9094 = vst [vmem:[#allocation48_spill] sm:$0xff] %v6490_v48 }
 0x4ec   : > { %v1925_v35 = vpop.f32.mrb[34].mxu1 }
 0x4ed   : > { %v1926_v39 = vadd.f32 %v4292_v9, %v1925_v35  ;;  %v4539_v46 = vpop.f32.mrb[35].mxu1 }
 0x4ee   : > { %v6508_v46 = vpop.permute.xlu1 %2547 }
 0x4ef   : > { %v1930_v44 = vrot.slane %v1926_v39, 1  ;;  %9099 = vst [vmem:[#allocation53_spill] sm:$0xff] %v6508_v46 }
 0x4f1   : > { %v1932_v59 = vadd.f32 %v1930_v44, %v1926_v39 }
 0x4f3   : > { %v4295_v7 = vmul.f32 -1.442695, %v1932_v59 }
 0x4f5   : > { %4992 = vpow2.f32 %v4295_v7 }
 0x4ff   : > { %v4993_v42 = vpop.eup %4992 }
 0x500   : > { %v1936_v52 = vadd.f32 1.0, %v4993_v42 }
 0x502   : > { %4994 = vrcp.f32 %v1936_v52 }
 0x50c   : > { %v4995_v41 = vpop.eup %4994 }
 0x50d   : > { %v1942_v51 = vrot.slane %v4995_v41, %v1941_v57 }
 0x50f   : > { %v6493_v47 = vmul.f32 %v1942_v51, %v6065_v26  ;;  %v6496_v58 = vmul.f32 %v1942_v51, %v6067_v18  ;;  %v6503_v35 = vmul.f32 %v1942_v51, %v6083_v40  ;;  %v6506_v39 = vmul.f32 %v1942_v51, %v6075_v37  ;;  %v6510_v26 = vpop.permute.xlu0 %2641  ;;  %v6522_v37 = vpop.permute.xlu1 %2571 }
 0x510   : > { %9100 = vst [vmem:[#allocation54_spill] sm:$0xff] %v6510_v26  ;;  %v6517_v59 = vmul.f32 %v1942_v51, %v6101_v55  ;;  %v6520_v40 = vmul.f32 %v1942_v51, %v6073_v3  ;;  %9103 = vst [vmem:[#allocation57_spill] sm:$0xff] %v6522_v37  ;;  %v6529_v52 = vmul.f32 %v1942_v51, %v6079_v61 }
 0x511   : > { %9095 = vst [vmem:[#allocation49_spill] sm:$0xff] %v6493_v47  ;;  %9096 = vst [vmem:[#allocation50_spill] sm:$0xff] %v6496_v58  ;;  %v1954_v6 = vsel %vm9039_vm0, %v6493_v47, -inf  ;;  %v1951_v9 = vsel %vm9039_vm0, %v6496_v58, -inf  ;;  %v1963_v18 = vsel %vm9039_vm0, %v6503_v35, -inf  ;;  %v1957_v44 = vsel %vm9039_vm0, %v6506_v39, -inf }
 0x512   : > { %9097 = vst [vmem:[#allocation51_spill] sm:$0xff] %v6503_v35  ;;  %9098 = vst [vmem:[#allocation52_spill] sm:$0xff] %v6506_v39  ;;  %1955 = vmax.xlane.f32.xlu1 %v1954_v6  ;;  %1952 = vmax.xlane.f32.xlu0 %v1951_v9  ;;  %v1969_v7 = vsel %vm9039_vm0, %v6517_v59, -inf  ;;  %v1960_v42 = vsel %vm9039_vm0, %v6520_v40, -inf  ;;  %v1975_v3 = vsel %vm9039_vm0, %v6496_v58, 0.0  ;;  %v1966_v54 = vsel %vm9039_vm0, %v6529_v52, -inf }
 0x513   : > { %9101 = vst [vmem:[#allocation55_spill] sm:$0xff] %v6517_v59  ;;  %9102 = vst [vmem:[#allocation56_spill] sm:$0xff] %v6520_v40  ;;  %v6531_v55 = vpop.permute.xlu0 %2665  ;;  %v6538_v43 = vmul.f32 %v1942_v51, %v6093_v27  ;;  %v6540_v57 = vpop.permute.xlu1 %2595  ;;  %v1981_v61 = vsel %vm9039_vm0, %v6506_v39, 0.0  ;;  %v1987_v27 = vsel %vm9039_vm0, %v6503_v35, 0.0  ;;  %v1978_v51 = vsel %vm9039_vm0, %v6493_v47, 0.0 }
 0x514   : > { %9104 = vst [vmem:[#allocation58_spill] sm:$0xff] %v6529_v52  ;;  %9105 = vst [vmem:[#allocation59_spill] sm:$0xff] %v6531_v55 }
 0x515   : > { %9106 = vst [vmem:[#allocation60_spill] sm:$0xff] %v6538_v43  ;;  %9107 = vst [vmem:[#allocation61_spill] sm:$0xff] %v6540_v57  ;;  %v1972_v6 = vsel %vm9039_vm0, %v6538_v43, -inf }
 0x516   : > { %1964 = vmax.xlane.f32.xlu1 %v1963_v18  ;;  %1958 = vmax.xlane.f32.xlu0 %v1957_v44  ;;  %v1993_v44 = vsel %vm9039_vm0, %v6517_v59, 0.0 }
 0x517   : > { %v6542_v41 = vpop.permute.xlu0 %2689  ;;  %v6548_v9 = vpop.permute.xlu1 %2619 }
 0x518   : > { %9108 = vst [vmem:[#allocation62_spill] sm:$0xff] %v6542_v41  ;;  %9109 = vst [vmem:[#allocation63_spill] sm:$0xff] %v6548_v9 }
 0x51a   : > { %1970 = vmax.xlane.f32.xlu1 %v1969_v7  ;;  %1961 = vmax.xlane.f32.xlu0 %v1960_v42  ;;  %v1984_v7 = vsel %vm9039_vm0, %v6520_v40, 0.0 }
 0x51b   : > { %v6550_v18 = vpop.permute.xlu0 %2847  ;;  %v6560_v42 = vpop.permute.xlu1 %2643 }
 0x51c   : > { %9110 = vst [vmem:[#allocation64_spill] sm:$0xff] %v6560_v42 }
 0x51e   : > { %1976 = vadd.xlane.f32.xlu1 %v1975_v3  ;;  %1967 = vmax.xlane.f32.xlu0 %v1966_v54  ;;  %v1990_v54 = vsel %vm9039_vm0, %v6529_v52, 0.0 }
 0x51f   : > { %v6562_v3 = vpop.permute.xlu0 %2871 }
 0x522   : > { %1982 = vadd.xlane.f32.xlu1 %v1981_v61  ;;  %1973 = vmax.xlane.f32.xlu0 %v1972_v6  ;;  %v6566_v61 = vpop.permute.xlu1 %3341 }
 0x523   : > { %9111 = vst [vmem:[#allocation65_spill] sm:$0xff] %v6566_v61  ;;  %v6568_v6 = vpop.permute.xlu0 %2895 }
 0x526   : > { %1988 = vadd.xlane.f32.xlu1 %v1987_v27  ;;  %1979 = vadd.xlane.f32.xlu0 %v1978_v51  ;;  %v1996_v27 = vsel %vm9039_vm0, %v6538_v43, 0.0  ;;  %v6572_v51 = vpop.permute.xlu1 %3387  ;;  %vm2829_vm0 = vcmask 228352  }
 0x527   : > { %9112 = vst [vmem:[#allocation66_spill] sm:$0xff] %v6572_v51 }
 0x52a   : > { %1994 = vadd.xlane.f32.xlu1 %v1993_v44  ;;  %1985 = vadd.xlane.f32.xlu0 %v1984_v7  ;;  %v6574_v44 = vpop.permute.xlu0 %2919  ;;  %v6576_v7 = vpop.permute.xlu1 %3411 }
 0x52b   : > { %9113 = vst [vmem:[#allocation67_spill] sm:$0xff] %v6576_v7 }
 0x52e   : > { %1991 = vadd.xlane.f32.xlu0 %v1990_v54  ;;  %v6578_v28 = vpop.permute.xlu0 %3365  ;;  %v6580_v31 = vpop.permute.xlu1 %3413 }
 0x52f   : > { %9114 = vst [vmem:[#allocation68_spill] sm:$0xff] %v6578_v28  ;;  %9115 = vst [vmem:[#allocation69_spill] sm:$0xff] %v6580_v31 }
 0x532   : > { %1997 = vadd.xlane.f32.xlu0 %v1996_v27  ;;  %v6582_v59 = vpop.permute.xlu0 %3389  ;;  %v6584_v54 = vpop.permute.xlu1 %3459 }
 0x533   : > { %9116 = vst [vmem:[#allocation70_spill] sm:$0xff] %v6582_v59  ;;  %9117 = vst [vmem:[#allocation71_spill] sm:$0xff] %v6584_v54 }
 0x536   : > { %v6586_v24 = vpop.permute.xlu0 %3435  ;;  %v6588_v25 = vpop.permute.xlu1 %3461 }
 0x537   : > { %9118 = vst [vmem:[#allocation72_spill] sm:$0xff] %v6586_v24  ;;  %9119 = vst [vmem:[#allocation73_spill] sm:$0xff] %v6588_v25 }
 0x53a   : > { %v6590_v43 = vpop.permute.xlu0 %3437  ;;  %v6592_v27 = vpop.permute.xlu1 %3553 }
 0x53b   : > { %9120 = vst [vmem:[#allocation74_spill] sm:$0xff] %v6590_v43  ;;  %9121 = vst [vmem:[#allocation75_spill] sm:$0xff] %v6592_v27 }
 0x53e   : > { %v6594_v35 = vpop.permute.xlu0 %3483  ;;  %v6596_v52 = vpop.permute.xlu1 %3485 }
 0x53f   : > { %9122 = vst [vmem:[#allocation76_spill] sm:$0xff] %v6594_v35  ;;  %9123 = vst [vmem:[#allocation77_spill] sm:$0xff] %v6596_v52 }
 0x542   : > { %v6598_v21 = vpop.permute.xlu0 %3507  ;;  %v6600_v23 = vpop.permute.xlu1 %3577 }
 0x543   : > { %9124 = vst [vmem:[#allocation78_spill] sm:$0xff] %v6598_v21  ;;  %9125 = vst [vmem:[#allocation79_spill] sm:$0xff] %v6600_v23 }
 0x546   : > { %v6602_v39 = vpop.permute.xlu0 %3509  ;;  %v6604_v40 = vpop.permute.xlu1 %3531 }
 0x547   : > { %9126 = vst [vmem:[#allocation80_spill] sm:$0xff] %v6602_v39  ;;  %9127 = vst [vmem:[#allocation81_spill] sm:$0xff] %v6604_v40 }
 0x54a   : > { %v6606_v20 = vpop.permute.xlu0 %3601  ;;  %v6608_v19 = vpop.permute.xlu1 %3555 }
 0x54b   : > { %9128 = vst [vmem:[#allocation82_spill] sm:$0xff] %v6606_v20  ;;  %9129 = vst [vmem:[#allocation83_spill] sm:$0xff] %v6608_v19 }
 0x54e   : > { %v6610_v58 = vpop.permute.xlu0 %3533  ;;  %v6612_v47 = vpop.permute.xlu1 %3557 }
 0x54f   : > { %9130 = vst [vmem:[#allocation84_spill] sm:$0xff] %v6610_v58  ;;  %9131 = vst [vmem:[#allocation85_spill] sm:$0xff] %v6612_v47 }
 0x552   : > { %v6614_v42 = vpop.permute.xlu0 %3625  ;;  %v6616_v9 = vpop.permute.xlu1 %3649 }
 0x553   : > { %9132 = vst [vmem:[#allocation86_spill] sm:$0xff] %v6614_v42  ;;  %9133 = vst [vmem:[#allocation87_spill] sm:$0xff] %v6616_v9 }
 0x556   : > { %v6618_v53 = vpop.permute.xlu0 %3579  ;;  %v6620_v57 = vpop.permute.xlu1 %3125 }
 0x557   : > { %9134 = vst [vmem:[#allocation88_spill] sm:$0xff] %v6618_v53  ;;  %9135 = vst [vmem:[#allocation89_spill] sm:$0xff] %v6620_v57 }
 0x55a   : > { %v6622_v4 = vpop.permute.xlu0 %3603  ;;  %v6624_v37 = vpop.permute.xlu1 %3581 }
 0x55b   : > { %9136 = vst [vmem:[#allocation90_spill] sm:$0xff] %v6622_v4  ;;  %9137 = vst [vmem:[#allocation91_spill] sm:$0xff] %v6624_v37 }
 0x55e   : > { %v6626_v1 = vpop.permute.xlu0 %3149  ;;  %v6628_v46 = vpop.permute.xlu1 %3673 }
 0x55f   : > { %9138 = vst [vmem:[#allocation92_spill] sm:$0xff] %v6626_v1  ;;  %9139 = vst [vmem:[#allocation93_spill] sm:$0xff] %v6628_v46 }
 0x562   : > { %v6630_v50 = vpop.permute.xlu0 %3605  ;;  %v6632_v32 = vpop.permute.xlu1 %3627 }
 0x563   : > { %9140 = vst [vmem:[#allocation94_spill] sm:$0xff] %v6630_v50  ;;  %9141 = vst [vmem:[#allocation95_spill] sm:$0xff] %v6632_v32 }
 0x566   : > { %v6634_v2 = vpop.permute.xlu0 %3173  ;;  %v6636_v30 = vpop.permute.xlu1 %3651 }
 0x567   : > { %9142 = vst [vmem:[#allocation96_spill] sm:$0xff] %v6634_v2  ;;  %9143 = vst [vmem:[#allocation97_spill] sm:$0xff] %v6636_v30 }
 0x56a   : > { %v6638_v11 = vpop.permute.xlu0 %3629  ;;  %v6640_v63 = vpop.permute.xlu1 %3653 }
 0x56b   : > { %9144 = vst [vmem:[#allocation98_spill] sm:$0xff] %v6638_v11  ;;  %9145 = vst [vmem:[#allocation99_spill] sm:$0xff] %v6640_v63 }
 0x56e   : > { %v6642_v33 = vpop.permute.xlu0 %3197 }
 0x56f   : > { %9146 = vst [vmem:[#allocation100_spill] sm:$0xff] %v6642_v33 }
 0x59f   : > { %v1956_v29 = vpop.xlane.xlu1 %1955  ;;  %v1953_v60 = vpop.xlane.xlu0 %1952 }
 0x5a3   : > { %v1965_v13 = vpop.xlane.xlu1 %1964  ;;  %v1959_v5 = vpop.xlane.xlu0 %1958 }
 0x5a7   : > { %v1971_v1 = vpop.xlane.xlu1 %1970  ;;  %v1962_v46 = vpop.xlane.xlu0 %1961 }
 0x5ab   : > { %v1977_v9 = vpop.xlane.xlu1 %1976  ;;  %v1968_v57 = vpop.xlane.xlu0 %1967 }
 0x5ac   : > { %v2000_v42 = vmul.f32 0.03125, %v1977_v9 }
 0x5ae   : > { %v2009_v2 = vsel %vm2008_vm14, %v1953_v60, %v2000_v42 }
 0x5af   : > { %2018 = vst.msk [vmem:[#allocation3 + $0x33] sm:$0xff] %vm470_vm8, %v2009_v2  ;;  %v1983_v20 = vpop.xlane.xlu1 %1982  ;;  %v1974_v23 = vpop.xlane.xlu0 %1973 }
 0x5b0   : > { %v2002_v27 = vmul.f32 0.03125, %v1983_v20 }
 0x5b2   : > { %v2011_v41 = vsel %vm2008_vm14, %v1959_v5, %v2002_v27 }
 0x5b3   : > { %2020 = vst.msk [vmem:[#allocation3 + $0x53] sm:$0xff] %vm470_vm8, %v2011_v41  ;;  %v1989_v33 = vpop.xlane.xlu1 %1988  ;;  %v1980_v55 = vpop.xlane.xlu0 %1979 }
 0x5b4   : > { %v2004_v26 = vmul.f32 0.03125, %v1989_v33  ;;  %v2001_v10 = vmul.f32 0.03125, %v1980_v55 }
 0x5b6   : > { %v2013_v48 = vsel %vm2008_vm14, %v1965_v13, %v2004_v26  ;;  %v2010_v34 = vsel %vm2008_vm14, %v1956_v29, %v2001_v10  ;;  %v6650_v9 = vld [vmem:[#allocation3 + $0x30] sm:$0xff] }
 0x5b7   : > { %2022 = vst.msk [vmem:[#allocation3 + $0x73] sm:$0xff] %vm470_vm8, %v2013_v48  ;;  %2019 = vst.msk [vmem:[#allocation3 + $0x43] sm:$0xff] %vm470_vm8, %v2010_v34  ;;  %v1995_v2 = vpop.xlane.xlu1 %1994  ;;  %2501 = vrot.lane.b32.xlu0 %v6650_v9, %s9017_s18  ;;  %v1986_v20 = vpop.xlane.xlu0 %1985 }
 0x5b8   : > { %v2006_v5 = vmul.f32 0.03125, %v1995_v2  ;;  %v2003_v60 = vmul.f32 0.03125, %v1986_v20 }
 0x5ba   : > { %v2015_v33 = vsel %vm2008_vm14, %v1971_v1, %v2006_v5  ;;  %v2012_v55 = vsel %vm2008_vm14, %v1962_v46, %v2003_v60  ;;  %v6658_v13 = vld [vmem:[#allocation3 + $0x50] sm:$0xff]  ;;  %v6820_v53 = vld [vmem:[#allocation3 + $0x58] sm:$0x3f] }
 0x5bb   : > { %2024 = vst.msk [vmem:[#allocation3 + $0x93] sm:$0xff] %vm470_vm8, %v2015_v33  ;;  %2021 = vst.msk [vmem:[#allocation3 + $0x63] sm:$0xff] %vm470_vm8, %v2012_v55  ;;  %2505 = vrot.lane.b32.xlu0 %v6658_v13, %s9017_s18  ;;  %v1992_v10 = vpop.xlane.xlu0 %1991  ;;  %v2085_v37 = vrot.slane %v6658_v13, 1  ;;  %v2086_v62 = vrot.slane %v6820_v53, 1  ;;  %v2109_v39 = vrot.slane %v6658_v13, 2  ;;  %v2110_v15 = vrot.slane %v6820_v53, 2 }
 0x5bc   : > { %v2005_v29 = vmul.f32 0.03125, %v1992_v10  ;;  %v2134_v25 = vrot.slane %v6658_v13, 3  ;;  %v2135_v8 = vrot.slane %v6820_v53, 3 }
 0x5bd   : > { %v6843_v40 = vsel %vm545_vm3, %v2085_v37, %v2086_v62  ;;  %v2103_v62 = vrot.slane %v6650_v9, 2  ;;  %v6885_v35 = vsel %vm570_vm2, %v2109_v39, %v2110_v15  ;;  %v2128_v15 = vrot.slane %v6650_v9, 3 }
 0x5be   : > { %v2014_v34 = vsel %vm2008_vm14, %v1968_v57, %v2005_v29  ;;  %v6665_v48 = vld [vmem:[#allocation3 + $0x70] sm:$0xff]  ;;  %v6667_v26 = vld [vmem:[#allocation3 + $0x40] sm:$0xff]  ;;  %v6840_v12 = vld [vmem:[#allocation3 + $0x78] sm:$0x3f]  ;;  %9156 = vst [vmem:[#allocation106_spill] sm:$0xff] %v6885_v35  ;;  %v6929_v43 = vsel %vm2118_vm11, %v2134_v25, %v2135_v8 }
 0x5bf   : > { %2023 = vst.msk [vmem:[#allocation3 + $0x83] sm:$0xff] %vm470_vm8, %v2014_v34  ;;  %2509 = vrot.lane.b32.xlu0 %v6665_v48, %s9017_s18  ;;  %2503 = vrot.lane.b32.xlu1 %v6667_v26, %s9017_s18  ;;  %v1998_v1 = vpop.xlane.xlu0 %1997  ;;  %v2131_v19 = vrot.slane %v6667_v26, 3  ;;  %v2092_v58 = vrot.slane %v6840_v12, 1  ;;  %v2181_v52 = vrot.slane %v6667_v26, 5 }
 0x5c0   : > { %v2007_v46 = vmul.f32 0.03125, %v1998_v1 }
 0x5c2   : > { %v2016_v41 = vsel %vm2008_vm14, %v1974_v23, %v2007_v46  ;;  %v6675_v42 = vld [vmem:[#allocation3 + $0x60] sm:$0xff]  ;;  %v6700_v23 = vld [vmem:[#allocation3 + $0x90] sm:$0xff]  ;;  %v6702_v27 = vld [vmem:[#allocation3 + $0x98] sm:$0x3f]  ;;  %vm2802_vm14 = vcmask 179200  }
 0x5c3   : > { %2025 = vst.msk [vmem:[#allocation3 + $0xa3] sm:$0xff] %vm470_vm8, %v2016_v41  ;;  %2669 = vrot.lane.b32.xlu0 %v6667_v26, %s9015_s29  ;;  %2507 = vrot.lane.b32.xlu1 %v6675_v42, %s9017_s18  ;;  %v2262_v20 = vrot.slane %v6700_v23, 6  ;;  %v2263_v5 = vrot.slane %v6702_v27, 6  ;;  %v2242_v33 = vrot.slane %v6700_v23, 2  ;;  %v2243_v10 = vrot.slane %v6702_v27, 2 }
 0x5c5   : > { %v6716_v55 = vsel %vm9040_vm10, %v2262_v20, %v2263_v5  ;;  %v6724_v41 = vsel %vm570_vm2, %v2242_v33, %v2243_v10 }
 0x5c6   : > { %v6682_v57 = vld [vmem:[#allocation3 + $0x80] sm:$0xff]  ;;  %9147 = vst [vmem:[#allocation101_spill] sm:$0xff] %v6724_v41 }
 0x5c7   : > { %2673 = vrot.lane.b32.xlu0 %v6675_v42, %s9015_s29  ;;  %2511 = vrot.lane.b32.xlu1 %v6682_v57, %s9017_s18  ;;  %s9155_s18 = smov 8  }
 0x5ca   : > { %v6704_v2 = vld [vmem:[#allocation3 + $0xa0] sm:$0xff]  ;;  %v6708_v60 = vld [vmem:[#allocation3 + $0xa8] sm:$0x3f] }
 0x5cb   : > { %2677 = vrot.lane.b32.xlu0 %v6682_v57, %s9015_s29  ;;  %2667 = vrot.lane.b32.xlu1 %v6650_v9, %s9015_s29  ;;  %v2282_v29 = vrot.slane %v6704_v2, 6  ;;  %v2283_v34 = vrot.slane %v6708_v60, 6  ;;  %v2273_v1 = vrot.slane %v6704_v2, 3  ;;  %v2274_v46 = vrot.slane %v6708_v60, 3 }
 0x5cc   : > { %v2279_v30 = vrot.slane %v6704_v2, 5  ;;  %v2280_v63 = vrot.slane %v6708_v60, 5  ;;  %v2276_v20 = vrot.slane %v6704_v2, 4  ;;  %v2277_v33 = vrot.slane %v6708_v60, 4 }
 0x5cd   : > { %v6734_v5 = vsel %vm9040_vm10, %v2282_v29, %v2283_v34  ;;  %v6737_v0 = vsel %vm2118_vm11, %v2273_v1, %v2274_v46  ;;  %v2270_v10 = vrot.slane %v6704_v2, 2  ;;  %v2271_v11 = vrot.slane %v6708_v60, 2  ;;  %v6791_v29 = vld [vmem:[#allocation3 + $0x68] sm:$0x3f] }
 0x5ce   : > { %v6742_v32 = vsel %vm2168_vm13, %v2279_v30, %v2280_v63  ;;  %v6746_v16 = vsel %vm2143_vm12, %v2276_v20, %v2277_v33  ;;  %v2082_v63 = vrot.slane %v6667_v26, 1  ;;  %v2088_v1 = vrot.slane %v6675_v42, 1 }
 0x5cf   : > { %2943 = vrot.lane.b32.xlu0 %v6650_v9, %s9028_s17  ;;  %2671 = vrot.lane.b32.xlu1 %v6658_v13, %s9015_s29  ;;  %v6749_v4 = vsel %vm570_vm2, %v2270_v10, %v2271_v11  ;;  %v6783_v11 = vld [vmem:[#allocation3 + $0x48] sm:$0x3f]  ;;  %v2089_v46 = vrot.slane %v6791_v29, 1  ;;  %v2106_v33 = vrot.slane %v6667_v26, 2  ;;  %v2188_v54 = vrot.slane %v6791_v29, 5 }
 0x5d0   : > { %9148 = vst [vmem:[#allocation102_spill] sm:$0xff] %v6749_v4  ;;  %v2083_v30 = vrot.slane %v6783_v11, 1  ;;  %v2107_v10 = vrot.slane %v6783_v11, 2  ;;  %v2132_v47 = vrot.slane %v6783_v11, 3  ;;  %v2157_v21 = vrot.slane %v6783_v11, 4 }
 0x5d1   : > { %v6803_v20 = vsel %vm545_vm3, %v2088_v1, %v2089_v46  ;;  %v2112_v1 = vrot.slane %v6675_v42, 2  ;;  %v2113_v46 = vrot.slane %v6791_v29, 2 }
 0x5d2   : > { %v6794_v34 = vsel %vm545_vm3, %v2082_v63, %v2083_v30  ;;  %v6811_v63 = vld [vmem:[#allocation3 + $0x38] sm:$0x3f]  ;;  %v2079_v30 = vrot.slane %v6650_v9, 1  ;;  %v6815_v50 = vsel %vm570_vm2, %v2106_v33, %v2107_v10 }
 0x5d3   : > { %2947 = vrot.lane.b32.xlu0 %v6658_v13, %s9028_s17  ;;  %2675 = vrot.lane.b32.xlu1 %v6665_v48, %s9015_s29  ;;  %9151 = vst [vmem:[#allocation103_spill] sm:$0xff] %v6815_v50  ;;  %v2080_v17 = vrot.slane %v6811_v63, 1  ;;  %v6829_v33 = vsel %vm570_vm2, %v2112_v1, %v2113_v46  ;;  %v2091_v1 = vrot.slane %v6665_v48, 1  ;;  %v2138_v46 = vrot.slane %v6791_v29, 3 }
 0x5d4   : > { %9153 = vst [vmem:[#allocation104_spill] sm:$0xff] %v6829_v33  ;;  %v2104_v37 = vrot.slane %v6811_v63, 2  ;;  %v2129_v39 = vrot.slane %v6811_v63, 3 }
 0x5d5   : > { %v6832_v10 = vsel %vm545_vm3, %v2079_v30, %v2080_v17  ;;  %v6847_v17 = vsel %vm2118_vm11, %v2131_v19, %v2132_v47  ;;  %v2137_v30 = vrot.slane %v6675_v42, 3  ;;  %v6862_v19 = vsel %vm545_vm3, %v2091_v1, %v2092_v58 }
 0x5d6   : > { %v2156_v47 = vrot.slane %v6667_v26, 4  ;;  %v6876_v58 = vsel %vm570_vm2, %v2103_v62, %v2104_v37  ;;  %v2162_v1 = vrot.slane %v6675_v42, 4  ;;  %v2182_v62 = vrot.slane %v6783_v11, 5 }
 0x5d7   : > { %2951 = vrot.lane.b32.xlu0 %v6665_v48, %s9028_s17  ;;  %2679 = vrot.lane.b32.xlu1 %v6700_v23, %s9015_s29  ;;  %s9152_s29 = smov 4   ;;  %v6859_v36 = vsel %vm2118_vm11, %v2137_v30, %v2138_v46  ;;  %9154 = vst [vmem:[#allocation105_spill] sm:$0xff] %v6876_v58  ;;  %v2163_v46 = vrot.slane %v6791_v29, 4  ;;  %v2115_v37 = vrot.slane %v6665_v48, 2 }
 0x5d8   : > { %v6873_v30 = vsel %vm2143_vm12, %v2156_v47, %v2157_v21  ;;  %v2116_v47 = vrot.slane %v6840_v12, 2  ;;  %v6901_v22 = vsel %vm2168_vm13, %v2181_v52, %v2182_v62  ;;  %v6918_v62 = vsel %vm2118_vm11, %v2128_v15, %v2129_v39 }
 0x5d9   : > { %v6889_v21 = vsel %vm2143_vm12, %v2162_v1, %v2163_v46  ;;  %v2187_v46 = vrot.slane %v6675_v42, 5  ;;  %v2141_v39 = vrot.slane %v6840_v12, 3 }
 0x5da   : > { %9157 = vst [vmem:[#allocation107_spill] sm:$0xff] %v6889_v21  ;;  %v6904_v1 = vsel %vm570_vm2, %v2115_v37, %v2116_v47  ;;  %v2205_v37 = vrot.slane %v6667_v26, 6  ;;  %v2206_v47 = vrot.slane %v6783_v11, 6  ;;  %v2140_v11 = vrot.slane %v6665_v48, 3 }
 0x5db   : > { %2955 = vrot.lane.b32.xlu0 %v6700_v23, %s9028_s17  ;;  %2945 = vrot.lane.b32.xlu1 %v6667_v26, %s9028_s17  ;;  %v6915_v52 = vsel %vm2168_vm13, %v2187_v46, %v2188_v54  ;;  %v2211_v54 = vrot.slane %v6675_v42, 6 }
 0x5dc   : > { %v6933_v15 = vsel %vm9040_vm10, %v2205_v37, %v2206_v47  ;;  %v6948_v8 = vsel %vm2118_vm11, %v2140_v11, %v2141_v39  ;;  %v2160_v11 = vrot.slane %v6820_v53, 4 }
 0x5df   : > { %3377 = vrot.lane.b32.xlu0 %v6675_v42, %s5111_s14  ;;  %2949 = vrot.lane.b32.xlu1 %v6675_v42, %s9028_s17 }
 0x5e3   : > { %3381 = vrot.lane.b32.xlu0 %v6682_v57, %s5111_s14  ;;  %2953 = vrot.lane.b32.xlu1 %v6682_v57, %s9028_s17 }
 0x5e7   : > { %3543 = vrot.lane.b32.xlu0 %v6675_v42, %s9149_s25  ;;  %2957 = vrot.lane.b32.xlu1 %v6704_v2, %s9028_s17 }
 0x5eb   : > { %3111 = vrot.lane.b32.xlu0 %v6667_v26, %s9065_s15  ;;  %3375 = vrot.lane.b32.xlu1 %v6658_v13, %s5111_s14  ;;  %v2212_v26 = vrot.slane %v6791_v29, 6  ;;  %v2154_v29 = vrot.slane %v6811_v63, 4 }
 0x5ed   : > { %v6945_v25 = vsel %vm9040_vm10, %v2211_v54, %v2212_v26  ;;  %v2159_v26 = vrot.slane %v6658_v13, 4 }
 0x5ef   : > { %3383 = vrot.lane.b32.xlu0 %v6700_v23, %s5111_s14  ;;  %3379 = vrot.lane.b32.xlu1 %v6665_v48, %s5111_s14 }
 0x5f3   : > { %3547 = vrot.lane.b32.xlu0 %v6682_v57, %s9149_s25  ;;  %3545 = vrot.lane.b32.xlu1 %v6665_v48, %s9149_s25 }
 0x5f7   : > { %3115 = vrot.lane.b32.xlu0 %v6675_v42, %s9065_s15  ;;  %3113 = vrot.lane.b32.xlu1 %v6658_v13, %s9065_s15  ;;  %v2153_v42 = vrot.slane %v6650_v9, 4 }
 0x5f9   : > { %v6961_v54 = vsel %vm2143_vm12, %v2153_v42, %v2154_v29  ;;  %v2165_v42 = vrot.slane %v6665_v48, 4  ;;  %v2166_v29 = vrot.slane %v6840_v12, 4 }
 0x5fb   : > { %3549 = vrot.lane.b32.xlu0 %v6700_v23, %s9149_s25  ;;  %3385 = vrot.lane.b32.xlu1 %v6704_v2, %s5111_s14 }
 0x5ff   : > { %3117 = vrot.lane.b32.xlu0 %v6665_v48, %s9065_s15  ;;  %3551 = vrot.lane.b32.xlu1 %v6704_v2, %s9149_s25 }
 0x603   : > { %2361 = vrot.lane.b32.xlu0 %v6794_v34, %s9150_s26  ;;  %3119 = vrot.lane.b32.xlu1 %v6682_v57, %s9065_s15 }
 0x607   : > { %2365 = vrot.lane.b32.xlu0 %v6803_v20, %s9150_s26  ;;  %3121 = vrot.lane.b32.xlu1 %v6700_v23, %s9065_s15 }
 0x60b   : > { %2385 = vrot.lane.b32.xlu0 %v6815_v50, %s9152_s29  ;;  %3123 = vrot.lane.b32.xlu1 %v6704_v2, %s9065_s15 }
 0x60f   : > { %2389 = vrot.lane.b32.xlu0 %v6829_v33, %s9152_s29  ;;  %2359 = vrot.lane.b32.xlu1 %v6832_v10, %s9150_s26 }
 0x613   : > { %2409 = vrot.lane.b32.xlu0 %v6847_v17, %s5111_s14  ;;  %2363 = vrot.lane.b32.xlu1 %v6843_v40, %s9150_s26 }
 0x617   : > { %2413 = vrot.lane.b32.xlu0 %v6859_v36, %s5111_s14  ;;  %2367 = vrot.lane.b32.xlu1 %v6862_v19, %s9150_s26 }
 0x61b   : > { %2433 = vrot.lane.b32.xlu0 %v6873_v30, %s9155_s18  ;;  %2383 = vrot.lane.b32.xlu1 %v6876_v58, %s9152_s29 }
 0x61f   : > { %2437 = vrot.lane.b32.xlu0 %v6889_v21, %s9155_s18  ;;  %2387 = vrot.lane.b32.xlu1 %v6885_v35, %s9152_s29 }
 0x623   : > { %2457 = vrot.lane.b32.xlu0 %v6901_v22, %s9028_s17  ;;  %2391 = vrot.lane.b32.xlu1 %v6904_v1, %s9152_s29 }
 0x627   : > { %2461 = vrot.lane.b32.xlu0 %v6915_v52, %s9028_s17  ;;  %2407 = vrot.lane.b32.xlu1 %v6918_v62, %s5111_s14 }
 0x629   : > { %v6926_v24 = vpop.permute.xlu0 %2501 }
 0x62a   : > { %9158 = vst [vmem:[#allocation108_spill] sm:$0xff] %v6926_v24 }
 0x62b   : > { %2481 = vrot.lane.b32.xlu0 %v6933_v15, %s9159_s21  ;;  %2411 = vrot.lane.b32.xlu1 %v6929_v43, %s5111_s14 }
 0x62d   : > { %v6942_v46 = vpop.permute.xlu0 %2505 }
 0x62e   : > { %9160 = vst [vmem:[#allocation109_spill] sm:$0xff] %v6942_v46 }
 0x62f   : > { %2485 = vrot.lane.b32.xlu0 %v6945_v25, %s9159_s21  ;;  %2415 = vrot.lane.b32.xlu1 %v6948_v8, %s5111_s14 }
 0x631   : > { %v6956_v37 = vpop.permute.xlu1 %2503  ;;  %v6958_v47 = vpop.permute.xlu0 %2509 }
 0x632   : > { %9161 = vst [vmem:[#allocation110_spill] sm:$0xff] %v6956_v37  ;;  %9162 = vst [vmem:[#allocation111_spill] sm:$0xff] %v6958_v47  ;;  %v6974_v37 = vsel %vm2143_vm12, %v2159_v26, %v2160_v11  ;;  %v2178_v26 = vrot.slane %v6650_v9, 5  ;;  %v2179_v11 = vrot.slane %v6811_v63, 5 }
 0x633   : > { %2525 = vrot.lane.b32.xlu0 %v6832_v10, %s9066_s16  ;;  %2431 = vrot.lane.b32.xlu1 %v6961_v54, %s9155_s18 }
 0x635   : > { %v6969_v39 = vpop.permute.xlu1 %2507  ;;  %v6971_v46 = vpop.permute.xlu0 %2669 }
 0x636   : > { %9163 = vst [vmem:[#allocation112_spill] sm:$0xff] %v6969_v39  ;;  %9164 = vst [vmem:[#allocation113_spill] sm:$0xff] %v6971_v46  ;;  %v6987_v39 = vsel %vm2143_vm12, %v2165_v42, %v2166_v29  ;;  %v2184_v42 = vrot.slane %v6658_v13, 5  ;;  %v2185_v29 = vrot.slane %v6820_v53, 5 }
 0x637   : > { %2529 = vrot.lane.b32.xlu0 %v6843_v40, %s9066_s16  ;;  %2435 = vrot.lane.b32.xlu1 %v6974_v37, %s9155_s18 }
 0x639   : > { %v6982_v47 = vpop.permute.xlu1 %2511  ;;  %v6984_v24 = vpop.permute.xlu0 %2673 }
 0x63a   : > { %9165 = vst [vmem:[#allocation114_spill] sm:$0xff] %v6982_v47  ;;  %9166 = vst [vmem:[#allocation115_spill] sm:$0xff] %v6984_v24  ;;  %v7000_v47 = vsel %vm2168_vm13, %v2178_v26, %v2179_v11  ;;  %v2190_v26 = vrot.slane %v6665_v48, 5  ;;  %v2191_v11 = vrot.slane %v6840_v12, 5 }
 0x63b   : > { %2533 = vrot.lane.b32.xlu0 %v6862_v19, %s9066_s16  ;;  %2439 = vrot.lane.b32.xlu1 %v6987_v39, %s9155_s18 }
 0x63d   : > { %v6995_v46 = vpop.permute.xlu1 %2667  ;;  %v6997_v14 = vpop.permute.xlu0 %2677 }
 0x63e   : > { %9167 = vst [vmem:[#allocation116_spill] sm:$0xff] %v6995_v46  ;;  %9168 = vst [vmem:[#allocation117_spill] sm:$0xff] %v6997_v14  ;;  %v7013_v46 = vsel %vm2168_vm13, %v2184_v42, %v2185_v29  ;;  %v2202_v42 = vrot.slane %v6650_v9, 6  ;;  %v2203_v29 = vrot.slane %v6811_v63, 6 }
 0x63f   : > { %2549 = vrot.lane.b32.xlu0 %v6876_v58, %s9023_s23  ;;  %2455 = vrot.lane.b32.xlu1 %v7000_v47, %s9028_s17 }
 0x641   : > { %v7008_v24 = vpop.permute.xlu1 %2671  ;;  %v7010_v7 = vpop.permute.xlu0 %2943 }
 0x642   : > { %9169 = vst [vmem:[#allocation118_spill] sm:$0xff] %v7008_v24  ;;  %v7026_v24 = vsel %vm2168_vm13, %v2190_v26, %v2191_v11  ;;  %v2208_v26 = vrot.slane %v6658_v13, 6  ;;  %v2209_v11 = vrot.slane %v6820_v53, 6 }
 0x643   : > { %2553 = vrot.lane.b32.xlu0 %v6885_v35, %s9023_s23  ;;  %2459 = vrot.lane.b32.xlu1 %v7013_v46, %s9028_s17 }
 0x645   : > { %v7021_v14 = vpop.permute.xlu1 %2675  ;;  %v7023_v31 = vpop.permute.xlu0 %2947 }
 0x646   : > { %9170 = vst [vmem:[#allocation119_spill] sm:$0xff] %v7021_v14  ;;  %9171 = vst [vmem:[#allocation120_spill] sm:$0xff] %v7023_v31  ;;  %v7039_v14 = vsel %vm9040_vm10, %v2202_v42, %v2203_v29  ;;  %v2214_v42 = vrot.slane %v6665_v48, 6  ;;  %v2215_v29 = vrot.slane %v6840_v12, 6 }
 0x647   : > { %2557 = vrot.lane.b32.xlu0 %v6904_v1, %s9023_s23  ;;  %2463 = vrot.lane.b32.xlu1 %v7026_v24, %s9028_s17 }
 0x649   : > { %v7034_v51 = vpop.permute.xlu1 %2679  ;;  %v7036_v59 = vpop.permute.xlu0 %2951 }
 0x64a   : > { %9172 = vst [vmem:[#allocation121_spill] sm:$0xff] %v7034_v51  ;;  %9173 = vst [vmem:[#allocation122_spill] sm:$0xff] %v7036_v59  ;;  %v7052_v51 = vsel %vm9040_vm10, %v2208_v26, %v2209_v11  ;;  %v7079_v26 = vld [vmem:[#allocation3 + $0x88] sm:$0x3f] }
 0x64b   : > { %2573 = vrot.lane.b32.xlu0 %v6918_v62, %s9149_s25  ;;  %2479 = vrot.lane.b32.xlu1 %v7039_v14, %s9159_s21  ;;  %v2223_v59 = vrot.slane %v7079_v26, 2 }
 0x64d   : > { %v7047_v9 = vpop.permute.xlu1 %2945  ;;  %v7049_v63 = vpop.permute.xlu0 %2955 }
 0x64e   : > { %9174 = vst [vmem:[#allocation123_spill] sm:$0xff] %v7047_v9  ;;  %9175 = vst [vmem:[#allocation124_spill] sm:$0xff] %v7049_v63  ;;  %v7065_v9 = vsel %vm9040_vm10, %v2214_v42, %v2215_v29  ;;  %v2219_v29 = vrot.slane %v6682_v57, 1  ;;  %v2220_v63 = vrot.slane %v7079_v26, 1 }
 0x64f   : > { %2577 = vrot.lane.b32.xlu0 %v6929_v43, %s9149_s25  ;;  %2483 = vrot.lane.b32.xlu1 %v7052_v51, %s9159_s21  ;;  %9177 = vst [vmem:[#allocation126_spill] sm:$0xff] %v7065_v9 }
 0x650   : > { %v7096_v61 = vsel %vm545_vm3, %v2219_v29, %v2220_v63  ;;  %v2222_v29 = vrot.slane %v6682_v57, 2 }
 0x651   : > { %v7060_v53 = vpop.permute.xlu1 %2949  ;;  %v7062_v13 = vpop.permute.xlu0 %3377 }
 0x652   : > { %9176 = vst [vmem:[#allocation125_spill] sm:$0xff] %v7060_v53  ;;  %v7125_v38 = vsel %vm570_vm2, %v2222_v29, %v2223_v59  ;;  %v2225_v29 = vrot.slane %v6682_v57, 3  ;;  %vm2739_vm2 = vcmask 64512  }
 0x653   : > { %2581 = vrot.lane.b32.xlu0 %v6948_v8, %s9149_s25  ;;  %2487 = vrot.lane.b32.xlu1 %v7065_v9, %s9159_s21 }
 0x655   : > { %v7071_v12 = vpop.permute.xlu1 %2953  ;;  %v7073_v48 = vpop.permute.xlu0 %3381 }
 0x656   : > { %9178 = vst [vmem:[#allocation127_spill] sm:$0xff] %v7071_v12  ;;  %9179 = vst [vmem:[#allocation128_spill] sm:$0xff] %v7073_v48 }
 0x657   : > { %2597 = vrot.lane.b32.xlu0 %v6961_v54, %s9025_s22  ;;  %2527 = vrot.lane.b32.xlu1 %v6794_v34, %s9066_s16 }
 0x659   : > { %v7081_v11 = vpop.permute.xlu1 %2957  ;;  %v7083_v42 = vpop.permute.xlu0 %3543 }
 0x65a   : > { %9180 = vst [vmem:[#allocation129_spill] sm:$0xff] %v7081_v11  ;;  %9181 = vst [vmem:[#allocation130_spill] sm:$0xff] %v7083_v42 }
 0x65b   : > { %2601 = vrot.lane.b32.xlu0 %v6974_v37, %s9025_s22  ;;  %2531 = vrot.lane.b32.xlu1 %v6803_v20, %s9066_s16 }
 0x65d   : > { %v7091_v28 = vpop.permute.xlu1 %3375  ;;  %v7093_v49 = vpop.permute.xlu0 %3111 }
 0x65e   : > { %9182 = vst [vmem:[#allocation131_spill] sm:$0xff] %v7091_v28 }
 0x65f   : > { %2605 = vrot.lane.b32.xlu0 %v6987_v39, %s9025_s22  ;;  %2535 = vrot.lane.b32.xlu1 %v7096_v61, %s9066_s16 }
 0x661   : > { %v7102_v11 = vpop.permute.xlu1 %3379  ;;  %v7104_v31 = vpop.permute.xlu0 %3383 }
 0x662   : > { %9183 = vst [vmem:[#allocation132_spill] sm:$0xff] %v7102_v11  ;;  %9184 = vst [vmem:[#allocation133_spill] sm:$0xff] %v7104_v31 }
 0x663   : > { %2621 = vrot.lane.b32.xlu0 %v7000_v47, %s9065_s15  ;;  %2551 = vrot.lane.b32.xlu1 %v6815_v50, %s9023_s23 }
 0x665   : > { %v7110_v53 = vpop.permute.xlu1 %3545  ;;  %v7112_v63 = vpop.permute.xlu0 %3547 }
 0x666   : > { %9185 = vst [vmem:[#allocation134_spill] sm:$0xff] %v7110_v53  ;;  %9186 = vst [vmem:[#allocation135_spill] sm:$0xff] %v7112_v63 }
 0x667   : > { %2625 = vrot.lane.b32.xlu0 %v7013_v46, %s9065_s15  ;;  %2555 = vrot.lane.b32.xlu1 %v6829_v33, %s9023_s23 }
 0x669   : > { %v7120_v11 = vpop.permute.xlu1 %3113  ;;  %v7122_v31 = vpop.permute.xlu0 %3115 }
 0x66a   : > { %9187 = vst [vmem:[#allocation136_spill] sm:$0xff] %v7120_v11  ;;  %9188 = vst [vmem:[#allocation137_spill] sm:$0xff] %v7122_v31  ;;  %v2226_v31 = vrot.slane %v7079_v26, 3 }
 0x66b   : > { %2629 = vrot.lane.b32.xlu0 %v7026_v24, %s9065_s15  ;;  %2559 = vrot.lane.b32.xlu1 %v7125_v38, %s9023_s23  ;;  %s9197_s23 = smov 30  }
 0x66d   : > { %v7131_v63 = vpop.permute.xlu1 %3385  ;;  %v7133_v42 = vpop.permute.xlu0 %3549 }
 0x66e   : > { %9189 = vst [vmem:[#allocation138_spill] sm:$0xff] %v7131_v63  ;;  %9190 = vst [vmem:[#allocation139_spill] sm:$0xff] %v7133_v42  ;;  %v7154_v42 = vsel %vm2118_vm11, %v2225_v29, %v2226_v31  ;;  %v2228_v29 = vrot.slane %v6682_v57, 4 }
 0x66f   : > { %2645 = vrot.lane.b32.xlu0 %v7039_v14, %s9068_s24  ;;  %2575 = vrot.lane.b32.xlu1 %v6847_v17, %s9149_s25 }
 0x671   : > { %v7139_v11 = vpop.permute.xlu1 %3551  ;;  %v7141_v59 = vpop.permute.xlu0 %3117 }
 0x672   : > { %9191 = vst [vmem:[#allocation140_spill] sm:$0xff] %v7139_v11  ;;  %9192 = vst [vmem:[#allocation141_spill] sm:$0xff] %v7141_v59 }
 0x673   : > { %2649 = vrot.lane.b32.xlu0 %v7052_v51, %s9068_s24  ;;  %2579 = vrot.lane.b32.xlu1 %v6859_v36, %s9149_s25 }
 0x675   : > { %v7149_v12 = vpop.permute.xlu1 %3119  ;;  %v7151_v28 = vpop.permute.xlu0 %2361 }
 0x676   : > { %9193 = vst [vmem:[#allocation142_spill] sm:$0xff] %v7149_v12  ;;  %9194 = vst [vmem:[#allocation143_spill] sm:$0xff] %v7151_v28  ;;  %v2229_v12 = vrot.slane %v7079_v26, 4 }
 0x677   : > { %2583 = vrot.lane.b32.xlu1 %v7154_v42, %s9149_s25  ;;  %2653 = vrot.lane.b32.xlu0 %v7065_v9, %s9068_s24 }
 0x678   : > { %v7183_v53 = vsel %vm2143_vm12, %v2228_v29, %v2229_v12  ;;  %v2231_v29 = vrot.slane %v6682_v57, 5 }
 0x679   : > { %v7160_v11 = vpop.permute.xlu1 %3121  ;;  %v7162_v59 = vpop.permute.xlu0 %2365 }
 0x67a   : > { %9195 = vst [vmem:[#allocation144_spill] sm:$0xff] %v7160_v11  ;;  %9196 = vst [vmem:[#allocation145_spill] sm:$0xff] %v7162_v59 }
 0x67b   : > { %2599 = vrot.lane.b32.xlu1 %v6873_v30, %s9025_s22  ;;  %2693 = vrot.lane.b32.xlu0 %v6794_v34, %s9197_s23 }
 0x67d   : > { %v7168_v28 = vpop.permute.xlu1 %3123  ;;  %v7170_v31 = vpop.permute.xlu0 %2385 }
 0x67e   : > { %9198 = vst [vmem:[#allocation146_spill] sm:$0xff] %v7168_v28  ;;  %9199 = vst [vmem:[#allocation147_spill] sm:$0xff] %v7170_v31 }
 0x67f   : > { %2603 = vrot.lane.b32.xlu1 %v6889_v21, %s9025_s22  ;;  %2697 = vrot.lane.b32.xlu0 %v6803_v20, %s9197_s23 }
 0x681   : > { %v7178_v59 = vpop.permute.xlu1 %2359  ;;  %v7180_v11 = vpop.permute.xlu0 %2389 }
 0x682   : > { %9200 = vst [vmem:[#allocation148_spill] sm:$0xff] %v7178_v59  ;;  %9201 = vst [vmem:[#allocation149_spill] sm:$0xff] %v7180_v11  ;;  %v2232_v59 = vrot.slane %v7079_v26, 5 }
 0x683   : > { %2607 = vrot.lane.b32.xlu1 %v7183_v53, %s9025_s22  ;;  %2701 = vrot.lane.b32.xlu0 %v7096_v61, %s9197_s23  ;;  %s9236_s22 = smov 14  }
 0x684   : > { %v7212_v63 = vsel %vm2168_vm13, %v2231_v29, %v2232_v59  ;;  %v2234_v29 = vrot.slane %v6682_v57, 6 }
 0x685   : > { %v7189_v31 = vpop.permute.xlu1 %2363  ;;  %v7191_v28 = vpop.permute.xlu0 %2409 }
 0x686   : > { %9202 = vst [vmem:[#allocation150_spill] sm:$0xff] %v7189_v31  ;;  %9203 = vst [vmem:[#allocation151_spill] sm:$0xff] %v7191_v28 }
 0x687   : > { %2623 = vrot.lane.b32.xlu1 %v6901_v22, %s9065_s15  ;;  %2851 = vrot.lane.b32.xlu0 %v6847_v17, %s9150_s26 }
 0x689   : > { %v7197_v11 = vpop.permute.xlu1 %2367  ;;  %v7199_v12 = vpop.permute.xlu0 %2413 }
 0x68a   : > { %9204 = vst [vmem:[#allocation152_spill] sm:$0xff] %v7197_v11  ;;  %9205 = vst [vmem:[#allocation153_spill] sm:$0xff] %v7199_v12 }
 0x68b   : > { %2627 = vrot.lane.b32.xlu1 %v6915_v52, %s9065_s15  ;;  %2855 = vrot.lane.b32.xlu0 %v6859_v36, %s9150_s26 }
 0x68d   : > { %v7207_v31 = vpop.permute.xlu1 %2383  ;;  %v7209_v28 = vpop.permute.xlu0 %2433 }
 0x68e   : > { %9206 = vst [vmem:[#allocation154_spill] sm:$0xff] %v7207_v31  ;;  %9207 = vst [vmem:[#allocation155_spill] sm:$0xff] %v7209_v28  ;;  %v2235_v31 = vrot.slane %v7079_v26, 6 }
 0x68f   : > { %2631 = vrot.lane.b32.xlu1 %v7212_v63, %s9065_s15  ;;  %2859 = vrot.lane.b32.xlu0 %v7154_v42, %s9150_s26 }
 0x690   : > { %v7241_v48 = vsel %vm9040_vm10, %v2234_v29, %v2235_v31  ;;  %vm2838_vm10 = vcmask 244736  }
 0x691   : > { %v7218_v11 = vpop.permute.xlu1 %2387  ;;  %v7220_v12 = vpop.permute.xlu0 %2437 }
 0x692   : > { %9208 = vst [vmem:[#allocation156_spill] sm:$0xff] %v7218_v11  ;;  %9209 = vst [vmem:[#allocation157_spill] sm:$0xff] %v7220_v12 }
 0x693   : > { %2647 = vrot.lane.b32.xlu1 %v6933_v15, %s9068_s24  ;;  %2875 = vrot.lane.b32.xlu0 %v6873_v30, %s9152_s29 }
 0x695   : > { %v7226_v28 = vpop.permute.xlu1 %2391  ;;  %v7228_v59 = vpop.permute.xlu0 %2457 }
 0x696   : > { %9210 = vst [vmem:[#allocation158_spill] sm:$0xff] %v7226_v28  ;;  %9211 = vst [vmem:[#allocation159_spill] sm:$0xff] %v7228_v59 }
 0x697   : > { %2651 = vrot.lane.b32.xlu1 %v6945_v25, %s9068_s24  ;;  %2879 = vrot.lane.b32.xlu0 %v6889_v21, %s9152_s29 }
 0x699   : > { %v7236_v12 = vpop.permute.xlu1 %2407  ;;  %v7238_v11 = vpop.permute.xlu0 %2461 }
 0x69a   : > { %9212 = vst [vmem:[#allocation160_spill] sm:$0xff] %v7236_v12  ;;  %9213 = vst [vmem:[#allocation161_spill] sm:$0xff] %v7238_v11  ;;  %v2239_v11 = vrot.slane %v6700_v23, 1 }
 0x69b   : > { %2655 = vrot.lane.b32.xlu1 %v7241_v48, %s9068_s24  ;;  %2883 = vrot.lane.b32.xlu0 %v7183_v53, %s9152_s29 }
 0x69d   : > { %v7247_v57 = vpop.permute.xlu1 %2411  ;;  %v7249_v26 = vpop.permute.xlu0 %2481 }
 0x69e   : > { %9214 = vst [vmem:[#allocation162_spill] sm:$0xff] %v7247_v57  ;;  %9215 = vst [vmem:[#allocation163_spill] sm:$0xff] %v7249_v26  ;;  %v2240_v26 = vrot.slane %v6702_v27, 1 }
 0x69f   : > { %2691 = vrot.lane.b32.xlu1 %v6832_v10, %s9197_s23  ;;  %2899 = vrot.lane.b32.xlu0 %v6901_v22, %s5111_s14 }
 0x6a0   : > { %v7278_v59 = vsel %vm545_vm3, %v2239_v11, %v2240_v26 }
 0x6a1   : > { %v7255_v28 = vpop.permute.xlu1 %2415  ;;  %v7257_v31 = vpop.permute.xlu0 %2485 }
 0x6a2   : > { %9216 = vst [vmem:[#allocation164_spill] sm:$0xff] %v7255_v28  ;;  %9217 = vst [vmem:[#allocation165_spill] sm:$0xff] %v7257_v31 }
 0x6a3   : > { %2695 = vrot.lane.b32.xlu1 %v6843_v40, %s9197_s23  ;;  %2903 = vrot.lane.b32.xlu0 %v6915_v52, %s5111_s14 }
 0x6a5   : > { %v7263_v29 = vpop.permute.xlu1 %2431  ;;  %v7265_v57 = vpop.permute.xlu0 %2525 }
 0x6a6   : > { %9218 = vst [vmem:[#allocation166_spill] sm:$0xff] %v7263_v29  ;;  %9219 = vst [vmem:[#allocation167_spill] sm:$0xff] %v7265_v57 }
 0x6a7   : > { %2699 = vrot.lane.b32.xlu1 %v6862_v19, %s9197_s23  ;;  %2907 = vrot.lane.b32.xlu0 %v7212_v63, %s5111_s14 }
 0x6a9   : > { %v7273_v28 = vpop.permute.xlu1 %2435  ;;  %v7275_v31 = vpop.permute.xlu0 %2529 }
 0x6aa   : > { %9220 = vst [vmem:[#allocation168_spill] sm:$0xff] %v7273_v28  ;;  %9221 = vst [vmem:[#allocation169_spill] sm:$0xff] %v7275_v31  ;;  %v2254_v31 = vrot.slane %v6702_v27, 3 }
 0x6ab   : > { %2703 = vrot.lane.b32.xlu1 %v7278_v59, %s9197_s23  ;;  %2923 = vrot.lane.b32.xlu0 %v6933_v15, %s9155_s18 }
 0x6ad   : > { %v7284_v29 = vpop.permute.xlu1 %2439  ;;  %v7286_v12 = vpop.permute.xlu0 %2533 }
 0x6ae   : > { %9222 = vst [vmem:[#allocation170_spill] sm:$0xff] %v7284_v29  ;;  %9223 = vst [vmem:[#allocation171_spill] sm:$0xff] %v7286_v12  ;;  %v2253_v12 = vrot.slane %v6700_v23, 3 }
 0x6af   : > { %2849 = vrot.lane.b32.xlu1 %v6918_v62, %s9150_s26  ;;  %2927 = vrot.lane.b32.xlu0 %v6945_v25, %s9155_s18 }
 0x6b0   : > { %v7315_v57 = vsel %vm2118_vm11, %v2253_v12, %v2254_v31  ;;  %vm9041_vm11 = vcmask 146432  }
 0x6b1   : > { %v7292_v28 = vpop.permute.xlu1 %2455  ;;  %v7294_v11 = vpop.permute.xlu0 %2549 }
 0x6b2   : > { %9224 = vst [vmem:[#allocation172_spill] sm:$0xff] %v7292_v28  ;;  %9225 = vst [vmem:[#allocation173_spill] sm:$0xff] %v7294_v11 }
 0x6b3   : > { %2853 = vrot.lane.b32.xlu1 %v6929_v43, %s9150_s26  ;;  %2931 = vrot.lane.b32.xlu0 %v7241_v48, %s9155_s18 }
 0x6b5   : > { %v7300_v26 = vpop.permute.xlu1 %2459  ;;  %v7302_v29 = vpop.permute.xlu0 %2553 }
 0x6b6   : > { %9226 = vst [vmem:[#allocation174_spill] sm:$0xff] %v7300_v26  ;;  %9227 = vst [vmem:[#allocation175_spill] sm:$0xff] %v7302_v29 }
 0x6b7   : > { %2857 = vrot.lane.b32.xlu1 %v6948_v8, %s9150_s26  ;;  %2967 = vrot.lane.b32.xlu0 %v6832_v10, %s9159_s21 }
 0x6b9   : > { %v7310_v28 = vpop.permute.xlu1 %2463  ;;  %v7312_v11 = vpop.permute.xlu0 %2557 }
 0x6ba   : > { %9228 = vst [vmem:[#allocation176_spill] sm:$0xff] %v7310_v28  ;;  %9229 = vst [vmem:[#allocation177_spill] sm:$0xff] %v7312_v11  ;;  %v2256_v28 = vrot.slane %v6700_v23, 4 }
 0x6bb   : > { %2861 = vrot.lane.b32.xlu1 %v7315_v57, %s9150_s26  ;;  %2971 = vrot.lane.b32.xlu0 %v6843_v40, %s9159_s21 }
 0x6bd   : > { %v7321_v26 = vpop.permute.xlu1 %2479  ;;  %v7323_v29 = vpop.permute.xlu0 %2573 }
 0x6be   : > { %9230 = vst [vmem:[#allocation178_spill] sm:$0xff] %v7321_v26  ;;  %9231 = vst [vmem:[#allocation179_spill] sm:$0xff] %v7323_v29  ;;  %v2257_v26 = vrot.slane %v6702_v27, 4 }
 0x6bf   : > { %2873 = vrot.lane.b32.xlu1 %v6961_v54, %s9152_s29  ;;  %2975 = vrot.lane.b32.xlu0 %v6862_v19, %s9159_s21 }
 0x6c0   : > { %v7352_v29 = vsel %vm2143_vm12, %v2256_v28, %v2257_v26  ;;  %vm2793_vm12 = vcmask 162816  }
 0x6c1   : > { %v7329_v10 = vpop.permute.xlu1 %2483  ;;  %v7331_v12 = vpop.permute.xlu0 %2577 }
 0x6c2   : > { %9232 = vst [vmem:[#allocation180_spill] sm:$0xff] %v7329_v10  ;;  %9233 = vst [vmem:[#allocation181_spill] sm:$0xff] %v7331_v12 }
 0x6c3   : > { %2877 = vrot.lane.b32.xlu1 %v6974_v37, %s9152_s29  ;;  %2979 = vrot.lane.b32.xlu0 %v7278_v59, %s9159_s21 }
 0x6c5   : > { %v7337_v31 = vpop.permute.xlu1 %2487  ;;  %v7339_v11 = vpop.permute.xlu0 %2581 }
 0x6c6   : > { %9234 = vst [vmem:[#allocation182_spill] sm:$0xff] %v7337_v31  ;;  %9235 = vst [vmem:[#allocation183_spill] sm:$0xff] %v7339_v11 }
 0x6c7   : > { %2881 = vrot.lane.b32.xlu1 %v6987_v39, %s9152_s29  ;;  %2991 = vrot.lane.b32.xlu0 %v6876_v58, %s9236_s22 }
 0x6c9   : > { %v7347_v10 = vpop.permute.xlu1 %2527  ;;  %v7349_v12 = vpop.permute.xlu0 %2597 }
 0x6ca   : > { %9237 = vst [vmem:[#allocation184_spill] sm:$0xff] %v7347_v10  ;;  %9238 = vst [vmem:[#allocation185_spill] sm:$0xff] %v7349_v12  ;;  %v2260_v12 = vrot.slane %v6702_v27, 5 }
 0x6cb   : > { %2885 = vrot.lane.b32.xlu1 %v7352_v29, %s9152_s29  ;;  %2995 = vrot.lane.b32.xlu0 %v6885_v35, %s9236_s22 }
 0x6cd   : > { %v7358_v11 = vpop.permute.xlu1 %2531  ;;  %v7360_v31 = vpop.permute.xlu0 %2601 }
 0x6ce   : > { %9239 = vst [vmem:[#allocation186_spill] sm:$0xff] %v7358_v11  ;;  %9240 = vst [vmem:[#allocation187_spill] sm:$0xff] %v7360_v31  ;;  %v2259_v31 = vrot.slane %v6700_v23, 5 }
 0x6cf   : > { %2897 = vrot.lane.b32.xlu1 %v7000_v47, %s5111_s14  ;;  %3329 = vrot.lane.b32.xlu0 %v7013_v46, %s9150_s26 }
 0x6d0   : > { %v7389_v58 = vsel %vm2168_vm13, %v2259_v31, %v2260_v12 }
 0x6d1   : > { %v7366_v10 = vpop.permute.xlu1 %2535  ;;  %v7368_v28 = vpop.permute.xlu0 %2605 }
 0x6d2   : > { %9241 = vst [vmem:[#allocation188_spill] sm:$0xff] %v7366_v10  ;;  %9242 = vst [vmem:[#allocation189_spill] sm:$0xff] %v7368_v28 }
 0x6d3   : > { %2901 = vrot.lane.b32.xlu1 %v7013_v46, %s5111_s14  ;;  %3353 = vrot.lane.b32.xlu0 %v7052_v51, %s9152_s29 }
 0x6d5   : > { %v7374_v26 = vpop.permute.xlu1 %2551  ;;  %v7376_v11 = vpop.permute.xlu0 %2621 }
 0x6d6   : > { %9243 = vst [vmem:[#allocation190_spill] sm:$0xff] %v7374_v26  ;;  %9244 = vst [vmem:[#allocation191_spill] sm:$0xff] %v7376_v11  ;;  %v2267_v26 = vrot.slane %v6704_v2, 1 }
 0x6d7   : > { %2905 = vrot.lane.b32.xlu1 %v7026_v24, %s5111_s14  ;;  %3331 = vrot.lane.b32.xlu0 %v6915_v52, %s9150_s26 }
 0x6d9   : > { %v7384_v10 = vpop.permute.xlu1 %2555  ;;  %v7386_v28 = vpop.permute.xlu0 %2625 }
 0x6da   : > { %9245 = vst [vmem:[#allocation192_spill] sm:$0xff] %v7384_v10  ;;  %9246 = vst [vmem:[#allocation193_spill] sm:$0xff] %v7386_v28 }
 0x6db   : > { %2909 = vrot.lane.b32.xlu1 %v7389_v58, %s5111_s14  ;;  %3423 = vrot.lane.b32.xlu0 %v6885_v35, %s9028_s17  ;;  %s9261_s14 = smov 18  }
 0x6dd   : > { %v7395_v23 = vpop.permute.xlu1 %2559  ;;  %v7397_v27 = vpop.permute.xlu0 %2629 }
 0x6de   : > { %9247 = vst [vmem:[#allocation194_spill] sm:$0xff] %v7395_v23  ;;  %9248 = vst [vmem:[#allocation195_spill] sm:$0xff] %v7397_v27 }
 0x6df   : > { %2921 = vrot.lane.b32.xlu1 %v7039_v14, %s9155_s18  ;;  %3355 = vrot.lane.b32.xlu0 %v6945_v25, %s9152_s29 }
 0x6e1   : > { %v7403_v10 = vpop.permute.xlu1 %2575  ;;  %v7405_v12 = vpop.permute.xlu0 %2645 }
 0x6e2   : > { %9249 = vst [vmem:[#allocation196_spill] sm:$0xff] %v7403_v10  ;;  %9250 = vst [vmem:[#allocation197_spill] sm:$0xff] %v7405_v12 }
 0x6e3   : > { %2925 = vrot.lane.b32.xlu1 %v7052_v51, %s9155_s18  ;;  %3447 = vrot.lane.b32.xlu0 %v6929_v43, %s9159_s21 }
 0x6e5   : > { %v7411_v31 = vpop.permute.xlu1 %2579  ;;  %v7413_v23 = vpop.permute.xlu0 %2649 }
 0x6e6   : > { %9251 = vst [vmem:[#allocation198_spill] sm:$0xff] %v7411_v31  ;;  %9252 = vst [vmem:[#allocation199_spill] sm:$0xff] %v7413_v23 }
 0x6e7   : > { %2929 = vrot.lane.b32.xlu1 %v7065_v9, %s9155_s18  ;;  %3357 = vrot.lane.b32.xlu0 %v7065_v9, %s9152_s29 }
 0x6e9   : > { %v7419_v27 = vpop.permute.xlu1 %2583  ;;  %v7421_v28 = vpop.permute.xlu0 %2653 }
 0x6ea   : > { %9253 = vst [vmem:[#allocation200_spill] sm:$0xff] %v7419_v27  ;;  %9254 = vst [vmem:[#allocation201_spill] sm:$0xff] %v7421_v28 }
 0x6eb   : > { %2933 = vrot.lane.b32.xlu1 %v6716_v55, %s9155_s18  ;;  %3449 = vrot.lane.b32.xlu0 %v6859_v36, %s9159_s21 }
 0x6ed   : > { %v7427_v10 = vpop.permute.xlu1 %2599  ;;  %v7429_v31 = vpop.permute.xlu0 %2693 }
 0x6ee   : > { %9255 = vst [vmem:[#allocation202_spill] sm:$0xff] %v7427_v10  ;;  %9256 = vst [vmem:[#allocation203_spill] sm:$0xff] %v7429_v31  ;;  %v2268_v31 = vrot.slane %v6708_v60, 1 }
 0x6ef   : > { %2969 = vrot.lane.b32.xlu1 %v6794_v34, %s9159_s21  ;;  %3017 = vrot.lane.b32.xlu0 %v6847_v17, %s9066_s16 }
 0x6f0   : > { %v7458_v12 = vsel %vm545_vm3, %v2267_v26, %v2268_v31  ;;  %vm2748_vm3 = vcmask 80896  }
 0x6f1   : > { %v7435_v23 = vpop.permute.xlu1 %2603  ;;  %v7437_v27 = vpop.permute.xlu0 %2697 }
 0x6f2   : > { %9257 = vst [vmem:[#allocation204_spill] sm:$0xff] %v7435_v23  ;;  %9258 = vst [vmem:[#allocation205_spill] sm:$0xff] %v7437_v27 }
 0x6f3   : > { %2973 = vrot.lane.b32.xlu1 %v6803_v20, %s9159_s21  ;;  %3473 = vrot.lane.b32.xlu0 %v6889_v21, %s9236_s22 }
 0x6f5   : > { %v7443_v28 = vpop.permute.xlu1 %2607  ;;  %v7445_v10 = vpop.permute.xlu0 %2701 }
 0x6f6   : > { %9259 = vst [vmem:[#allocation206_spill] sm:$0xff] %v7443_v28  ;;  %9260 = vst [vmem:[#allocation207_spill] sm:$0xff] %v7445_v10 }
 0x6f7   : > { %2977 = vrot.lane.b32.xlu1 %v7096_v61, %s9159_s21  ;;  %3041 = vrot.lane.b32.xlu0 %v6873_v30, %s9261_s14 }
 0x6f9   : > { %v7453_v23 = vpop.permute.xlu1 %2623  ;;  %v7455_v27 = vpop.permute.xlu0 %2851 }
 0x6fa   : > { %9262 = vst [vmem:[#allocation208_spill] sm:$0xff] %v7453_v23  ;;  %9263 = vst [vmem:[#allocation209_spill] sm:$0xff] %v7455_v27 }
 0x6fb   : > { %2981 = vrot.lane.b32.xlu1 %v7458_v12, %s9159_s21  ;;  %3335 = vrot.lane.b32.xlu0 %v7212_v63, %s9150_s26 }
 0x6fd   : > { %v7464_v2 = vpop.permute.xlu1 %2627  ;;  %v7466_v60 = vpop.permute.xlu0 %2855 }
 0x6fe   : > { %9264 = vst [vmem:[#allocation210_spill] sm:$0xff] %v7464_v2  ;;  %9265 = vst [vmem:[#allocation211_spill] sm:$0xff] %v7466_v60 }
 0x6ff   : > { %2993 = vrot.lane.b32.xlu1 %v6815_v50, %s9236_s22  ;;  %3427 = vrot.lane.b32.xlu0 %v6904_v1, %s9028_s17 }
 0x701   : > { %v7472_v10 = vpop.permute.xlu1 %2631  ;;  %v7474_v26 = vpop.permute.xlu0 %2859 }
 0x702   : > { %9266 = vst [vmem:[#allocation212_spill] sm:$0xff] %v7472_v10  ;;  %9267 = vst [vmem:[#allocation213_spill] sm:$0xff] %v7474_v26 }
 0x703   : > { %3327 = vrot.lane.b32.xlu1 %v6901_v22, %s9150_s26  ;;  %3519 = vrot.lane.b32.xlu0 %v7052_v51, %s9261_s14 }
 0x705   : > { %v7480_v31 = vpop.permute.xlu1 %2647  ;;  %v7482_v28 = vpop.permute.xlu0 %2875 }
 0x706   : > { %9268 = vst [vmem:[#allocation214_spill] sm:$0xff] %v7480_v31  ;;  %9269 = vst [vmem:[#allocation215_spill] sm:$0xff] %v7482_v28 }
 0x707   : > { %3351 = vrot.lane.b32.xlu1 %v6933_v15, %s9152_s29  ;;  %3087 = vrot.lane.b32.xlu0 %v7039_v14, %s9270_s0 }
 0x709   : > { %v7488_v2 = vpop.permute.xlu1 %2651  ;;  %v7490_v10 = vpop.permute.xlu0 %2879 }
 0x70a   : > { %9271 = vst [vmem:[#allocation216_spill] sm:$0xff] %v7488_v2  ;;  %9272 = vst [vmem:[#allocation217_spill] sm:$0xff] %v7490_v10 }
 0x70b   : > { %3399 = vrot.lane.b32.xlu1 %v6843_v40, %s9155_s18  ;;  %3359 = vrot.lane.b32.xlu0 %v7241_v48, %s9152_s29 }
 0x70d   : > { %v7496_v23 = vpop.permute.xlu1 %2655  ;;  %v7498_v31 = vpop.permute.xlu0 %2883 }
 0x70e   : > { %9273 = vst [vmem:[#allocation218_spill] sm:$0xff] %v7496_v23  ;;  %9274 = vst [vmem:[#allocation219_spill] sm:$0xff] %v7498_v31 }
 0x70f   : > { %3401 = vrot.lane.b32.xlu1 %v6803_v20, %s9155_s18  ;;  %3451 = vrot.lane.b32.xlu0 %v6948_v8, %s9159_s21 }
 0x711   : > { %v7504_v14 = vpop.permute.xlu1 %2691  ;;  %v7506_v2 = vpop.permute.xlu0 %2899 }
 0x712   : > { %9275 = vst [vmem:[#allocation220_spill] sm:$0xff] %v7504_v14  ;;  %9276 = vst [vmem:[#allocation221_spill] sm:$0xff] %v7506_v2 }
 0x713   : > { %3333 = vrot.lane.b32.xlu1 %v7026_v24, %s9150_s26  ;;  %3019 = vrot.lane.b32.xlu0 %v6929_v43, %s9066_s16 }
 0x715   : > { %v7512_v11 = vpop.permute.xlu1 %2695  ;;  %v7514_v23 = vpop.permute.xlu0 %2903 }
 0x716   : > { %9277 = vst [vmem:[#allocation222_spill] sm:$0xff] %v7512_v11  ;;  %9278 = vst [vmem:[#allocation223_spill] sm:$0xff] %v7514_v23 }
 0x717   : > { %3425 = vrot.lane.b32.xlu1 %v6829_v33, %s9028_s17  ;;  %3475 = vrot.lane.b32.xlu0 %v6987_v39, %s9236_s22  ;;  %s9293_s17 = smov 28  }
 0x719   : > { %v7520_v31 = vpop.permute.xlu1 %2699  ;;  %v7522_v14 = vpop.permute.xlu0 %2907 }
 0x71a   : > { %9279 = vst [vmem:[#allocation224_spill] sm:$0xff] %v7520_v31  ;;  %9280 = vst [vmem:[#allocation225_spill] sm:$0xff] %v7522_v14 }
 0x71b   : > { %3015 = vrot.lane.b32.xlu1 %v6918_v62, %s9066_s16  ;;  %3567 = vrot.lane.b32.xlu0 %v6803_v20, %s9270_s0 }
 0x71d   : > { %v7528_v26 = vpop.permute.xlu1 %2703  ;;  %v7530_v11 = vpop.permute.xlu0 %2923 }
 0x71e   : > { %9281 = vst [vmem:[#allocation226_spill] sm:$0xff] %v7528_v26  ;;  %9282 = vst [vmem:[#allocation227_spill] sm:$0xff] %v7530_v11 }
 0x71f   : > { %3471 = vrot.lane.b32.xlu1 %v6974_v37, %s9236_s22  ;;  %3043 = vrot.lane.b32.xlu0 %v6974_v37, %s9261_s14 }
 0x721   : > { %v7536_v2 = vpop.permute.xlu1 %2849  ;;  %v7538_v31 = vpop.permute.xlu0 %2927 }
 0x722   : > { %9283 = vst [vmem:[#allocation228_spill] sm:$0xff] %v7536_v2  ;;  %9284 = vst [vmem:[#allocation229_spill] sm:$0xff] %v7538_v31 }
 0x723   : > { %3039 = vrot.lane.b32.xlu1 %v6961_v54, %s9261_s14  ;;  %3135 = vrot.lane.b32.xlu0 %v6794_v34, %s9068_s24 }
 0x725   : > { %v7544_v62 = vpop.permute.xlu1 %2853  ;;  %v7546_v26 = vpop.permute.xlu0 %2931 }
 0x726   : > { %9285 = vst [vmem:[#allocation230_spill] sm:$0xff] %v7544_v62  ;;  %9286 = vst [vmem:[#allocation231_spill] sm:$0xff] %v7546_v26 }
 0x727   : > { %3403 = vrot.lane.b32.xlu1 %v6862_v19, %s9155_s18  ;;  %3407 = vrot.lane.b32.xlu0 %v7278_v59, %s9155_s18 }
 0x729   : > { %v7552_v14 = vpop.permute.xlu1 %2857  ;;  %v7554_v2 = vpop.permute.xlu0 %2967 }
 0x72b   : > { %3495 = vrot.lane.b32.xlu1 %v7013_v46, %s9066_s16  ;;  %3499 = vrot.lane.b32.xlu0 %v7026_v24, %s9066_s16 }
 0x72d   : > { %v7560_v34 = vpop.permute.xlu1 %2861  ;;  %v7562_v54 = vpop.permute.xlu0 %2971 }
 0x72e   : > { %9287 = vst [vmem:[#allocation232_spill] sm:$0xff] %v7560_v34  ;;  %9288 = vst [vmem:[#allocation233_spill] sm:$0xff] %v7562_v54 }
 0x72f   : > { %3063 = vrot.lane.b32.xlu1 %v7000_v47, %s9149_s25  ;;  %3591 = vrot.lane.b32.xlu0 %v6829_v33, %s9065_s15 }
 0x731   : > { %v7568_v26 = vpop.permute.xlu1 %2873  ;;  %v7570_v11 = vpop.permute.xlu0 %2975 }
 0x732   : > { %9289 = vst [vmem:[#allocation234_spill] sm:$0xff] %v7568_v26  ;;  %9290 = vst [vmem:[#allocation235_spill] sm:$0xff] %v7570_v11 }
 0x733   : > { %3405 = vrot.lane.b32.xlu1 %v7096_v61, %s9155_s18  ;;  %3067 = vrot.lane.b32.xlu0 %v7013_v46, %s9149_s25 }
 0x735   : > { %v7576_v28 = vpop.permute.xlu1 %2877  ;;  %v7578_v34 = vpop.permute.xlu0 %2979 }
 0x736   : > { %9291 = vst [vmem:[#allocation236_spill] sm:$0xff] %v7576_v28  ;;  %9292 = vst [vmem:[#allocation237_spill] sm:$0xff] %v7578_v34 }
 0x737   : > { %3497 = vrot.lane.b32.xlu1 %v6915_v52, %s9066_s16  ;;  %3159 = vrot.lane.b32.xlu0 %v6815_v50, %s9293_s17 }
 0x739   : > { %v7584_v47 = vpop.permute.xlu1 %2881  ;;  %v7586_v26 = vpop.permute.xlu0 %2991 }
 0x73b   : > { %3065 = vrot.lane.b32.xlu1 %v6901_v22, %s9149_s25  ;;  %3409 = vrot.lane.b32.xlu0 %v7458_v12, %s9155_s18 }
 0x73d   : > { %v7592_v46 = vpop.permute.xlu1 %2885  ;;  %v7594_v54 = vpop.permute.xlu0 %2995 }
 0x73e   : > { %9294 = vst [vmem:[#allocation238_spill] sm:$0xff] %v7592_v46  ;;  %9295 = vst [vmem:[#allocation239_spill] sm:$0xff] %v7594_v54 }
 0x73f   : > { %3337 = vrot.lane.b32.xlu1 %v7389_v58, %s9150_s26  ;;  %3501 = vrot.lane.b32.xlu0 %v7212_v63, %s9066_s16 }
 0x741   : > { %v7600_v34 = vpop.permute.xlu1 %2897  ;;  %v7602_v50 = vpop.permute.xlu0 %3329 }
 0x742   : > { %9296 = vst [vmem:[#allocation240_spill] sm:$0xff] %v7600_v34 }
 0x743   : > { %3429 = vrot.lane.b32.xlu1 %v7125_v38, %s9297_s1  ;;  %3593 = vrot.lane.b32.xlu0 %v6904_v1, %s9065_s15 }
 0x745   : > { %v7608_v22 = vpop.permute.xlu1 %2901  ;;  %v7610_v46 = vpop.permute.xlu0 %3353 }
 0x746   : > { %9298 = vst [vmem:[#allocation241_spill] sm:$0xff] %v7608_v22 }
 0x747   : > { %3521 = vrot.lane.b32.xlu1 %v6945_v25, %s9261_s14  ;;  %2999 = vrot.lane.b32.xlu0 %v6904_v1, %s9236_s22 }
 0x749   : > { %v7616_v54 = vpop.permute.xlu1 %2905  ;;  %v7618_v34 = vpop.permute.xlu0 %3331 }
 0x74a   : > { %9299 = vst [vmem:[#allocation242_spill] sm:$0xff] %v7616_v54  ;;  %9300 = vst [vmem:[#allocation243_spill] sm:$0xff] %v7618_v34 }
 0x74b   : > { %2997 = vrot.lane.b32.xlu1 %v6829_v33, %s9236_s22  ;;  %3091 = vrot.lane.b32.xlu0 %v7052_v51, %s9270_s0 }
 0x74d   : > { %v7624_v27 = vpop.permute.xlu1 %2909  ;;  %v7626_v22 = vpop.permute.xlu0 %3423 }
 0x74e   : > { %9301 = vst [vmem:[#allocation244_spill] sm:$0xff] %v7624_v27  ;;  %9302 = vst [vmem:[#allocation245_spill] sm:$0xff] %v7626_v22 }
 0x74f   : > { %3089 = vrot.lane.b32.xlu1 %v6933_v15, %s9270_s0  ;;  %3183 = vrot.lane.b32.xlu0 %v6847_v17, %s9197_s23 }
 0x751   : > { %v7632_v28 = vpop.permute.xlu1 %2921  ;;  %v7634_v62 = vpop.permute.xlu0 %3355 }
 0x752   : > { %9303 = vst [vmem:[#allocation246_spill] sm:$0xff] %v7632_v28  ;;  %9304 = vst [vmem:[#allocation247_spill] sm:$0xff] %v7634_v62 }
 0x753   : > { %3361 = vrot.lane.b32.xlu1 %v6716_v55, %s9152_s29  ;;  %3363 = vrot.lane.b32.xlu0 %v6734_v5, %s9152_s29 }
 0x755   : > { %v7640_v51 = vpop.permute.xlu1 %2925  ;;  %v7642_v27 = vpop.permute.xlu0 %3447 }
 0x756   : > { %9305 = vst [vmem:[#allocation248_spill] sm:$0xff] %v7640_v51  ;;  %9306 = vst [vmem:[#allocation249_spill] sm:$0xff] %v7642_v27 }
 0x757   : > { %3453 = vrot.lane.b32.xlu1 %v7154_v42, %s9159_s21  ;;  %3455 = vrot.lane.b32.xlu0 %v7315_v57, %s9159_s21 }
 0x759   : > { %v7648_v17 = vpop.permute.xlu1 %2929  ;;  %v7650_v15 = vpop.permute.xlu0 %3357 }
 0x75a   : > { %9307 = vst [vmem:[#allocation250_spill] sm:$0xff] %v7648_v17 }
 0x75b   : > { %3021 = vrot.lane.b32.xlu1 %v6859_v36, %s9066_s16  ;;  %3639 = vrot.lane.b32.xlu0 %v6889_v21, %s9293_s17 }
 0x75d   : > { %v7656_v28 = vpop.permute.xlu1 %2933  ;;  %v7658_v62 = vpop.permute.xlu0 %3449 }
 0x75e   : > { %9308 = vst [vmem:[#allocation251_spill] sm:$0xff] %v7656_v28 }
 0x75f   : > { %3477 = vrot.lane.b32.xlu1 %v7183_v53, %s9236_s22  ;;  %3023 = vrot.lane.b32.xlu0 %v6948_v8, %s9066_s16 }
 0x761   : > { %v7664_v34 = vpop.permute.xlu1 %2969  ;;  %v7666_v51 = vpop.permute.xlu0 %3017 }
 0x762   : > { %9309 = vst [vmem:[#allocation252_spill] sm:$0xff] %v7664_v34  ;;  %9310 = vst [vmem:[#allocation253_spill] sm:$0xff] %v7666_v51 }
 0x763   : > { %3569 = vrot.lane.b32.xlu1 %v6862_v19, %s9270_s0  ;;  %3457 = vrot.lane.b32.xlu0 %v6737_v0, %s9159_s21  ;;  %s4319_s21 = sshll.u32 %s5221_s12, 10 }
 0x765   : > { %v7672_v11 = vpop.permute.xlu1 %2973  ;;  %v7674_v28 = vpop.permute.xlu0 %3473 }
 0x766   : > { %9311 = vst [vmem:[#allocation254_spill] sm:$0xff] %v7672_v11 }
 0x767   : > { %3045 = vrot.lane.b32.xlu1 %v6889_v21, %s9261_s14  ;;  %3641 = vrot.lane.b32.xlu0 %v6987_v39, %s9293_s17 }
 0x769   : > { %v7680_v31 = vpop.permute.xlu1 %2977  ;;  %v7682_v34 = vpop.permute.xlu0 %3041 }
 0x76a   : > { %9312 = vst [vmem:[#allocation255_spill] sm:$0xff] %v7680_v31  ;;  %9313 = vst [vmem:[#allocation256_spill] sm:$0xff] %v7682_v34 }
 0x76b   : > { %3137 = vrot.lane.b32.xlu1 %v6843_v40, %s9068_s24  ;;  %3025 = vrot.lane.b32.xlu0 %v7154_v42, %s9066_s16 }
 0x76d   : > { %v7688_v51 = vpop.permute.xlu1 %2981  ;;  %v7690_v11 = vpop.permute.xlu0 %3335 }
 0x76e   : > { %9314 = vst [vmem:[#allocation257_spill] sm:$0xff] %v7688_v51  ;;  %9315 = vst [vmem:[#allocation258_spill] sm:$0xff] %v7690_v11 }
 0x76f   : > { %3339 = vrot.lane.b32.xlu1 %v6742_v32, %s9150_s26  ;;  %3481 = vrot.lane.b32.xlu0 %v6746_v16, %s9236_s22  ;;  %s8906_s26 = scalar_lea.hbm %s8971_s13, %s4319_s21 }
 0x771   : > { %v7696_v21 = vpop.permute.xlu1 %2993  ;;  %v7698_v23 = vpop.permute.xlu0 %3427 }
 0x772   : > { %9316 = vst [vmem:[#allocation259_spill] sm:$0xff] %v7696_v21  ;;  %9317 = vst [vmem:[#allocation260_spill] sm:$0xff] %v7698_v23 }
 0x773   : > { %3431 = vrot.lane.b32.xlu1 %v6724_v41, %s9297_s1  ;;  %3573 = vrot.lane.b32.xlu0 %v7278_v59, %s9270_s0 }
 0x775   : > { %v7704_v40 = vpop.permute.xlu1 %3327  ;;  %v7706_v34 = vpop.permute.xlu0 %3519 }
 0x776   : > { %9318 = vst [vmem:[#allocation261_spill] sm:$0xff] %v7706_v34 }
 0x777   : > { %3523 = vrot.lane.b32.xlu1 %v7065_v9, %s9261_s14  ;;  %3665 = vrot.lane.b32.xlu0 %v7026_v24, %s9197_s23 }
 0x779   : > { %v7712_v51 = vpop.permute.xlu1 %3351  ;;  %v7714_v21 = vpop.permute.xlu0 %3087 }
 0x77b   : > { %3615 = vrot.lane.b32.xlu1 %v6859_v36, %s9068_s24  ;;  %3071 = vrot.lane.b32.xlu0 %v7026_v24, %s9149_s25 }
 0x77d   : > { %v7720_v23 = vpop.permute.xlu1 %3399  ;;  %v7722_v11 = vpop.permute.xlu0 %3359 }
 0x77e   : > { %9319 = vst [vmem:[#allocation262_spill] sm:$0xff] %v7720_v23  ;;  %9320 = vst [vmem:[#allocation263_spill] sm:$0xff] %v7722_v11 }
 0x77f   : > { %3069 = vrot.lane.b32.xlu1 %v6915_v52, %s9149_s25  ;;  %3163 = vrot.lane.b32.xlu0 %v6829_v33, %s9293_s17 }
 0x781   : > { %v7728_v10 = vpop.permute.xlu1 %3401  ;;  %v7730_v60 = vpop.permute.xlu0 %3451 }
 0x782   : > { %9321 = vst [vmem:[#allocation264_spill] sm:$0xff] %v7730_v60 }
 0x783   : > { %3161 = vrot.lane.b32.xlu1 %v6885_v35, %s9293_s17  ;;  %3527 = vrot.lane.b32.xlu0 %v6716_v55, %s9261_s14 }
 0x785   : > { %v7736_v24 = vpop.permute.xlu1 %3333  ;;  %v7738_v34 = vpop.permute.xlu0 %3019 }
 0x786   : > { %9322 = vst [vmem:[#allocation265_spill] sm:$0xff] %v7738_v34 }
 0x787   : > { %3433 = vrot.lane.b32.xlu1 %v6749_v4, %s9297_s1  ;;  %3619 = vrot.lane.b32.xlu0 %v7154_v42, %s9068_s24  ;;  %s9343_s1 = smov 32  }
 0x789   : > { %v7744_v11 = vpop.permute.xlu1 %3425  ;;  %v7746_v33 = vpop.permute.xlu0 %3475 }
 0x78a   : > { %9323 = vst [vmem:[#allocation266_spill] sm:$0xff] %v7746_v33 }
 0x78b   : > { %3525 = vrot.lane.b32.xlu1 %v7241_v48, %s9261_s14  ;;  %3073 = vrot.lane.b32.xlu0 %v7212_v63, %s9149_s25 }
 0x78d   : > { %v7752_v60 = vpop.permute.xlu1 %3015  ;;  %v7754_v35 = vpop.permute.xlu0 %3567 }
 0x78e   : > { %9324 = vst [vmem:[#allocation267_spill] sm:$0xff] %v7754_v35 }
 0x78f   : > { %3617 = vrot.lane.b32.xlu1 %v6948_v8, %s9068_s24  ;;  %3165 = vrot.lane.b32.xlu0 %v6904_v1, %s9293_s17 }
 0x791   : > { %v7760_v34 = vpop.permute.xlu1 %3471  ;;  %v7762_v27 = vpop.permute.xlu0 %3043 }
 0x792   : > { %9325 = vst [vmem:[#allocation268_spill] sm:$0xff] %v7760_v34  ;;  %9326 = vst [vmem:[#allocation269_spill] sm:$0xff] %v7762_v27 }
 0x793   : > { %3001 = vrot.lane.b32.xlu1 %v7125_v38, %s9236_s22  ;;  %3529 = vrot.lane.b32.xlu0 %v6734_v5, %s9261_s14 }
 0x795   : > { %v7768_v33 = vpop.permute.xlu1 %3039  ;;  %v7770_v31 = vpop.permute.xlu0 %3135 }
 0x797   : > { %3093 = vrot.lane.b32.xlu1 %v6945_v25, %s9270_s0  ;;  %3621 = vrot.lane.b32.xlu0 %v7315_v57, %s9068_s24 }
 0x799   : > { %v7776_v35 = vpop.permute.xlu1 %3403  ;;  %v7778_v34 = vpop.permute.xlu0 %3407 }
 0x79a   : > { %9327 = vst [vmem:[#allocation270_spill] sm:$0xff] %v7776_v35  ;;  %9328 = vst [vmem:[#allocation271_spill] sm:$0xff] %v7778_v34 }
 0x79b   : > { %3185 = vrot.lane.b32.xlu1 %v6929_v43, %s9197_s23  ;;  %3005 = vrot.lane.b32.xlu0 %v6749_v4, %s9236_s22 }
 0x79d   : > { %v7784_v27 = vpop.permute.xlu1 %3495  ;;  %v7786_v22 = vpop.permute.xlu0 %3499 }
 0x79e   : > { %9329 = vst [vmem:[#allocation272_spill] sm:$0xff] %v7784_v27  ;;  %9330 = vst [vmem:[#allocation273_spill] sm:$0xff] %v7786_v22 }
 0x79f   : > { %3479 = vrot.lane.b32.xlu1 %v7352_v29, %s9236_s22  ;;  %3097 = vrot.lane.b32.xlu0 %v7241_v48, %s9270_s0 }
 0x7a1   : > { %v7792_v23 = vpop.permute.xlu1 %3063  ;;  %v7794_v35 = vpop.permute.xlu0 %3591 }
 0x7a2   : > { %9331 = vst [vmem:[#allocation274_spill] sm:$0xff] %v7794_v35 }
 0x7a3   : > { %3571 = vrot.lane.b32.xlu1 %v7096_v61, %s9270_s0  ;;  %3189 = vrot.lane.b32.xlu0 %v6948_v8, %s9197_s23 }
 0x7a5   : > { %v7800_v43 = vpop.permute.xlu1 %3405  ;;  %v7802_v34 = vpop.permute.xlu0 %3067 }
 0x7a6   : > { %9332 = vst [vmem:[#allocation275_spill] sm:$0xff] %v7802_v34 }
 0x7a7   : > { %3663 = vrot.lane.b32.xlu1 %v6915_v52, %s9197_s23  ;;  %3575 = vrot.lane.b32.xlu0 %v7458_v12, %s9270_s0 }
 0x7a9   : > { %v7808_v22 = vpop.permute.xlu1 %3497  ;;  %v7810_v27 = vpop.permute.xlu0 %3159 }
 0x7ab   : > { %3047 = vrot.lane.b32.xlu1 %v6987_v39, %s9261_s14  ;;  %3667 = vrot.lane.b32.xlu0 %v7212_v63, %s9197_s23 }
 0x7ad   : > { %v7816_v8 = vpop.permute.xlu1 %3065  ;;  %v7818_v35 = vpop.permute.xlu0 %3409 }
 0x7ae   : > { %9333 = vst [vmem:[#allocation276_spill] sm:$0xff] %v7816_v8 }
 0x7af   : > { %3139 = vrot.lane.b32.xlu1 %v6803_v20, %s9068_s24  ;;  %3051 = vrot.lane.b32.xlu0 %v7352_v29, %s9261_s14 }
 0x7b1   : > { %v7824_v52 = vpop.permute.xlu1 %3337  ;;  %v7826_v34 = vpop.permute.xlu0 %3501 }
 0x7b3   : > { %3503 = vrot.lane.b32.xlu1 %v7389_v58, %s9066_s16  ;;  %3143 = vrot.lane.b32.xlu0 %v7096_v61, %s9068_s24 }
 0x7b5   : > { %v7832_v63 = vpop.permute.xlu1 %3429  ;;  %v7834_v8 = vpop.permute.xlu0 %3593 }
 0x7b6   : > { %9334 = vst [vmem:[#allocation277_spill] sm:$0xff] %v7834_v8 }
 0x7b7   : > { %3595 = vrot.lane.b32.xlu1 %v7125_v38, %s9065_s15  ;;  %3599 = vrot.lane.b32.xlu0 %v6749_v4, %s9065_s15 }
 0x7b9   : > { %v7840_v20 = vpop.permute.xlu1 %3521  ;;  %v7842_v17 = vpop.permute.xlu0 %2999 }
 0x7ba   : > { %9335 = vst [vmem:[#allocation278_spill] sm:$0xff] %v7842_v17 }
 0x7bb   : > { %3049 = vrot.lane.b32.xlu1 %v7183_v53, %s9261_s14  ;;  %3053 = vrot.lane.b32.xlu0 %v6746_v16, %s9261_s14 }
 0x7bd   : > { %v7848_v61 = vpop.permute.xlu1 %2997  ;;  %v7850_v54 = vpop.permute.xlu0 %3091 }
 0x7be   : > { %9336 = vst [vmem:[#allocation279_spill] sm:$0xff] %v7848_v61  ;;  %9337 = vst [vmem:[#allocation280_spill] sm:$0xff] %v7850_v54 }
 0x7bf   : > { %3141 = vrot.lane.b32.xlu1 %v6862_v19, %s9068_s24  ;;  %3145 = vrot.lane.b32.xlu0 %v7278_v59, %s9068_s24 }
 0x7c1   : > { %v7856_v4 = vpop.permute.xlu1 %3089  ;;  %v7858_v8 = vpop.permute.xlu0 %3183 }
 0x7c2   : > { %9338 = vst [vmem:[#allocation281_spill] sm:$0xff] %v7856_v4 }
 0x7c3   : > { %3505 = vrot.lane.b32.xlu1 %v6742_v32, %s9066_s16  ;;  %3077 = vrot.lane.b32.xlu0 %v6742_v32, %s9149_s25 }
 0x7c5   : > { %v7864_v17 = vpop.permute.xlu1 %3361  ;;  %v7866_v61 = vpop.permute.xlu0 %3363 }
 0x7c6   : > { %9339 = vst [vmem:[#allocation282_spill] sm:$0xff] %v7866_v61  ;;  %v3207_v61 = vsel %vm470_vm8, %v6206_v56, %v6550_v18 }
 0x7c7   : > { %3597 = vrot.lane.b32.xlu1 %v6724_v41, %s9065_s15  ;;  %3169 = vrot.lane.b32.xlu0 %v6724_v41, %s9293_s17 }
 0x7c9   : > { %v7872_v19 = vpop.permute.xlu1 %3453  ;;  %v7874_v59 = vpop.permute.xlu0 %3455 }
 0x7ca   : > { %9340 = vst [vmem:[#allocation283_spill] sm:$0xff] %v7874_v59 }
 0x7cb   : > { %3003 = vrot.lane.b32.xlu1 %v6724_v41, %s9236_s22  ;;  %3101 = vrot.lane.b32.xlu0 %v6734_v5, %s9270_s0  ;;  %s5125_s22 = smov [#allocation5]  }
 0x7cc   : > { %s5043_s29 = sshll.u32 %s5125_s22, 4  ;;  %s5044_s29 = int_to_ptr.vmem [resolvable:$false] %s5043_s29 }
 0x7cd   : > { %v7880_v4 = vpop.permute.xlu1 %3021  ;;  %v7882_v54 = vpop.permute.xlu0 %3639 }
 0x7ce   : > { %9341 = vst [vmem:[#allocation284_spill] sm:$0xff] %v7880_v4  ;;  %9342 = vst [vmem:[#allocation285_spill] sm:$0xff] %v7882_v54  ;;  %v3215_v4 = vsel %vm2721_vm15, %v3207_v61, %v6562_v3 }
 0x7cf   : > { %3095 = vrot.lane.b32.xlu1 %v7065_v9, %s9270_s0  ;;  %3193 = vrot.lane.b32.xlu0 %v7315_v57, %s9197_s23  ;;  %v3223_v56 = vsel %vm2730_vm1, %v3215_v4, %v6568_v6 }
 0x7d1   : > { %v7891_v59 = vpop.permute.xlu1 %3477  ;;  %v7893_v41 = vpop.permute.xlu0 %3023 }
 0x7d3   : > { %3187 = vrot.lane.b32.xlu1 %v6859_v36, %s9197_s23  ;;  %3671 = vrot.lane.b32.xlu0 %v6742_v32, %s9197_s23  ;;  %v3231_v36 = vsel %vm2739_vm2, %v3223_v56, %v6574_v44 }
 0x7d4   : > { %v3239_v3 = vsel %vm2748_vm3, %v3231_v36, %v7010_v7 }
 0x7d5   : > { %v7901_v9 = vpop.permute.xlu1 %3569  ;;  %v7903_v54 = vpop.permute.xlu0 %3457  ;;  %v3247_v4 = vsel %vm2757_vm6, %v3239_v3, %v7554_v2 }
 0x7d6   : > { %v3255_v6 = vsel %vm9043_vm7, %v3247_v4, %v7586_v26  ;;  %v3692_v4 = vsel %vm470_vm8, %v7352_v29, %v7824_v52 }
 0x7d7   : > { %3643 = vrot.lane.b32.xlu1 %v7183_v53, %s9293_s17  ;;  %3147 = vrot.lane.b32.xlu0 %v7458_v12, %s9068_s24  ;;  %v3263_v44 = vsel %vm9042_vm9, %v3255_v6, %v7752_v60 }
 0x7d8   : > { %v3271_v2 = vsel %vm9041_vm11, %v3263_v44, %v7768_v33 }
 0x7d9   : > { %v7913_v32 = vpop.permute.xlu1 %3045  ;;  %v7915_v18 = vpop.permute.xlu0 %3641 }
 0x7db   : > { %3027 = vrot.lane.b32.xlu1 %v7315_v57, %s9066_s16  ;;  %3675 = vrot.lane.b32.xlu0 %v6400_v45, %s9197_s23  ;;  %v3279_v57 = vsel %vm2793_vm12, %v3271_v2, %v7792_v23 }
 0x7dc   : > { %v3287_v26 = vsel %vm2802_vm14, %v3279_v57, %v7714_v21 }
 0x7dd   : > { %v7929_v12 = vpop.permute.xlu1 %3137  ;;  %v7931_v7 = vpop.permute.xlu0 %3025  ;;  %v3295_v33 = vsel %vm2811_vm5, %v3287_v26, %v7093_v49 }
 0x7de   : > { %v3303_v21 = vsel %vm2820_vm4, %v3295_v33, %v7770_v31 }
 0x7df   : > { %3645 = vrot.lane.b32.xlu1 %v7352_v29, %s9293_s17  ;;  %3871 = vrot.lane.b32.xlu0 %v6945_v25, %s9062_s20  ;;  %v9345_v29 = vld [vmem:[#allocation138_spill] sm:$0xff] }
 0x7e1   : > { %v7941_v45 = vpop.permute.xlu1 %3339  ;;  %v3482_v60 = vpop.permute.xlu0 %3481 }
 0x7e3   : > { %3029 = vrot.lane.b32.xlu1 %v6737_v0, %s9066_s16  ;;  %3875 = vrot.lane.b32.xlu0 %v7241_v48, %s9062_s20  ;;  %v3311_v48 = vsel %vm2829_vm0, %v3303_v21, %v7810_v27  ;;  %s5045_s16 = scalar_lea.vmem %s5044_s29, 2048 }
 0x7e4   : > { %v3319_v56 = vsel %vm2838_vm10, %v3311_v48, %v7858_v8  ;;  %v9346_v48 = vld [vmem:[#allocation134_spill] sm:$0xff] }
 0x7e5   : > { %v7951_v23 = vpop.permute.xlu1 %3431  ;;  %v7953_v25 = vpop.permute.xlu0 %3573 }
 0x7e7   : > { %3669 = vrot.lane.b32.xlu1 %v7389_v58, %s9197_s23  ;;  %3879 = vrot.lane.b32.xlu0 %v6734_v5, %s9062_s20  ;;  %v3688_v5 = vsel %vm470_vm8, %v6974_v37, %v7602_v50 }
 0x7e8   : > { %v3696_v31 = vsel %vm2721_vm15, %v3688_v5, %v7610_v46 }
 0x7e9   : > { %v7963_v49 = vpop.permute.xlu1 %3523  ;;  %v7965_v61 = vpop.permute.xlu0 %3665  ;;  %v3704_v8 = vsel %vm2730_vm1, %v3696_v31, %v7062_v13 }
 0x7ea   : > { %v3712_v50 = vsel %vm2739_vm2, %v3704_v8, %v7728_v10 }
 0x7eb   : > { %3075 = vrot.lane.b32.xlu1 %v7389_v58, %s9149_s25  ;;  %3815 = vrot.lane.b32.xlu0 %v3319_v56, %s9343_s1  ;;  %v3690_v58 = vsel %vm470_vm8, %v6987_v39, %v7736_v24  ;;  %v3720_v3 = vsel %vm2748_vm3, %v3712_v50, %v7744_v11  ;;  %v3700_v39 = vsel %vm2721_vm15, %v3692_v4, %v7864_v17  ;;  %v9344_v11 = vld [vmem:[#allocation128_spill] sm:$0xff]  ;;  %v9351_v50 = vld [vmem:[#allocation262_spill] sm:$0xff] }
 0x7ec   : > { %v3698_v13 = vsel %vm2721_vm15, %v3690_v58, %v7650_v15  ;;  %v3728_v10 = vsel %vm2757_vm6, %v3720_v3, %v7658_v62  ;;  %v3708_v52 = vsel %vm2730_vm1, %v3700_v39, %v9345_v29  ;;  %v9350_v58 = vld [vmem:[#allocation131_spill] sm:$0xff] }
 0x7ed   : > { %v7977_v27 = vpop.permute.xlu1 %3615  ;;  %v7979_v36 = vpop.permute.xlu0 %3071  ;;  %v3706_v44 = vsel %vm2730_vm1, %v3698_v13, %v9344_v11  ;;  %v3736_v17 = vsel %vm9043_vm7, %v3728_v10, %v7674_v28  ;;  %v3716_v33 = vsel %vm2739_vm2, %v3708_v52, %v7818_v35  ;;  %v3687_v35 = vsel %vm470_vm8, %v6873_v30, %v7704_v40  ;;  %v9352_v13 = vld [vmem:[#allocation277_spill] sm:$0xff] }
 0x7ee   : > { %v3714_v15 = vsel %vm2739_vm2, %v3706_v44, %v7800_v43  ;;  %v3744_v2 = vsel %vm9042_vm9, %v3736_v17, %v7808_v22  ;;  %v9353_v44 = vld [vmem:[#allocation127_spill] sm:$0xff] }
 0x7ef   : > { %3167 = vrot.lane.b32.xlu1 %v7125_v38, %s9293_s17  ;;  %v3722_v62 = vsel %vm2748_vm3, %v3714_v15, %v7832_v63  ;;  %v3752_v21 = vsel %vm9041_vm11, %v3744_v2, %v7840_v20  ;;  %v3212_v20 = vsel %vm470_vm8, %v6904_v1, %v7552_v14  ;;  %v9347_v14 = vld [vmem:[#allocation242_spill] sm:$0xff]  ;;  %v9355_v15 = vld [vmem:[#allocation245_spill] sm:$0xff] }
 0x7f0   : > { %v3730_v57 = vsel %vm2757_vm6, %v3722_v62, %v7872_v19  ;;  %v3220_v30 = vsel %vm2721_vm15, %v3212_v20, %v7584_v47  ;;  %v8091_v62 = vld [vmem:[#allocation3 + $0xd0] sm:$0xff] }
 0x7f1   : > { %v7990_v37 = vpop.permute.xlu1 %3069  ;;  %v7992_v46 = vpop.permute.xlu0 %3163  ;;  %v3738_v28 = vsel %vm9043_vm7, %v3730_v57, %v7891_v59  ;;  %v3695_v59 = vsel %vm2721_vm15, %v3687_v35, %v7712_v51  ;;  %v3228_v51 = vsel %vm2730_vm1, %v3220_v30, %v9347_v14  ;;  %v2347_v2 = vrot.slane %v8091_v62, 5  ;;  %v8094_v57 = vld [vmem:[#allocation3 + $0xd8] sm:$0x3f]  ;;  %v9357_v35 = vld [vmem:[#allocation249_spill] sm:$0xff] }
 0x7f2   : > { %v3703_v47 = vsel %vm2730_vm1, %v3695_v59, %v9350_v58 }
 0x7f3   : > { %3623 = vrot.lane.b32.xlu1 %v6737_v0, %s9068_s24  ;;  %v3711_v3 = vsel %vm2739_vm2, %v3703_v47, %v9351_v50  ;;  %v9364_v47 = vld [vmem:[#allocation211_spill] sm:$0xff]  ;;  %v9365_v50 = vld [vmem:[#allocation104_spill] sm:$0xff] }
 0x7f4   : > { %v3719_v17 = vsel %vm2748_vm3, %v3711_v3, %v9355_v15  ;;  %v3211_v3 = vsel %vm470_vm8, %v9365_v50, %v9364_v47  ;;  %v9369_v15 = vld [vmem:[#allocation229_spill] sm:$0xff]  ;;  %v9378_v47 = vld [vmem:[#allocation271_spill] sm:$0xff] }
 0x7f5   : > { %v8007_v24 = vpop.permute.xlu1 %3161  ;;  %v8009_v6 = vpop.permute.xlu0 %3527  ;;  %v3727_v20 = vsel %vm2757_vm6, %v3719_v17, %v9357_v35 }
 0x7f7   : > { %3099 = vrot.lane.b32.xlu1 %v6716_v55, %s9270_s0  ;;  %s9374_s0 = smov 64  }
 0x7f9   : > { %v3434_v26 = vpop.permute.xlu1 %3433  ;;  %v8029_v43 = vpop.permute.xlu0 %3619 }
 0x7fa   : > { %v3724_v63 = vsel %vm2748_vm3, %v3716_v33, %v3434_v26  ;;  %v2348_v26 = vrot.slane %v8094_v57, 5 }
 0x7fb   : > { %v3732_v22 = vsel %vm2757_vm6, %v3724_v63, %v7903_v54  ;;  %3191 = vrot.lane.b32.xlu1 %v7154_v42, %s9197_s23  ;;  %v3760_v54 = vsel %vm2793_vm12, %v3752_v21, %v9346_v48  ;;  %v3746_v42 = vsel %vm9042_vm9, %v3738_v28, %v7826_v34  ;;  %v9349_v34 = vld [vmem:[#allocation250_spill] sm:$0xff]  ;;  %v9356_v21 = vld [vmem:[#allocation255_spill] sm:$0xff]  ;;  %v9358_v48 = vld [vmem:[#allocation268_spill] sm:$0xff] }
 0x7fc   : > { %v8044_v19 = vsel %vm9043_vm7, %v3732_v22, %v3482_v60  ;;  %v3768_v40 = vsel %vm2802_vm14, %v3760_v54, %v7901_v9  ;;  %v9348_v60 = vld [vmem:[#allocation139_spill] sm:$0xff]  ;;  %v3236_v8 = vsel %vm2739_vm2, %v3228_v51, %v9349_v34  ;;  %v2349_v54 = vsel %vm2168_vm13, %v2347_v2, %v2348_v26  ;;  %v9361_v51 = vld [vmem:[#allocation130_spill] sm:$0xff] }
 0x7fd   : > { %v3526_v56 = vpop.permute.xlu1 %3525  ;;  %v8055_v5 = vpop.permute.xlu0 %3073  ;;  %v3776_v39 = vsel %vm2811_vm5, %v3768_v40, %v9352_v13  ;;  %v3244_v29 = vsel %vm2748_vm3, %v3236_v8, %v9353_v44  ;;  %v9363_v8 = vld [vmem:[#allocation267_spill] sm:$0xff]  ;;  %vm9483_vm13 = vcmask 1041408  }
 0x7fe   : > { %v3754_v1 = vsel %vm9041_vm11, %v3746_v42, %v3526_v56  ;;  %v9359_v56 = vld [vmem:[#allocation272_spill] sm:$0xff] }
 0x7ff   : > { %v3762_v31 = vsel %vm2793_vm12, %v3754_v1, %v9348_v60  ;;  %3647 = vrot.lane.b32.xlu1 %v6746_v16, %s9293_s17  ;;  %v9360_v1 = vld [vmem:[#allocation261_spill] sm:$0xff]  ;;  %v9362_v60 = vld [vmem:[#allocation20_spill] sm:$0xff] }
 0x800   : > { %v8074_v9 = vsel %vm2802_vm14, %v3762_v31, %v7953_v25  ;;  %v9354_v25 = vld [vmem:[#allocation102_spill] sm:$0xff] }
 0x801   : > { %v3618_v4 = vpop.permute.xlu1 %3617  ;;  %v8080_v10 = vpop.permute.xlu0 %3165 }
 0x802   : > { %v3784_v11 = vsel %vm2820_vm4, %v3776_v39, %v3618_v4  ;;  %v9366_v4 = vld [vmem:[#allocation217_spill] sm:$0xff]  ;;  %v9367_v39 = vld [vmem:[#allocation274_spill] sm:$0xff] }
 0x803   : > { %v3792_v52 = vsel %vm2829_vm0, %v3784_v11, %v7915_v18  ;;  %3171 = vrot.lane.b32.xlu1 %v9354_v25, %s9293_s17  ;;  %v3252_v18 = vsel %vm2757_vm6, %v3244_v29, %v9356_v21  ;;  %v3219_v13 = vsel %vm2721_vm15, %v3211_v3, %v9366_v4  ;;  %v9368_v29 = vld [vmem:[#allocation223_spill] sm:$0xff]  ;;  %v9370_v21 = vld [vmem:[#allocation285_spill] sm:$0xff] }
 0x804   : > { %v8099_v33 = vsel %vm2838_vm10, %v3792_v52, %v7965_v61  ;;  %v3735_v61 = vsel %vm9043_vm7, %v3727_v20, %v9358_v48  ;;  %v3227_v52 = vsel %vm2730_vm1, %v3219_v13, %v9368_v29  ;;  %v9372_v20 = vld [vmem:[#allocation235_spill] sm:$0xff]  ;;  %v9380_v13 = vld [vmem:[#allocation106_spill] sm:$0xff] }
 0x805   : > { %v3002_v28 = vpop.permute.xlu1 %3001  ;;  %v8103_v63 = vpop.permute.xlu0 %3529  ;;  %v3743_v42 = vsel %vm9042_vm9, %v3735_v61, %v9359_v56  ;;  %v3235_v17 = vsel %vm2739_vm2, %v3227_v52, %v9369_v15  ;;  %v9373_v61 = vld [vmem:[#allocation258_spill] sm:$0xff]  ;;  %v9383_v15 = vld [vmem:[#allocation283_spill] sm:$0xff] }
 0x806   : > { %v3260_v22 = vsel %vm9043_vm7, %v3252_v18, %v3002_v28  ;;  %v3751_v14 = vsel %vm9041_vm11, %v3743_v42, %v9360_v1  ;;  %v9371_v28 = vld [vmem:[#allocation122_spill] sm:$0xff] }
 0x807   : > { %3195 = vrot.lane.b32.xlu1 %v6737_v0, %s9197_s23  ;;  %v3268_v59 = vsel %vm9042_vm9, %v3260_v22, %v7931_v7  ;;  %v3759_v7 = vsel %vm2793_vm12, %v3751_v14, %v9361_v51  ;;  %v3243_v22 = vsel %vm2748_vm3, %v3235_v17, %v9371_v28  ;;  %v9376_v42 = vld [vmem:[#allocation278_spill] sm:$0xff] }
 0x808   : > { %v3767_v58 = vsel %vm2802_vm14, %v3759_v7, %v9363_v8  ;;  %v3251_v48 = vsel %vm2757_vm6, %v3243_v22, %v9372_v20  ;;  %v9377_v8 = vld [vmem:[#allocation133_spill] sm:$0xff] }
 0x809   : > { %v3094_v30 = vpop.permute.xlu1 %3093  ;;  %v8117_v40 = vpop.permute.xlu0 %3621  ;;  %v3775_v11 = vsel %vm2811_vm5, %v3767_v58, %v9367_v39  ;;  %v3259_v1 = vsel %vm9043_vm7, %v3251_v48, %v9376_v42  ;;  %v9386_v48 = vld [vmem:[#allocation254_spill] sm:$0xff] }
 0x80a   : > { %v3783_v25 = vsel %vm2820_vm4, %v3775_v11, %v7977_v27  ;;  %v3691_v27 = vsel %vm470_vm8, %v7183_v53, %v9373_v61  ;;  %v3267_v14 = vsel %vm9042_vm9, %v3259_v1, %v7893_v41  ;;  %v9379_v41 = vld [vmem:[#allocation230_spill] sm:$0xff]  ;;  %v9381_v11 = vld [vmem:[#allocation236_spill] sm:$0xff] }
 0x80b   : > { %3677 = vrot.lane.b32.xlu1 %v2349_v54, %s9197_s23  ;;  %v3791_v18 = vsel %vm2829_vm0, %v3783_v25, %v9370_v21  ;;  %v9375_v54 = vld [vmem:[#allocation263_spill] sm:$0xff]  ;;  %v3210_v39 = vsel %vm470_vm8, %v9380_v13, %v9379_v41  ;;  %v9382_v25 = vld [vmem:[#allocation241_spill] sm:$0xff]  ;;  %v9388_v1 = vld [vmem:[#allocation284_spill] sm:$0xff] }
 0x80c   : > { %v3699_v56 = vsel %vm2721_vm15, %v3691_v27, %v9375_v54  ;;  %v3218_v29 = vsel %vm2721_vm15, %v3210_v39, %v9381_v11  ;;  %v9391_v13 = vld [vmem:[#allocation247_spill] sm:$0xff]  ;;  %v9392_v11 = vld [vmem:[#allocation141_spill] sm:$0xff] }
 0x80d   : > { %v8122_v0 = vpop.permute.xlu1 %3185  ;;  %v8128_v31 = vpop.permute.xlu0 %3005  ;;  %v3707_v58 = vsel %vm2730_vm1, %v3699_v56, %v9377_v8  ;;  %v9387_v56 = vld [vmem:[#allocation279_spill] sm:$0xff] }
 0x80e   : > { %v3715_v50 = vsel %vm2739_vm2, %v3707_v58, %v9378_v47  ;;  %v9389_v58 = vld [vmem:[#allocation243_spill] sm:$0xff] }
 0x80f   : > { %3881 = vrot.lane.b32.xlu1 %v9362_v60, %s9062_s20  ;;  %v3723_v3 = vsel %vm2748_vm3, %v3715_v50, %v7951_v23  ;;  %v9390_v47 = vld [vmem:[#allocation107_spill] sm:$0xff] }
 0x810   : > { %v3731_v17 = vsel %vm2757_vm6, %v3723_v3, %v9383_v15  ;;  %v3689_v50 = vsel %vm470_vm8, %v9390_v47, %v9389_v58  ;;  %v9395_v15 = vld [vmem:[#allocation215_spill] sm:$0xff]  ;;  %v9404_v47 = vld [vmem:[#allocation264_spill] sm:$0xff] }
 0x811   : > { %v3480_v34 = vpop.permute.xlu1 %3479  ;;  %v3098_v2 = vpop.permute.xlu0 %3097 }
 0x812   : > { %v3739_v21 = vsel %vm9043_vm7, %v3731_v17, %v3480_v34 }
 0x815   : > { %v8139_v44 = vpop.permute.xlu1 %3571  ;;  %v3190_v51 = vpop.permute.xlu0 %3189 }
 0x819   : > { %v3664_v26 = vpop.permute.xlu1 %3663  ;;  %v8182_v52 = vpop.permute.xlu0 %3575 }
 0x81a   : > { %v3799_v35 = vsel %vm2838_vm10, %v3791_v18, %v3664_v26  ;;  %v9384_v26 = vld [vmem:[#allocation248_spill] sm:$0xff] }
 0x81b   : > { %3847 = vrot.lane.b32.xlu0 %v3799_v35, %s9374_s0  ;;  %v9385_v35 = vld [vmem:[#allocation125_spill] sm:$0xff] }
 0x81d   : > { %v3048_v7 = vpop.permute.xlu1 %3047  ;;  %v3668_v27 = vpop.permute.xlu0 %3667 }
 0x81e   : > { %v3275_v60 = vsel %vm9041_vm11, %v3267_v14, %v3048_v7 }
 0x81f   : > { %v8169_v53 = vsel %vm2793_vm12, %v3275_v60, %v7979_v36  ;;  %v3226_v36 = vsel %vm2730_vm1, %v3218_v29, %v9382_v25  ;;  %v9394_v29 = vld [vmem:[#allocation103_spill] sm:$0xff] }
 0x820   : > { %v3234_v23 = vsel %vm2739_vm2, %v3226_v36, %v9384_v26 }
 0x821   : > { %v8175_v4 = vpop.permute.xlu1 %3139  ;;  %v3242_v20 = vsel %vm2748_vm3, %v3234_v23, %v9385_v35  ;;  %v8213_v3 = vpop.permute.xlu0 %3051  ;;  %v9397_v23 = vld [vmem:[#allocation221_spill] sm:$0xff] }
 0x822   : > { %v3250_v61 = vsel %vm2757_vm6, %v3242_v20, %v9386_v48  ;;  %v9399_v20 = vld [vmem:[#allocation227_spill] sm:$0xff] }
 0x823   : > { %v3258_v42 = vsel %vm9043_vm7, %v3250_v61, %v9387_v56 }
 0x824   : > { %v3266_v34 = vsel %vm9042_vm9, %v3258_v42, %v9388_v1  ;;  %v9400_v1 = vld [vmem:[#allocation260_spill] sm:$0xff] }
 0x825   : > { %v3504_v18 = vpop.permute.xlu1 %3503  ;;  %v3274_v14 = vsel %vm9041_vm11, %v3266_v34, %v7913_v32  ;;  %v3697_v32 = vsel %vm2721_vm15, %v3689_v50, %v9391_v13  ;;  %v8243_v61 = vpop.permute.xlu0 %3143 }
 0x826   : > { %v3747_v28 = vsel %vm9042_vm9, %v3739_v21, %v3504_v18  ;;  %v9398_v18 = vld [vmem:[#allocation270_spill] sm:$0xff] }
 0x827   : > { %v8194_v22 = vsel %vm9041_vm11, %v3747_v28, %v8009_v6  ;;  %v3282_v6 = vsel %vm2793_vm12, %v3274_v14, %v7990_v37  ;;  %v9401_v14 = vld [vmem:[#allocation120_spill] sm:$0xff] }
 0x828   : > { %v3290_v60 = vsel %vm2802_vm14, %v3282_v6, %v3094_v30  ;;  %v9402_v6 = vld [vmem:[#allocation233_spill] sm:$0xff] }
 0x829   : > { %v3596_v54 = vpop.permute.xlu1 %3595  ;;  %v3298_v30 = vsel %vm2811_vm5, %v3290_v60, %v9392_v11  ;;  %v8265_v13 = vpop.permute.xlu0 %3599 }
 0x82d   : > { %v3050_v7 = vpop.permute.xlu1 %3049 }
 0x82e   : > { %v3276_v8 = vsel %vm9041_vm11, %v3268_v59, %v3050_v7  ;;  %v9393_v59 = vld [vmem:[#allocation209_spill] sm:$0xff] }
 0x82f   : > { %v3284_v41 = vsel %vm2793_vm12, %v3276_v8, %v8055_v5  ;;  %v3209_v25 = vsel %vm470_vm8, %v9394_v29, %v9393_v59  ;;  %v9396_v5 = vld [vmem:[#allocation132_spill] sm:$0xff]  ;;  %v9403_v8 = vld [vmem:[#allocation239_spill] sm:$0xff] }
 0x830   : > { %v8220_v39 = vsel %vm2802_vm14, %v3284_v41, %v3098_v2  ;;  %v3217_v17 = vsel %vm2721_vm15, %v3209_v25, %v9395_v15  ;;  %v3705_v26 = vsel %vm2730_vm1, %v3697_v32, %v9396_v5  ;;  %v9405_v41 = vld [vmem:[#allocation265_spill] sm:$0xff]  ;;  %v9408_v29 = vld [vmem:[#allocation275_spill] sm:$0xff] }
 0x831   : > { %v3142_v37 = vpop.permute.xlu1 %3141  ;;  %v3225_v21 = vsel %vm2730_vm1, %v3217_v17, %v9397_v23  ;;  %v3713_v28 = vsel %vm2739_vm2, %v3705_v26, %v9398_v18  ;;  %v9410_v17 = vld [vmem:[#allocation273_spill] sm:$0xff]  ;;  %v3054_v23 = vpop.permute.xlu0 %3053 }
 0x832   : > { %v3306_v36 = vsel %vm2820_vm4, %v3298_v30, %v3142_v37  ;;  %v3233_v48 = vsel %vm2739_vm2, %v3225_v21, %v9399_v20  ;;  %v9406_v37 = vld [vmem:[#allocation269_spill] sm:$0xff]  ;;  %v9407_v30 = vld [vmem:[#allocation266_spill] sm:$0xff] }
 0x833   : > { %v3314_v2 = vsel %vm2829_vm0, %v3306_v36, %v8080_v10  ;;  %v3721_v10 = vsel %vm2748_vm3, %v3713_v28, %v9400_v1  ;;  %v9411_v26 = vld [vmem:[#allocation137_spill] sm:$0xff]  ;;  %v9412_v28 = vld [vmem:[#allocation135_spill] sm:$0xff] }
 0x834   : > { %v8239_v35 = vsel %vm2838_vm10, %v3314_v2, %v3190_v51  ;;  %v3241_v51 = vsel %vm2748_vm3, %v3233_v48, %v9401_v14 }
 0x835   : > { %v3506_v56 = vpop.permute.xlu1 %3505  ;;  %v3249_v7 = vsel %vm2757_vm6, %v3241_v51, %v9402_v6  ;;  %v9413_v6 = vld [vmem:[#allocation232_spill] sm:$0xff] }
 0x836   : > { %v3748_v42 = vsel %vm9042_vm9, %v8044_v19, %v3506_v56  ;;  %v3257_v58 = vsel %vm9043_vm7, %v3249_v7, %v9403_v8  ;;  %v3729_v19 = vsel %vm2757_vm6, %v3721_v10, %v9404_v47  ;;  %v8295_v10 = vpop.permute.xlu0 %3145  ;;  %v9415_v8 = vld [vmem:[#allocation238_spill] sm:$0xff]  ;;  %v9416_v47 = vld [vmem:[#allocation244_spill] sm:$0xff] }
 0x837   : > { %v8251_v34 = vsel %vm9041_vm11, %v3748_v42, %v8103_v63  ;;  %v3265_v63 = vsel %vm9042_vm9, %v3257_v58, %v9405_v41  ;;  %v3737_v59 = vsel %vm9043_vm7, %v3729_v19, %v9407_v30  ;;  %v9417_v19 = vld [vmem:[#allocation251_spill] sm:$0xff]  ;;  %v9419_v30 = vld [vmem:[#allocation257_spill] sm:$0xff] }
 0x838   : > { %v3273_v11 = vsel %vm9041_vm11, %v3265_v63, %v9406_v37  ;;  %v3745_v5 = vsel %vm9042_vm9, %v3737_v59, %v9410_v17  ;;  %v9418_v63 = vld [vmem:[#allocation129_spill] sm:$0xff] }
 0x839   : > { %v3598_v60 = vpop.permute.xlu1 %3597  ;;  %v3281_v25 = vsel %vm2793_vm12, %v3273_v11, %v9408_v29  ;;  %v9420_v29 = vld [vmem:[#allocation65_spill] sm:$0xff] }
 0x83a   : > { %v3778_v50 = vsel %vm2811_vm5, %v8074_v9, %v3598_v60  ;;  %v9409_v9 = vld [vmem:[#allocation280_spill] sm:$0xff]  ;;  %v8306_v7 = vpop.permute.xlu0 %3077 }
 0x83b   : > { %v3786_v32 = vsel %vm2820_vm4, %v3778_v50, %v8117_v40  ;;  %v3289_v15 = vsel %vm2802_vm14, %v3281_v25, %v9409_v9  ;;  %v3753_v40 = vsel %vm9041_vm11, %v3745_v5, %v7963_v49  ;;  %v9421_v25 = vld [vmem:[#allocation21_spill] sm:$0xff] }
 0x83c   : > { %v3297_v2 = vsel %vm2811_vm5, %v3289_v15, %v9411_v26  ;;  %v3761_v20 = vsel %vm2793_vm12, %v3753_v40, %v9412_v28  ;;  %v3694_v9 = vsel %vm470_vm8, %v9421_v25, %v9420_v29  ;;  %v9422_v26 = vld [vmem:[#allocation68_spill] sm:$0xff]  ;;  %v9435_v29 = vld [vmem:[#allocation71_spill] sm:$0xff] }
 0x83d   : > { %v8275_v36 = vpop.permute.xlu1 %3003  ;;  %v3305_v18 = vsel %vm2820_vm4, %v3297_v2, %v8175_v4  ;;  %v3769_v48 = vsel %vm2802_vm14, %v3761_v20, %v8139_v44  ;;  %v3702_v2 = vsel %vm2721_vm15, %v3694_v9, %v9422_v26 }
 0x83e   : > { %v3313_v42 = vsel %vm2829_vm0, %v3305_v18, %v7992_v46  ;;  %v3777_v49 = vsel %vm2811_vm5, %v3769_v48, %v3596_v54  ;;  %v9414_v46 = vld [vmem:[#allocation101_spill] sm:$0xff]  ;;  %v8321_v11 = vpop.permute.xlu0 %3169  ;;  %v9423_v18 = vld [vmem:[#allocation282_spill] sm:$0xff] }
 0x83f   : > { %v3785_v4 = vsel %vm2820_vm4, %v3777_v49, %v8029_v43  ;;  %v3214_v54 = vsel %vm470_vm8, %v9414_v46, %v9413_v6  ;;  %v9426_v49 = vld [vmem:[#allocation69_spill] sm:$0xff]  ;;  %v9429_v46 = vld [vmem:[#allocation74_spill] sm:$0xff] }
 0x840   : > { %v3222_v58 = vsel %vm2721_vm15, %v3214_v54, %v9415_v8 }
 0x841   : > { %v3096_v21 = vpop.permute.xlu1 %3095  ;;  %v3230_v43 = vsel %vm2730_vm1, %v3222_v58, %v9416_v47  ;;  %v9430_v58 = vld [vmem:[#allocation72_spill] sm:$0xff] }
 0x842   : > { %v3238_v50 = vsel %vm2739_vm2, %v3230_v43, %v9417_v19  ;;  %v8341_v20 = vpop.permute.xlu0 %3101  ;;  %v9431_v43 = vld [vmem:[#allocation24_spill] sm:$0xff] }
 0x843   : > { %v3246_v37 = vsel %vm2748_vm3, %v3238_v50, %v9418_v63  ;;  %v9432_v50 = vld [vmem:[#allocation73_spill] sm:$0xff] }
 0x844   : > { %v3254_v59 = vsel %vm2757_vm6, %v3246_v37, %v9419_v30  ;;  %v9433_v63 = vld [vmem:[#allocation213_spill] sm:$0xff]  ;;  %v9434_v30 = vld [vmem:[#allocation219_spill] sm:$0xff] }
 0x845   : > { %v3188_v56 = vpop.permute.xlu1 %3187  ;;  %v3262_v15 = vsel %vm9043_vm7, %v3254_v59, %v8128_v31  ;;  %v9424_v31 = vld [vmem:[#allocation70_spill] sm:$0xff]  ;;  %v3213_v37 = vsel %vm470_vm8, %v7125_v38, %v9433_v63 }
 0x846   : > { %v3321_v1 = vsel %vm2838_vm10, %v3313_v42, %v3188_v56  ;;  %v3710_v56 = vsel %vm2730_vm1, %v3702_v2, %v9424_v31  ;;  %v9425_v42 = vld [vmem:[#allocation66_spill] sm:$0xff]  ;;  %v3221_v59 = vsel %vm2721_vm15, %v3213_v37, %v9434_v30  ;;  %v3291_v2 = vsel %vm2802_vm14, %v8169_v53, %v3096_v21 }
 0x847   : > { %3819 = vrot.lane.b32.xlu0 %v3321_v1, %s9343_s1  ;;  %v9427_v1 = vld [vmem:[#allocation67_spill] sm:$0xff]  ;;  %v9442_v21 = vld [vmem:[#allocation142_spill] sm:$0xff] }
 0x848   : > { %v9448_v37 = vld [vmem:[#allocation30_spill] sm:$0xff] }
 0x849   : > { %v3644_v14 = vpop.permute.xlu1 %3643 }
 0x84a   : > { %v3793_v51 = vsel %vm2829_vm0, %v3785_v4, %v3644_v14  ;;  %v8353_v4 = vpop.permute.xlu0 %3193 }
 0x84b   : > { %v3801_v44 = vsel %vm2838_vm10, %v3793_v51, %v3668_v27  ;;  %v5031_v51 = vld [vmem:[#allocation3] sm:$0xff] }
 0x84c   : > { %3851 = vrot.lane.b32.xlu0 %v3801_v44, %s9374_s0  ;;  %v9428_v44 = vld [vmem:[#allocation31_spill] sm:$0xff] }
 0x84d   : > { %v8308_v60 = vpop.permute.xlu1 %3027  ;;  %v2713_v6 = vsel %vm470_vm8, %v5031_v51, %v9428_v44  ;;  %v9443_v44 = vld [vmem:[#allocation80_spill] sm:$0xff] }
 0x84e   : > { %v2722_v19 = vsel %vm2721_vm15, %v2713_v6, %v9431_v43  ;;  %v3672_v9 = vpop.permute.xlu0 %3671  ;;  %v9446_v43 = vld [vmem:[#allocation237_spill] sm:$0xff] }
 0x851   : > { %v3646_v27 = vpop.permute.xlu1 %3645 }
 0x852   : > { %v8317_v41 = vsel %vm2829_vm0, %v3786_v32, %v3646_v27  ;;  %v3693_v32 = vsel %vm470_vm8, %v6746_v16, %v7941_v45 }
 0x853   : > { %v3701_v28 = vsel %vm2721_vm15, %v3693_v32, %v9423_v18  ;;  %v9438_v18 = vld [vmem:[#allocation77_spill] sm:$0xff] }
 0x854   : > { %v3709_v16 = vsel %vm2730_vm1, %v3701_v28, %v9425_v42  ;;  %v9439_v28 = vld [vmem:[#allocation231_spill] sm:$0xff]  ;;  %v3920_v42 = vld [vmem:[%s8969_s11 + $0x8] sm:$0xff] }
 0x855   : > { %v3030_v17 = vpop.permute.xlu1 %3029  ;;  %v3717_v14 = vsel %vm2739_vm2, %v3709_v16, %v9427_v1  ;;  %v9440_v16 = vld [vmem:[#allocation76_spill] sm:$0xff] }
 0x856   : > { %v3270_v5 = vsel %vm9042_vm9, %v3262_v15, %v3030_v17  ;;  %v3725_v47 = vsel %vm2748_vm3, %v3717_v14, %v9430_v58  ;;  %v9436_v17 = vld [vmem:[#allocation26_spill] sm:$0xff]  ;;  %v9441_v1 = vld [vmem:[#allocation28_spill] sm:$0xff]  ;;  %v3299_v14 = vsel %vm2811_vm5, %v3291_v2, %v9442_v21  ;;  %v9450_v2 = vld [vmem:[#allocation81_spill] sm:$0xff] }
 0x857   : > { %v8335_v40 = vsel %vm9041_vm11, %v3270_v5, %v3054_v23  ;;  %v3718_v23 = vsel %vm2739_vm2, %v3710_v56, %v9426_v49  ;;  %v3733_v25 = vsel %vm2757_vm6, %v3725_v47, %v9435_v29  ;;  %v2731_v32 = vsel %vm2730_vm1, %v2722_v19, %v9436_v17  ;;  %v9437_v5 = vld [vmem:[#allocation225_spill] sm:$0xff]  ;;  %v3919_v56 = vld [vmem:[%s8969_s11] sm:$0xff] }
 0x858   : > { %v3726_v54 = vsel %vm2748_vm3, %v3718_v23, %v9429_v46  ;;  %v3229_v26 = vsel %vm2730_vm1, %v3221_v59, %v9437_v5  ;;  %v3741_v49 = vsel %vm9043_vm7, %v3733_v25, %v9440_v16  ;;  %v4664_v23 = vpack.c.bf16 %v3920_v42, %v3919_v56  ;;  %v9444_v46 = vld [vmem:[#allocation124_spill] sm:$0xff]  ;;  %v9453_v16 = vld [vmem:[#allocation83_spill] sm:$0xff] }
 0x859   : > { %v8343_v48 = vpop.permute.xlu1 %3669  ;;  %v3734_v27 = vsel %vm2757_vm6, %v3726_v54, %v9432_v50  ;;  %v3237_v31 = vsel %vm2739_vm2, %v3229_v26, %v9439_v28  ;;  %v2740_v53 = vsel %vm2739_vm2, %v2731_v32, %v9441_v1  ;;  %v9445_v58 = vld [vmem:[#allocation140_spill] sm:$0xff]  ;;  %v3148_v50 = vpop.permute.xlu0 %3147  ;;  %v3307_v29 = vsel %vm2820_vm4, %v3299_v14, %v8243_v61  ;;  %v3921_v61 = vld [vmem:[%s8969_s11 + $0x10] sm:$0xff]  ;;  %v9452_v28 = vld [vmem:[#allocation85_spill] sm:$0xff] }
 0x85a   : > { %v3742_v38 = vsel %vm9043_vm7, %v3734_v27, %v9438_v18  ;;  %v3245_v54 = vsel %vm2748_vm3, %v3237_v31, %v9444_v46  ;;  %v3763_v47 = vsel %vm2793_vm12, %v8194_v22, %v9445_v58  ;;  %4665 = vmatprep.subr.bf16.mxu0 %v4664_v23  ;;  %v9447_v27 = vld [vmem:[#allocation78_spill] sm:$0xff]  ;;  %v2749_v30 = vsel %vm2748_vm3, %v2740_v53, %v9448_v37  ;;  %v9449_v25 = vld [vmem:[#allocation84_spill] sm:$0xff]  ;;  %v9455_v46 = vld [vmem:[#allocation91_spill] sm:$0xff] }
 0x85b   : > { %v3750_v6 = vsel %vm9042_vm9, %v3742_v38, %v9443_v44  ;;  %v3253_v19 = vsel %vm2757_vm6, %v3245_v54, %v9446_v43  ;;  %v3749_v63 = vsel %vm9042_vm9, %v3741_v49, %v9447_v27  ;;  %4667 = vmatpush3.bf16.msra.mxu0 %v4664_v23  ;;  %v3771_v17 = vsel %vm2802_vm14, %v3763_v47, %v8182_v52  ;;  %v3922_v38 = vld [vmem:[%s8969_s11 + $0x18] sm:$0xff]  ;;  %v9456_v58 = vld [vmem:[#allocation228_spill] sm:$0xff]  ;;  %v9457_v47 = vld [vmem:[#allocation105_spill] sm:$0xff] }
 0x85c   : > { %v3261_v59 = vsel %vm9043_vm7, %v3253_v19, %v8275_v36  ;;  %v3758_v22 = vsel %vm9041_vm11, %v3750_v6, %v9449_v25  ;;  %v3757_v18 = vsel %vm9041_vm11, %v3749_v63, %v9450_v2  ;;  %v4668_v52 = vpack.c.bf16 %v3922_v38, %v3921_v61  ;;  %v9454_v6 = vld [vmem:[#allocation38_spill] sm:$0xff]  ;;  %v9458_v19 = vld [vmem:[#allocation88_spill] sm:$0xff]  ;;  %v3926_v2 = vld [vmem:[%s8969_s11 + $0x38] sm:$0xff] }
 0x85d   : > { %v3076_v45 = vpop.permute.xlu1 %3075  ;;  %v3269_v32 = vsel %vm9042_vm9, %v3261_v59, %v8308_v60  ;;  %v9451_v60 = vld [vmem:[#allocation34_spill] sm:$0xff]  ;;  %v3766_v31 = vsel %vm2793_vm12, %v3758_v22, %v9452_v28  ;;  %v3779_v56 = vsel %vm2811_vm5, %v3771_v17, %v8265_v13  ;;  %v3765_v49 = vsel %vm2793_vm12, %v3757_v18, %v9453_v16  ;;  %v3676_v23 = vpop.permute.xlu0 %3675  ;;  %v3923_v13 = vld [vmem:[%s8969_s11 + $0x20] sm:$0xff] }
 0x85e   : > { %v3277_v42 = vsel %vm9041_vm11, %v3269_v32, %v8213_v3  ;;  %4669 = vmatprep.subr.bf16.mxu0 %v4668_v52  ;;  %v3924_v3 = vld [vmem:[%s8969_s11 + $0x28] sm:$0xff]  ;;  %v3208_v43 = vsel %vm470_vm8, %v9457_v47, %v9456_v58  ;;  %v3773_v27 = vsel %vm2802_vm14, %v3765_v49, %v9458_v19  ;;  %v9459_v63 = vld [vmem:[#allocation234_spill] sm:$0xff]  ;;  %v9461_v25 = vld [vmem:[#allocation40_spill] sm:$0xff] }
 0x85f   : > { %v3285_v1 = vsel %vm2793_vm12, %v3277_v42, %v3076_v45  ;;  %4671 = vmatpush3.bf16.msra.mxu0 %v4668_v52  ;;  %v3216_v37 = vsel %vm2721_vm15, %v3208_v43, %v9459_v63  ;;  %v9462_v22 = vld [vmem:[#allocation94_spill] sm:$0xff]  ;;  %v9463_v32 = vld [vmem:[#allocation240_spill] sm:$0xff]  ;;  %v9473_v58 = vld [vmem:[#allocation99_spill] sm:$0xff] }
 0x860   : > { %v9464_v18 = vld [vmem:[#allocation246_spill] sm:$0xff]  ;;  %v9474_v43 = vld [vmem:[#allocation97_spill] sm:$0xff] }
 0x861   : > { %v3168_v8 = vpop.permute.xlu1 %3167  ;;  %v9465_v61 = vld [vmem:[#allocation90_spill] sm:$0xff]  ;;  %v8479_v52 = vpop.permute.xlu0 %3871 }
 0x862   : > { %v3315_v5 = vsel %vm2829_vm0, %v3307_v29, %v3168_v8  ;;  %v2758_v8 = vsel %vm2757_vm6, %v2749_v30, %v9451_v60  ;;  %v9460_v30 = vld [vmem:[#allocation146_spill] sm:$0xff]  ;;  %v3781_v38 = vsel %vm2811_vm5, %v3773_v27, %v9465_v61 }
 0x863   : > { %v2767_v45 = vsel %vm9043_vm7, %v2758_v8, %v9454_v6  ;;  %v9466_v28 = vld [vmem:[#allocation42_spill] sm:$0xff]  ;;  %v9470_v6 = vld [vmem:[#allocation252_spill] sm:$0xff] }
 0x865   : > { %v3624_v15 = vpop.permute.xlu1 %3623  ;;  %v8509_v27 = vpop.permute.xlu0 %3875 }
 0x866   : > { %v3787_v53 = vsel %vm2820_vm4, %v3779_v56, %v3624_v15  ;;  %v3774_v15 = vsel %vm2802_vm14, %v3766_v31, %v9455_v46  ;;  %v9467_v56 = vld [vmem:[#allocation98_spill] sm:$0xff]  ;;  %v9471_v46 = vld [vmem:[#allocation259_spill] sm:$0xff] }
 0x867   : > { %v3782_v17 = vsel %vm2811_vm5, %v3774_v15, %v9462_v22 }
 0x868   : > { %v3790_v42 = vsel %vm2820_vm4, %v3782_v17, %v9467_v56  ;;  %v9484_v56 = vld [vmem:[#allocation54_spill] sm:$0xff] }
 0x869   : > { %v3100_v51 = vpop.permute.xlu1 %3099  ;;  %v3798_v47 = vsel %vm2829_vm0, %v3790_v42, %v9473_v58  ;;  %v8531_v61 = vpop.permute.xlu0 %3879 }
 0x86a   : > { %v3293_v14 = vsel %vm2802_vm14, %v3285_v1, %v3100_v51  ;;  %v4672_v51 = vpack.c.bf16 %v3924_v3, %v3923_v13  ;;  %v3927_v1 = vld [vmem:[%s8969_s11 + $0x40] sm:$0xff] }
 0x86b   : > { %v3301_v59 = vsel %vm2811_vm5, %v3293_v14, %v9460_v30  ;;  %v9469_v14 = vld [vmem:[#allocation95_spill] sm:$0xff] }
 0x86c   : > { %4673 = vmatprep.subr.bf16.mxu0 %v4672_v51  ;;  %v3309_v8 = vsel %vm2820_vm4, %v3301_v59, %v3148_v50  ;;  %v3929_v59 = vld [vmem:[%s8969_s11 + $0x50] sm:$0xff] }
 0x86d   : > { %v3192_v26 = vpop.permute.xlu1 %3191  ;;  %4675 = vmatpush3.bf16.msra.mxu0 %v4672_v51 }
 0x86e   : > { %v3323_v36 = vsel %vm2838_vm10, %v3315_v5, %v3192_v26  ;;  %v3224_v5 = vsel %vm2730_vm1, %v3216_v37, %v9463_v32  ;;  %v3925_v26 = vld [vmem:[%s8969_s11 + $0x30] sm:$0xff]  ;;  %v9477_v32 = vld [vmem:[#allocation256_spill] sm:$0xff] }
 0x86f   : > { %3823 = vrot.lane.b32.xlu0 %v3323_v36, %s9343_s1  ;;  %v3232_v36 = vsel %vm2739_vm2, %v3224_v5, %v9464_v18  ;;  %v4676_v60 = vpack.c.bf16 %v3926_v2, %v3925_v26  ;;  %v9478_v26 = vld [vmem:[#allocation48_spill] sm:$0xff] }
 0x870   : > { %v9479_v18 = vld [vmem:[#allocation276_spill] sm:$0xff] }
 0x871   : > { %v3648_v21 = vpop.permute.xlu1 %3647  ;;  %4677 = vmatprep.subr.bf16.mxu0 %v4676_v60 }
 0x872   : > { %v3795_v44 = vsel %vm2829_vm0, %v3787_v53, %v3648_v21  ;;  %v3928_v53 = vld [vmem:[%s8969_s11 + $0x48] sm:$0xff]  ;;  %v9468_v21 = vld [vmem:[#allocation123_spill] sm:$0xff]  ;;  %4679 = vmatpush3.bf16.msra.mxu0 %v4676_v60  ;;  %v9481_v60 = vld [vmem:[#allocation22_spill] sm:$0xff] }
 0x873   : > { %v3803_v54 = vsel %vm2838_vm10, %v3795_v44, %v3672_v9  ;;  %v2776_v9 = vsel %vm9042_vm9, %v2767_v45, %v9461_v25  ;;  %v3240_v50 = vsel %vm2748_vm3, %v3232_v36, %v9468_v21  ;;  %v3789_v44 = vsel %vm2820_vm4, %v3781_v38, %v9469_v14  ;;  %v9475_v25 = vld [vmem:[#allocation253_spill] sm:$0xff]  ;;  %v9480_v38 = vld [vmem:[#allocation126_spill] sm:$0xff]  ;;  %v3816_v14 = vpop.permute.xlu0 %3815 }
 0x874   : > { %3855 = vrot.lane.b32.xlu0 %v3803_v54, %s9374_s0  ;;  %v2785_v31 = vsel %vm9041_vm11, %v2776_v9, %v9466_v28  ;;  %v4680_v3 = vpack.c.bf16 %v3928_v53, %v3927_v1  ;;  %v3248_v45 = vsel %vm2757_vm6, %v3240_v50, %v9470_v6  ;;  %v9472_v54 = vld [vmem:[#allocation44_spill] sm:$0xff]  ;;  %v3797_v19 = vsel %vm2829_vm0, %v3789_v44, %v9474_v43  ;;  %v9482_v28 = vld [vmem:[#allocation281_spill] sm:$0xff]  ;;  %v9487_v53 = vld [vmem:[#allocation59_spill] sm:$0xff] }
 0x875   : > { %v3172_v29 = vpop.permute.xlu1 %3171  ;;  %v3256_v15 = vsel %vm9043_vm7, %v3248_v45, %v9471_v46  ;;  %v2794_v51 = vsel %vm2793_vm12, %v2785_v31, %v9472_v54  ;;  %v3805_v37 = vsel %vm2838_vm10, %v3797_v19, %v3676_v23  ;;  %v9476_v23 = vld [vmem:[#allocation46_spill] sm:$0xff]  ;;  %v9491_v45 = vld [vmem:[#allocation75_spill] sm:$0xff]  ;;  %vm9492_vm7 = vcmask 785408   ;;  %v9497_v43 = vld [vmem:[#allocation89_spill] sm:$0xff] }
 0x876   : > { %v3317_v16 = vsel %vm2829_vm0, %v3309_v8, %v3172_v29  ;;  %4681 = vmatprep.subr.bf16.mxu0 %v4680_v3  ;;  %v3930_v29 = vld [vmem:[%s8969_s11 + $0x58] sm:$0xff]  ;;  %v3264_v9 = vsel %vm9042_vm9, %v3256_v15, %v9475_v25  ;;  %v2803_v17 = vsel %vm2802_vm14, %v2794_v51, %v9476_v23  ;;  %v3931_v8 = vld [vmem:[%s8969_s11 + $0x60] sm:$0x3]  ;;  %vm9490_vm9 = vcmask 523264   ;;  %v5032_v23 = vld [vmem:[#allocation3 + $0x10] sm:$0xff] }
 0x877   : > { %4683 = vmatpush3.bf16.msra.mxu0 %v4680_v3  ;;  %v4684_v22 = vpack.c.bf16 %v3930_v29, %v3929_v59  ;;  %v3272_v5 = vsel %vm9041_vm11, %v3264_v9, %v9477_v32  ;;  %v2812_v2 = vsel %vm2811_vm5, %v2803_v17, %v9478_v26  ;;  %vm9485_vm11 = vmmov %vm9483_vm13  ;;  %v3764_v46 = vsel %vm2793_vm12, %v8251_v34, %v9491_v45  ;;  %v9494_v51 = vld [vmem:[#allocation144_spill] sm:$0xff]  ;;  %v9504_v17 = vld [vmem:[#allocation23_spill] sm:$0xff] }
 0x878   : > { %v3280_v36 = vsel %vm2793_vm12, %v3272_v5, %v9479_v18  ;;  %v2821_v42 = vsel %vm2820_vm4, %v2812_v2, %v9484_v56  ;;  %v3286_v54 = vsel %vm2793_vm12, %v8335_v40, %v8306_v7  ;;  %v3300_v34 = vsel %vm2811_vm5, %v8220_v39, %v9494_v51  ;;  %v9502_v25 = vld [vmem:[#allocation100_spill] sm:$0xff]  ;;  %v9505_v5 = vld [vmem:[#allocation35_spill] sm:$0xff]  ;;  %v9506_v2 = vld [vmem:[#allocation37_spill] sm:$0xff] }
 0x879   : > { %v3196_v49 = vpop.permute.xlu1 %3195  ;;  %4685 = vmatprep.subr.bf16.mxu0 %v4684_v22  ;;  %v3288_v31 = vsel %vm2802_vm14, %v3280_v36, %v9482_v28  ;;  %v2830_v21 = vsel %vm2829_vm0, %v2821_v42, %v9487_v53  ;;  %v3308_v7 = vsel %vm2820_vm4, %v3300_v34, %v8295_v10  ;;  %v2350_v29 = vrot.slane %v8091_v62, 6  ;;  %v9508_v36 = vld [vmem:[#allocation41_spill] sm:$0xff]  ;;  %v5033_v28 = vld [vmem:[#allocation3 + $0x20] sm:$0xff]  ;;  %v9514_v53 = vld [vmem:[#allocation47_spill] sm:$0xff] }
 0x87a   : > { %v3325_v13 = vsel %vm2838_vm10, %v3317_v16, %v3196_v49  ;;  %v9486_v16 = vld [vmem:[#allocation136_spill] sm:$0xff]  ;;  %v3316_v39 = vsel %vm2829_vm0, %v3308_v7, %v8321_v11  ;;  %v2714_v32 = vsel %vm470_vm8, %v5032_v23, %v9504_v17  ;;  %v9511_v42 = vld [vmem:[#allocation45_spill] sm:$0xff]  ;;  %v9534_v17 = vld [vmem:[#allocation155_spill] sm:$0xff] }
 0x87b   : > { %3827 = vrot.lane.b32.xlu0 %v3325_v13, %s9343_s1  ;;  %4687 = vmatpush3.bf16.msra.mxu0 %v4684_v22  ;;  %v3296_v49 = vsel %vm2811_vm5, %v3288_v31, %v9486_v16  ;;  %v9488_v13 = vld [vmem:[#allocation62_spill] sm:$0xff]  ;;  %v9501_v11 = vld [vmem:[#allocation96_spill] sm:$0xff]  ;;  %v2723_v26 = vsel %vm2721_vm15, %v2714_v32, %v9505_v5  ;;  %v9510_v31 = vld [vmem:[#allocation33_spill] sm:$0xff] }
 0x87c   : > { %4564 = vmatprep.subr.msk.mxu0 %vm9483_vm13, %v3931_v8  ;;  %v3304_v1 = vsel %vm2820_vm4, %v3296_v49, %v7929_v12  ;;  %v2839_v3 = vsel %vm2838_vm10, %v2830_v21, %v9488_v13  ;;  %vm3934_vm13 = vcmask 801792   ;;  %v2732_v62 = vsel %vm2730_vm1, %v2723_v26, %v9506_v2  ;;  %v9513_v49 = vld [vmem:[#allocation25_spill] sm:$0xff]  ;;  %v9523_v34 = vld [vmem:[#allocation36_spill] sm:$0xff]  ;;  %v9536_v2 = vld [vmem:[#allocation179_spill] sm:$0xff] }
 0x87d   : > { %v3678_v63 = vpop.permute.xlu1 %3677  ;;  %v3312_v50 = vsel %vm2829_vm0, %v3304_v1, %v8007_v24  ;;  %v2715_v56 = vsel %vm470_vm8, %v5033_v28, %v9510_v31  ;;  %v9517_v13 = vld [vmem:[#allocation53_spill] sm:$0xff]  ;;  %v9535_v5 = vld [vmem:[#allocation160_spill] sm:$0xff] }
 0x87e   : > { %v3806_v30 = vsel %vm2838_vm10, %v3798_v47, %v3678_v63  ;;  %v3320_v44 = vsel %vm2838_vm10, %v3312_v50, %v8122_v0  ;;  %v9493_v0 = vld [vmem:[#allocation79_spill] sm:$0xff]  ;;  %v3802_v47 = vsel %vm2838_vm10, %v8317_v41, %v8343_v48  ;;  %v9499_v63 = vld [vmem:[#allocation92_spill] sm:$0xff]  ;;  %v2724_v1 = vsel %vm2721_vm15, %v2715_v56, %v9513_v49  ;;  %v9540_v31 = vld [vmem:[#allocation185_spill] sm:$0xff] }
 0x87f   : > { %3861 = vrot.lane.b32.xlu1 %v3806_v30, %s9374_s0  ;;  %3859 = vrot.lane.b32.xlu0 %v3805_v37, %s9374_s0  ;;  %v3772_v15 = vsel %vm2802_vm14, %v3764_v46, %v9493_v0  ;;  %v9498_v41 = vld [vmem:[#allocation87_spill] sm:$0xff]  ;;  %v9500_v37 = vld [vmem:[#allocation93_spill] sm:$0xff]  ;;  %v9521_v46 = vld [vmem:[#allocation32_spill] sm:$0xff] }
 0x880   : > { %4565 = vmatpush3.msk.msra.mxu0 %vm9485_vm11, %v3931_v8  ;;  %vm9489_vm11 = vcmask 261120   ;;  %v9516_v50 = vld [vmem:[#allocation27_spill] sm:$0xff] }
 0x883   : > { %3873 = vrot.lane.b32.xlu1 %v9480_v38, %s9062_s20  ;;  %3883 = vrot.lane.b32.xlu0 %v9481_v60, %s9062_s20  ;;  %v9509_v60 = vld [vmem:[#allocation43_spill] sm:$0xff] }
 0x887   : > { %3877 = vrot.lane.b32.xlu1 %v6716_v55, %s9062_s20  ;;  %v3895_v55 = vsel %vm9489_vm11, %v2839_v3, %v3816_v14  ;;  %vm9515_vm11 = vcmask 130048   ;;  %v2733_v14 = vsel %vm2730_vm1, %v2724_v1, %v9516_v50  ;;  %v9542_v1 = vld [vmem:[#allocation163_spill] sm:$0xff] }
 0x88b   : > { %3817 = vrot.lane.b32.xlu1 %v3320_v44, %s9343_s1  ;;  %v8638_v44 = vpop.permute.xlu1 %3881 }
 0x88d   : > { %v3848_v6 = vpop.permute.xlu0 %3847 }
 0x88e   : > { %v3903_v12 = vsel %vm9490_vm9, %v3895_v55, %v3848_v6  ;;  %vm9512_vm9 = vcmask 113664   ;;  %v9519_v55 = vld [vmem:[#allocation29_spill] sm:$0xff] }
 0x88f   : > { %3849 = vrot.lane.b32.xlu1 %v8099_v33, %s9374_s0  ;;  %v3911_v24 = vsel %vm9492_vm7, %v3903_v12, %v8479_v52  ;;  %v9495_v33 = vld [vmem:[#allocation82_spill] sm:$0xff]  ;;  %v3294_v52 = vsel %vm2802_vm14, %v3286_v54, %v8341_v20  ;;  %v3324_v20 = vsel %vm2838_vm10, %v3316_v39, %v8353_v4  ;;  %v2351_v4 = vrot.slane %v8094_v57, 6  ;;  %v9507_v57 = vld [vmem:[#allocation39_spill] sm:$0xff]  ;;  %v9520_v12 = vld [vmem:[#allocation57_spill] sm:$0xff] }
 0x890   : > { %4566 = vmatprep.mubr.msk.f32.mxu0 %vm3934_vm13, %v3911_v24  ;;  %v3780_v58 = vsel %vm2811_vm5, %v3772_v15, %v9495_v33  ;;  %v3302_v19 = vsel %vm2811_vm5, %v3294_v52, %v9497_v43  ;;  %vm9503_vm7 = vcmask 1041408   ;;  %v2741_v18 = vsel %vm2739_vm2, %v2732_v62, %v9507_v57  ;;  %v9522_v54 = vld [vmem:[#allocation61_spill] sm:$0xff]  ;;  %v5036_v57 = vld [vmem:[#allocation3 + $0x60] sm:$0xff] }
 0x891   : > { %v3310_v10 = vsel %vm2820_vm4, %v3302_v19, %v9499_v63  ;;  %v2352_v22 = vsel %vm9503_vm7, %v2350_v29, %v2351_v4  ;;  %v2750_v38 = vsel %vm2748_vm3, %v2741_v18, %v9508_v36  ;;  %vm9518_vm7 = vcmask 146432   ;;  %v9527_v19 = vld [vmem:[#allocation147_spill] sm:$0xff]  ;;  %v9532_v4 = vld [vmem:[#allocation173_spill] sm:$0xff] }
 0x892   : > { %v3318_v59 = vsel %vm2829_vm0, %v3310_v10, %v9501_v11  ;;  %v2759_v8 = vsel %vm2757_vm6, %v2750_v38, %v9509_v60  ;;  %v2742_v6 = vsel %vm2739_vm2, %v2733_v14, %v9519_v55  ;;  %v9529_v10 = vld [vmem:[#allocation167_spill] sm:$0xff]  ;;  %v9537_v18 = vld [vmem:[#allocation145_spill] sm:$0xff]  ;;  %v9545_v55 = vld [vmem:[#allocation150_spill] sm:$0xff] }
 0x893   : > { %3821 = vrot.lane.b32.xlu1 %v8239_v35, %s9343_s1  ;;  %v9496_v35 = vld [vmem:[#allocation86_spill] sm:$0xff]  ;;  %v3326_v9 = vsel %vm2838_vm10, %v3318_v59, %v9502_v25  ;;  %v2768_v16 = vsel %vm9512_vm9, %v2759_v8, %v9511_v42  ;;  %v2751_v24 = vsel %vm2748_vm3, %v2742_v6, %v9521_v46  ;;  %v2719_v36 = vsel %vm470_vm8, %v5036_v57, %v9537_v18  ;;  %v9538_v38 = vld [vmem:[#allocation159_spill] sm:$0xff] }
 0x894   : > { %v3788_v40 = vsel %vm2820_vm4, %v3780_v58, %v9496_v35  ;;  %v2777_v21 = vsel %vm9515_vm11, %v2768_v16, %v9514_v53  ;;  %v2760_v33 = vsel %vm2757_vm6, %v2751_v24, %v9523_v34  ;;  %v9524_v58 = vld [vmem:[#allocation63_spill] sm:$0xff]  ;;  %v5034_v35 = vld [vmem:[#allocation3 + $0x40] sm:$0xff]  ;;  %v9531_v59 = vld [vmem:[#allocation154_spill] sm:$0xff] }
 0x895   : > { %v3796_v48 = vsel %vm2829_vm0, %v3788_v40, %v9498_v41  ;;  %v2786_v3 = vsel %vm9518_vm7, %v2777_v21, %v9517_v13  ;;  %v9526_v40 = vld [vmem:[#allocation143_spill] sm:$0xff]  ;;  %v5035_v41 = vld [vmem:[#allocation3 + $0x30] sm:$0xff]  ;;  %v9541_v16 = vld [vmem:[#allocation149_spill] sm:$0xff] }
 0x896   : > { %v3804_v30 = vsel %vm2838_vm10, %v3796_v48, %v9500_v37  ;;  %v2795_v45 = vsel %vm2793_vm12, %v2786_v3, %v9520_v12  ;;  %v2717_v39 = vsel %vm470_vm8, %v5034_v35, %v9526_v40  ;;  %v9528_v48 = vld [vmem:[#allocation148_spill] sm:$0xff]  ;;  %v9539_v8 = vld [vmem:[#allocation166_spill] sm:$0xff]  ;;  %v2728_v49 = vsel %vm2721_vm15, %v2719_v36, %v9541_v16  ;;  %v9544_v14 = vld [vmem:[#allocation191_spill] sm:$0xff] }
 0x897   : > { %3853 = vrot.lane.b32.xlu1 %v3802_v47, %s9374_s0  ;;  %v2804_v51 = vsel %vm2802_vm14, %v2795_v45, %v9522_v54  ;;  %v9525_v47 = vld [vmem:[#allocation108_spill] sm:$0xff]  ;;  %v2716_v63 = vsel %vm470_vm8, %v5035_v41, %v9528_v48  ;;  %v5037_v3 = vld [vmem:[#allocation3 + $0x50] sm:$0xff]  ;;  %v9546_v12 = vld [vmem:[#allocation153_spill] sm:$0xff] }
 0x898   : > { %v2813_v52 = vsel %vm2811_vm5, %v2804_v51, %v9524_v58  ;;  %v2769_v7 = vsel %vm9512_vm9, %v2760_v33, %v9525_v47  ;;  %v2725_v29 = vsel %vm2721_vm15, %v2716_v63, %v9531_v59  ;;  %v9543_v21 = vld [vmem:[#allocation172_spill] sm:$0xff]  ;;  %v2718_v6 = vsel %vm470_vm8, %v5037_v3, %v9545_v55  ;;  %v9547_v46 = vld [vmem:[#allocation178_spill] sm:$0xff]  ;;  %v9548_v54 = vld [vmem:[#allocation197_spill] sm:$0xff] }
 0x899   : > { %v2778_v37 = vsel %vm9515_vm11, %v2769_v7, %v9529_v10  ;;  %v2734_v26 = vsel %vm2730_vm1, %v2725_v29, %v9535_v5  ;;  %v2737_v45 = vsel %vm2730_vm1, %v2728_v49, %v9546_v12  ;;  %v9549_v33 = vld [vmem:[#allocation116_spill] sm:$0xff]  ;;  %v9551_v7 = vld [vmem:[#allocation157_spill] sm:$0xff]  ;;  %v5038_v40 = vld [vmem:[#allocation3 + $0x70] sm:$0xff] }
 0x89a   : > { %v2787_v25 = vsel %vm9518_vm7, %v2778_v37, %v9532_v4  ;;  %v2743_v28 = vsel %vm2739_vm2, %v2734_v26, %v9539_v8  ;;  %v2746_v35 = vsel %vm2739_vm2, %v2737_v45, %v9551_v7  ;;  %v9554_v48 = vld [vmem:[#allocation162_spill] sm:$0xff]  ;;  %v9555_v10 = vld [vmem:[#allocation109_spill] sm:$0xff]  ;;  %vm9559_vm7 = vmmov %vm9512_vm9 }
 0x89b   : > { %3825 = vrot.lane.b32.xlu1 %v3324_v20, %s9343_s1  ;;  %v2726_v20 = vsel %vm2721_vm15, %v2717_v39, %v9527_v19  ;;  %v2796_v62 = vsel %vm2793_vm12, %v2787_v25, %v9536_v2  ;;  %v2752_v50 = vsel %vm2748_vm3, %v2743_v28, %v9543_v21  ;;  %v9552_v39 = vld [vmem:[#allocation152_spill] sm:$0xff]  ;;  %v9557_v29 = vld [vmem:[#allocation169_spill] sm:$0xff]  ;;  %v9558_v25 = vld [vmem:[#allocation110_spill] sm:$0xff] }
 0x89c   : > { %v2805_v56 = vsel %vm2802_vm14, %v2796_v62, %v9540_v31  ;;  %v2761_v24 = vsel %vm2757_vm6, %v2752_v50, %v9547_v46  ;;  %v2720_v19 = vsel %vm470_vm8, %v5038_v40, %v9552_v39  ;;  %v9562_v26 = vld [vmem:[#allocation175_spill] sm:$0xff]  ;;  %vm9563_vm8 = vcmask 146432   ;;  %v9564_v62 = vld [vmem:[#allocation184_spill] sm:$0xff]  ;;  %v9568_v8 = vld [vmem:[#allocation190_spill] sm:$0xff] }
 0x89d   : > { %v2814_v13 = vsel %vm2811_vm5, %v2805_v56, %v9544_v14  ;;  %v9566_v18 = vld [vmem:[#allocation203_spill] sm:$0xff]  ;;  %v9570_v31 = vld [vmem:[#allocation220_spill] sm:$0xff]  ;;  %v9576_v55 = vld [vmem:[#allocation174_spill] sm:$0xff] }
 0x89e   : > { %v2823_v51 = vsel %vm2820_vm4, %v2814_v13, %v9548_v54  ;;  %v9572_v49 = vld [vmem:[#allocation187_spill] sm:$0xff]  ;;  %v9577_v12 = vld [vmem:[#allocation193_spill] sm:$0xff]  ;;  %v9578_v46 = vld [vmem:[#allocation202_spill] sm:$0xff] }
 0x89f   : > { %3857 = vrot.lane.b32.xlu1 %v3804_v30, %s9374_s0  ;;  %v9530_v30 = vld [vmem:[#allocation151_spill] sm:$0xff]  ;;  %v9580_v54 = vld [vmem:[#allocation180_spill] sm:$0xff]  ;;  %v9584_v7 = vld [vmem:[#allocation158_spill] sm:$0xff] }
 0x8a0   : > { %v2735_v11 = vsel %vm2730_vm1, %v2726_v20, %v9530_v30  ;;  %v9553_v20 = vld [vmem:[#allocation161_spill] sm:$0xff]  ;;  %v9585_v40 = vld [vmem:[#allocation214_spill] sm:$0xff] }
 0x8a1   : > { %v2744_v32 = vsel %vm2739_vm2, %v2735_v11, %v9534_v17  ;;  %v2755_v41 = vsel %vm2748_vm3, %v2746_v35, %v9553_v20  ;;  %v9556_v11 = vld [vmem:[#allocation165_spill] sm:$0xff]  ;;  %v2729_v35 = vsel %vm2721_vm15, %v2720_v19, %v9584_v7 }
 0x8a2   : > { %v2753_v60 = vsel %vm2748_vm3, %v2744_v32, %v9538_v38  ;;  %v2764_v59 = vsel %vm2757_vm6, %v2755_v41, %v9556_v11  ;;  %v9561_v32 = vld [vmem:[#allocation168_spill] sm:$0xff]  ;;  %v9567_v38 = vld [vmem:[#allocation181_spill] sm:$0xff]  ;;  %v9591_v11 = vld [vmem:[#allocation171_spill] sm:$0xff] }
 0x8a3   : > { %3829 = vrot.lane.b32.xlu1 %v3326_v9, %s9343_s1  ;;  %v2762_v53 = vsel %vm2757_vm6, %v2753_v60, %v9542_v1  ;;  %v9587_v41 = vld [vmem:[#allocation164_spill] sm:$0xff]  ;;  %s432_s1 = sand.u32 1, %s5093_s28  }
 0x8a4   : > { %v2771_v37 = vsel %vm9512_vm9, %v2762_v53, %v9555_v10  ;;  %vm9565_vm9 = vmmov %vm9515_vm11  ;;  %v9573_v53 = vld [vmem:[#allocation196_spill] sm:$0xff]  ;;  %s4267_s0 = sshll.u32 %s432_s1, 6  ;;  %s8916_s12 = scalar_lea.sflag [#allocation6], %s432_s1 }
 0x8a5   : > { %v2780_v4 = vsel %vm9515_vm11, %v2771_v37, %v9557_v29  ;;  %vm9569_vm11 = vmmov %vm9563_vm8  ;;  %s8875_s15 = scalar_lea.vmem [#allocation5], %s4267_s0 }
 0x8a6   : > { %v2789_v2 = vsel %vm9563_vm8, %v2780_v4, %v9562_v26  ;;  %vm9574_vm8 = vcmask 523264   ;;  %v9593_v4 = vld [vmem:[#allocation112_spill] sm:$0xff]  ;;  %s4201_s23 = sshll.u32 %s8875_s15, 4  ;;  %s8908_s23 = int_to_ptr.vmem [resolvable:$true] %s4201_s23 }
 0x8a7   : > { %3885 = vrot.lane.b32.xlu1 %v2352_v22, %s9062_s20  ;;  %v9533_v22 = vld [vmem:[#allocation64_spill] sm:$0xff]  ;;  %v2798_v60 = vsel %vm2793_vm12, %v2789_v2, %v9567_v38  ;;  %v9600_v2 = vld [vmem:[#allocation118_spill] sm:$0xff]  ;;  %s3932_s20 = sld [smem:[#allocation4]]  ;;  %s5039_s14 = scalar_lea.vmem %s8908_s23, 1024 }
 0x8a8   : > { %v2822_v23 = vsel %vm2820_vm4, %v2813_v52, %v9533_v22  ;;  %v9550_v52 = vld [vmem:[#allocation156_spill] sm:$0xff]  ;;  %v2770_v22 = vsel %vm9559_vm7, %v2761_v24, %v9558_v25  ;;  %vm9571_vm7 = vcmask 261120   ;;  %v2807_v1 = vsel %vm2802_vm14, %v2798_v60, %v9572_v49  ;;  %v9604_v60 = vld [vmem:[#allocation222_spill] sm:$0xff]  ;;  %p5040_p11 = scmp.ne.s32.totalorder %s8908_s23, %s5039_s14  ;;  %p5046_p0 = scmp.lt.s32.totalorder %s8908_s23, %s5044_s29 }
 0x8a9   : > { %v2831_v58 = vsel %vm2829_vm0, %v2822_v23, %v9549_v33  ;;  %v2727_v47 = vsel %vm2721_vm15, %v2718_v6, %v9550_v52  ;;  %v9560_v23 = vld [vmem:[#allocation113_spill] sm:$0xff]  ;;  %v2779_v57 = vsel %vm9565_vm9, %v2770_v22, %v9564_v62  ;;  %vm9575_vm9 = vmmov %vm9571_vm7  ;;  %v2816_v45 = vsel %vm2811_vm5, %v2807_v1, %v9577_v12  ;;  %v9581_v33 = vld [vmem:[#allocation199_spill] sm:$0xff]  ;;  %p5047_p1 = scmp.lt.s32.totalorder %s5045_s16, %s5039_s14 }
 0x8aa   : > { %v2736_v63 = vsel %vm2730_vm1, %v2727_v47, %v9554_v48  ;;  %v2832_v17 = vsel %vm2829_vm0, %v2823_v51, %v9560_v23  ;;  %v2788_v28 = vsel %vm9569_vm11, %v2779_v57, %v9568_v8  ;;  %v2840_v56 = vsel %vm2838_vm10, %v2831_v58, %v9570_v31  ;;  %vm9579_vm11 = vmmov %vm9574_vm8  ;;  %v9582_v58 = vld [vmem:[#allocation208_spill] sm:$0xff]  ;;  %v9601_v57 = vld [vmem:[#allocation182_spill] sm:$0xff]  ;;  %p5041_p12 = pnand %p5040_p11, %p5238_p5 }
 0x8ab   : > { %v2745_v5 = vsel %vm2739_vm2, %v2736_v63, %v9561_v32  ;;  %v2841_v36 = vsel %vm2838_vm10, %v2832_v17, %v9566_v18  ;;  %v2797_v21 = vsel %vm2793_vm12, %v2788_v28, %v9573_v53  ;;  %v2738_v48 = vsel %vm2730_vm1, %v2729_v35, %v9587_v41  ;;  %v9588_v63 = vld [vmem:[#allocation111_spill] sm:$0xff]  ;;  %v9596_v23 = vld [vmem:[#allocation176_spill] sm:$0xff]  ;;  %v9606_v31 = vld [vmem:[#allocation177_spill] sm:$0xff]  ;;  %p5048_p2 = por %p5047_p1, %p5046_p0 }
 0x8ac   : > { %v2754_v6 = vsel %vm2748_vm3, %v2745_v5, %v9576_v55  ;;  %vm9592_vm15 = vcmask 130048   ;;  %v9599_v5 = vld [vmem:[#allocation205_spill] sm:$0xff]  ;;  %v9623_v35 = vld [vmem:[#allocation194_spill] sm:$0xff]  ;;  %v9626_v41 = vld [vmem:[#allocation200_spill] sm:$0xff]  ;;  %p5042_p13 = pneg %p5041_p12 }
 0x8ad   : > { %v2763_v51 = vsel %vm2757_vm6, %v2754_v6, %v9580_v54  ;;  %vm9598_vm1 = vmmov %vm9592_vm15 }
 0x8ae   : > { %p5049_p3 = pnand %p5048_p2, %p5042_p13 }
 0x8b9   : > { %v3820_v0 = vpop.permute.xlu0 %3819 }
 0x8ba   : > { %v3897_v16 = vsel %vm9571_vm7, %v2841_v36, %v3820_v0  ;;  %v2806_v0 = vsel %vm2802_vm14, %v2797_v21, %v9578_v46  ;;  %vm9583_vm7 = vcmask 785408   ;;  %v9602_v36 = vld [vmem:[#allocation192_spill] sm:$0xff] }
 0x8bb   : > { %v2815_v52 = vsel %vm2811_vm5, %v2806_v0, %v9582_v58  ;;  %v9617_v0 = vld [vmem:[#allocation210_spill] sm:$0xff] }
 0x8bc   : > { %v2824_v39 = vsel %vm2820_vm4, %v2815_v52, %v9585_v40  ;;  %v9621_v52 = vld [vmem:[#allocation216_spill] sm:$0xff] }
 0x8bd   : > { %v2833_v62 = vsel %vm2829_vm0, %v2824_v39, %v9600_v2  ;;  %v9625_v39 = vld [vmem:[#allocation201_spill] sm:$0xff] }
 0x8be   : > { %v3852_v9 = vpop.permute.xlu0 %3851  ;;  %v2842_v8 = vsel %vm2838_vm10, %v2833_v62, %v9604_v60  ;;  %v9641_v60 = vld [vmem:[#allocation226_spill] sm:$0xff] }
 0x8bf   : > { %v3905_v50 = vsel %vm9574_vm8, %v3897_v16, %v3852_v9  ;;  %v2825_v9 = vsel %vm2820_vm4, %v2816_v45, %v9581_v33  ;;  %vm9586_vm8 = vmmov %vm9583_vm7  ;;  %v9608_v16 = vld [vmem:[#allocation198_spill] sm:$0xff]  ;;  %v9616_v45 = vld [vmem:[#allocation189_spill] sm:$0xff] }
 0x8c0   : > { %v3913_v20 = vsel %vm9586_vm8, %v3905_v50, %v8509_v27  ;;  %v9595_v27 = vld [vmem:[#allocation115_spill] sm:$0xff]  ;;  %vm9609_vm8 = vcmask 523264  }
 0x8c1   : > { %v2834_v22 = vsel %vm2829_vm0, %v2825_v9, %v9595_v27  ;;  %v9611_v50 = vld [vmem:[#allocation183_spill] sm:$0xff] }
 0x8c2   : > { %v2843_v26 = vsel %vm2838_vm10, %v2834_v22, %v9599_v5  ;;  %v9620_v9 = vld [vmem:[#allocation195_spill] sm:$0xff] }
 0x8c3   : > { %v9632_v27 = vld [vmem:[#allocation207_spill] sm:$0xff] }
 0x8e1   : > { %v3824_v34 = vpop.permute.xlu0 %3823 }
 0x8e6   : > { %v3856_v14 = vpop.permute.xlu0 %3855 }
 0x8ed   : > { %v3828_v37 = vpop.permute.xlu0 %3827 }
 0x8f1   : > { %v8648_v15 = vpop.permute.xlu1 %3861 }
 0x8f5   : > { %v8660_v43 = vpop.permute.xlu1 %3873 }
 0x8f9   : > { %v8690_v42 = vpop.permute.xlu1 %3877 }
 0x8fd   : > { %v3818_v30 = vpop.permute.xlu1 %3817 }
 0x8fe   : > { %v3896_v13 = vsel %vm9575_vm9, %v2840_v56, %v3818_v30  ;;  %vm9589_vm9 = vcmask 113664  }
 0x8ff   : > { %v2773_v10 = vsel %vm9589_vm9, %v2764_v59, %v9588_v63  ;;  %v9597_v59 = vld [vmem:[#allocation186_spill] sm:$0xff] }
 0x900   : > { %v2782_v29 = vsel %vm9592_vm15, %v2773_v10, %v9591_v11  ;;  %v9627_v63 = vld [vmem:[#allocation206_spill] sm:$0xff]  ;;  %v9630_v11 = vld [vmem:[#allocation212_spill] sm:$0xff] }
 0x901   : > { %v3850_v3 = vpop.permute.xlu1 %3849 }
 0x902   : > { %v3904_v24 = vsel %vm9579_vm11, %v3896_v13, %v3850_v3  ;;  %vm9594_vm11 = vmmov %vm9589_vm9  ;;  %v9612_v3 = vld [vmem:[#allocation204_spill] sm:$0xff] }
 0x903   : > { %v3912_v47 = vsel %vm9583_vm7, %v3904_v24, %v8660_v43  ;;  %v9590_v43 = vld [vmem:[#allocation170_spill] sm:$0xff]  ;;  %v2772_v25 = vsel %vm9594_vm11, %v2763_v51, %v9593_v4  ;;  %vm9605_vm7 = vcmask 261120   ;;  %vm9615_vm15 = vmmov %vm9594_vm11  ;;  %v3860_v24 = vpop.permute.xlu0 %3859  ;;  %vm9618_vm11 = vcmask 785408   ;;  %v9619_v51 = vld [vmem:[#allocation188_spill] sm:$0xff] }
 0x904   : > { %4567 = vmatmul.mubr.msk.f32.vlgmr.msra.gmra.mrb[16].mxu0 %vm3934_vm13, %v3912_v47  ;;  %v2747_v19 = vsel %vm2739_vm2, %v2738_v48, %v9590_v43  ;;  %v2781_v32 = vsel %vm9598_vm1, %v2772_v25, %v9597_v59  ;;  %vm9603_vm2 = vcmask 146432   ;;  %v3899_v28 = vsel %vm9605_vm7, %v2843_v26, %v3824_v34  ;;  %vm9610_vm9 = vmmov %vm9605_vm7  ;;  %v9614_v34 = vld [vmem:[#allocation114_spill] sm:$0xff]  ;;  %v9631_v4 = vld [vmem:[#allocation224_spill] sm:$0xff] }
 0x905   : > { %v3822_v30 = vpop.permute.xlu1 %3821  ;;  %4569 = vmatprep.mubr.msk.f32.mxu0 %vm3934_vm13, %v3913_v20  ;;  %v2756_v17 = vsel %vm2748_vm3, %v2747_v19, %v9596_v23  ;;  %v2790_v38 = vsel %vm9603_vm2, %v2781_v32, %v9602_v36  ;;  %vm9607_vm3 = vmmov %vm9603_vm2  ;;  %v3907_v1 = vsel %vm9609_vm8, %v3899_v28, %v3856_v14  ;;  %v9629_v19 = vld [vmem:[#allocation117_spill] sm:$0xff]  ;;  %v9633_v23 = vld [vmem:[#allocation218_spill] sm:$0xff] }
 0x906   : > { %v2765_v18 = vsel %vm2757_vm6, %v2756_v17, %v9601_v57  ;;  %v2791_v56 = vsel %vm9607_vm3, %v2782_v29, %v9606_v31  ;;  %v2799_v49 = vsel %vm2793_vm12, %v2790_v38, %v9608_v16  ;;  %v3898_v53 = vsel %vm9610_vm9, %v2842_v8, %v3822_v30  ;;  %vm9613_vm6 = vmmov %vm9609_vm8  ;;  %v9628_v30 = vld [vmem:[#allocation119_spill] sm:$0xff] }
 0x907   : > { %v2800_v13 = vsel %vm2793_vm12, %v2791_v56, %v9611_v50  ;;  %v2808_v55 = vsel %vm2802_vm14, %v2799_v49, %v9612_v3  ;;  %v2774_v12 = vsel %vm9615_vm15, %v2765_v18, %v9614_v34  ;;  %vm9622_vm2 = vmmov %vm9618_vm11  ;;  %v3884_v59 = vpop.permute.xlu0 %3883  ;;  %v9639_v18 = vld [vmem:[#allocation121_spill] sm:$0xff]  ;;  %v5124_v16 = vmov 0  }
 0x908   : > { %v2809_v46 = vsel %vm2802_vm14, %v2800_v13, %v9616_v45  ;;  %v2817_v14 = vsel %vm2811_vm5, %v2808_v55, %v9617_v0  ;;  %v2783_v33 = vsel %vm9598_vm1, %v2774_v12, %v9619_v51  ;;  %v3915_v7 = vsel %vm9622_vm2, %v3907_v1, %v8531_v61  ;;  %vm9624_vm7 = vmmov %vm9607_vm3  ;;  %4990 = vset.pattern.permute.xlu1 %v5124_v16 }
 0x909   : > { %v3854_v21 = vpop.permute.xlu1 %3853  ;;  %v2818_v58 = vsel %vm2811_vm5, %v2809_v46, %v9620_v9  ;;  %v2826_v47 = vsel %vm2820_vm4, %v2817_v14, %v9621_v52  ;;  %v2792_v40 = vsel %vm9624_vm7, %v2783_v33, %v9623_v35  ;;  %vm9636_vm3 = vmmov %vm9613_vm6  ;;  %4991 = vset.pattern.permute.xlu0 %v5124_v16  ;;  %v3933_v49 = vstv %s3932_s20 }
 0x90a   : > { %v3906_v6 = vsel %vm9613_vm6, %v3898_v53, %v3854_v21  ;;  %v2801_v48 = vsel %vm2793_vm12, %v2792_v40, %v9626_v41  ;;  %v2835_v43 = vsel %vm2829_vm0, %v2826_v47, %v9628_v30  ;;  %vm9634_vm12 = vmmov %vm9610_vm9 }
 0x90b   : > { %v3914_v54 = vsel %vm9618_vm11, %v3906_v6, %v8690_v42  ;;  %v2827_v42 = vsel %vm2820_vm4, %v2818_v58, %v9625_v39  ;;  %v2810_v10 = vsel %vm2802_vm14, %v2801_v48, %v9627_v63  ;;  %v2844_v25 = vsel %vm2838_vm10, %v2835_v43, %v9631_v4  ;;  %vm9635_vm14 = vmmov %vm9610_vm9 }
 0x90c   : > { %4570 = vmatmul.mubr.msk.f32.gmra.mrb[18].mxu0 %vm3934_vm13, %v3914_v54  ;;  %v2836_v61 = vsel %vm2829_vm0, %v2827_v42, %v9629_v19  ;;  %v2819_v29 = vsel %vm2811_vm5, %v2810_v10, %v9630_v11  ;;  %vm9637_vm8 = vmmov %vm9636_vm3 }
 0x90d   : > { %v3826_v20 = vpop.permute.xlu1 %3825  ;;  %4572 = vmatprep.mubr.msk.f32.mxu0 %vm3934_vm13, %v3915_v7  ;;  %v2845_v22 = vsel %vm2838_vm10, %v2836_v61, %v9632_v27  ;;  %v2828_v17 = vsel %vm2820_vm4, %v2819_v29, %v9633_v23  ;;  %vm9638_vm5 = vmmov %vm9622_vm2 }
 0x90e   : > { %v3900_v32 = vsel %vm9634_vm12, %v2844_v25, %v3826_v20  ;;  %v3901_v26 = vsel %vm9635_vm14, %v2845_v22, %v3828_v37  ;;  %v2837_v36 = vsel %vm2829_vm0, %v2828_v17, %v9639_v18  ;;  %vm9640_vm9 = vmmov %vm9622_vm2  ;;  %v9646_v18 = vld [vmem:[#allocation50_spill] sm:$0xff] }
 0x90f   : > { %v3909_v62 = vsel %vm9637_vm8, %v3901_v26, %v3860_v24  ;;  %v2846_v8 = vsel %vm2838_vm10, %v2837_v36, %v9641_v60  ;;  %vm9642_vm4 = vmmov %vm9634_vm12 }
 0x910   : > { %v3917_v38 = vsel %vm9640_vm9, %v3909_v62, %v3884_v59  ;;  %vm9643_vm6 = vmmov %vm9636_vm3 }
 0x911   : > { %v3858_v5 = vpop.permute.xlu1 %3857  ;;  %vm9644_vm15 = vmmov %vm9622_vm2 }
 0x912   : > { %v3908_v2 = vsel %vm9636_vm3, %v3900_v32, %v3858_v5  ;;  %vm9649_vm0 = vmmov %vm9642_vm4 }
 0x913   : > { %v3916_v57 = vsel %vm9638_vm5, %v3908_v2, %v8638_v44  ;;  %v9645_v2 = vld [vmem:[#allocation49_spill] sm:$0xff]  ;;  %vm9650_vm10 = vmmov %vm9649_vm0 }
 0x914   : > { %4573 = vmatmul.mubr.msk.f32.gmra.mrb[20].mxu0 %vm3934_vm13, %v3916_v57  ;;  %vm9656_vm11 = vmmov %vm9649_vm0 }
 0x915   : > { %v3830_v28 = vpop.permute.xlu1 %3829  ;;  %4575 = vmatprep.mubr.msk.f32.mxu0 %vm3934_vm13, %v3917_v38  ;;  %v9647_v38 = vld [vmem:[#allocation12_spill] sm:$0xff]  ;;  %vm9661_vm1 = vmmov %vm9649_vm0 }
 0x916   : > { %v3902_v37 = vsel %vm9642_vm4, %v2846_v8, %v3830_v28  ;;  %v9648_v8 = vld [vmem:[#allocation13_spill] sm:$0xff]  ;;  %vm9662_vm2 = vmmov %vm9649_vm0 }
 0x917   : > { %v3910_v31 = vsel %vm9643_vm6, %v3902_v37, %v8648_v15  ;;  %vm9667_vm7 = vmmov %vm9649_vm0 }
 0x918   : > { %vm9668_vm12 = vmmov %vm9649_vm0 }
 0x919   : > { %v3886_v56 = vpop.permute.xlu1 %3885 }
 0x91a   : > { %v3918_v44 = vsel %vm9644_vm15, %v3910_v31, %v3886_v56 }
 0x91b   : > { %4576 = vmatmul.mubr.msk.f32.gmra.mrb[22].mxu0 %vm3934_vm13, %v3918_v44  ;;  %v9651_v44 = vld [vmem:[#allocation56_spill] sm:$0xff]  ;;  %vm9655_vm13 = vmmov %vm9649_vm0 }
 0x9d7   : > { %v4568_v1 = vpop.f32.mrb[16].mxu0 }
 0x9d8   : > { %v4034_v53 = vadd.f32 %v4568_v1, %v3933_v49  ;;  %v4028_v21 = vpop.f32.mrb[17].mxu0  ;;  %v9652_v1 = vld [vmem:[#allocation52_spill] sm:$0xff] }
 0x9d9   : > { %v4029_v50 = vadd.f32 %v4028_v21, %v3933_v49  ;;  %v9653_v21 = vld [vmem:[#allocation15_spill] sm:$0xff] }
 0x9da   : > { %v4306_v13 = vmul.f32 -1.442695, %v4034_v53 }
 0x9db   : > { %v4305_v3 = vmul.f32 -1.442695, %v4029_v50 }
 0x9dc   : > { %4996 = vpow2.f32 %v4306_v13  ;;  %v9654_v13 = vld [vmem:[#allocation14_spill] sm:$0xff] }
 0x9dd   : > { %4998 = vpow2.f32 %v4305_v3 }
 0x9df   : > { %v4571_v55 = vpop.f32.mrb[18].mxu0 }
 0x9e0   : > { %v4044_v15 = vadd.f32 %v4571_v55, %v3933_v49  ;;  %v4038_v6 = vpop.f32.mrb[19].mxu0 }
 0x9e1   : > { %v4039_v34 = vadd.f32 %v4038_v6, %v3933_v49 }
 0x9e2   : > { %v4308_v12 = vmul.f32 -1.442695, %v4044_v15 }
 0x9e3   : > { %v4307_v45 = vmul.f32 -1.442695, %v4039_v34  ;;  %v9657_v34 = vld [vmem:[#allocation58_spill] sm:$0xff] }
 0x9e4   : > { %5000 = vpow2.f32 %v4308_v12 }
 0x9e5   : > { %5002 = vpow2.f32 %v4307_v45 }
 0x9e6   : > { %v4997_v46 = vpop.eup %4996 }
 0x9e7   : > { %v4999_v0 = vpop.eup %4998  ;;  %v4092_v14 = vadd.f32 1.0, %v4997_v46  ;;  %v4574_v24 = vpop.f32.mrb[20].mxu0  ;;  %v9658_v46 = vld [vmem:[#allocation51_spill] sm:$0xff] }
 0x9e8   : > { %v4091_v54 = vadd.f32 1.0, %v4999_v0  ;;  %v4054_v51 = vadd.f32 %v4574_v24, %v3933_v49  ;;  %v4048_v33 = vpop.f32.mrb[21].mxu0 }
 0x9e9   : > { %5004 = vrcp.f32 %v4092_v14  ;;  %v4049_v9 = vadd.f32 %v4048_v33, %v3933_v49  ;;  %v9659_v14 = vld [vmem:[#allocation17_spill] sm:$0xff] }
 0x9ea   : > { %5006 = vrcp.f32 %v4091_v54  ;;  %v4310_v58 = vmul.f32 -1.442695, %v4054_v51  ;;  %v9660_v54 = vld [vmem:[#allocation16_spill] sm:$0xff] }
 0x9eb   : > { %v4309_v52 = vmul.f32 -1.442695, %v4049_v9 }
 0x9ec   : > { %5008 = vpow2.f32 %v4310_v58 }
 0x9ed   : > { %5010 = vpow2.f32 %v4309_v52  ;;  %v9663_v52 = vld [vmem:[#allocation60_spill] sm:$0xff] }
 0x9ee   : > { %v5001_v47 = vpop.eup %5000  ;;  %v4577_v7 = vpop.f32.mrb[22].mxu0 }
 0x9ef   : > { %v5003_v35 = vpop.eup %5002  ;;  %v4094_v40 = vadd.f32 1.0, %v5001_v47  ;;  %v4064_v39 = vadd.f32 %v4577_v7, %v3933_v49  ;;  %v4058_v42 = vpop.f32.mrb[23].mxu0 }
 0x9f0   : > { %v4093_v20 = vadd.f32 1.0, %v5003_v35  ;;  %v4059_v41 = vadd.f32 %v4058_v42, %v3933_v49  ;;  %v9664_v35 = vld [vmem:[#allocation55_spill] sm:$0xff] }
 0x9f1   : > { %5012 = vrcp.f32 %v4094_v40  ;;  %v4312_v48 = vmul.f32 -1.442695, %v4064_v39  ;;  %v9665_v39 = vld [vmem:[#allocation19_spill] sm:$0xff] }
 0x9f2   : > { %5014 = vrcp.f32 %v4093_v20  ;;  %v4311_v63 = vmul.f32 -1.442695, %v4059_v41  ;;  %v9666_v20 = vld [vmem:[#allocation18_spill] sm:$0xff] }
 0x9f3   : > { %v5005_v10 = vpop.eup %5004  ;;  %5016 = vpow2.f32 %v4312_v48 }
 0x9f4   : > { %v5007_v30 = vpop.eup %5006  ;;  %5018 = vpow2.f32 %v4311_v63  ;;  %4122 = vperm.xlu1 %4990, %v5005_v10  }
 0x9f5   : > { %4117 = vperm.xlu0 %4991, %v5007_v30  }
 0x9f6   : > { %v5009_v43 = vpop.eup %5008 }
 0x9f7   : > { %v5011_v19 = vpop.eup %5010  ;;  %v4096_v61 = vadd.f32 1.0, %v5009_v43 }
 0x9f8   : > { %v4095_v11 = vadd.f32 1.0, %v5011_v19 }
 0x9f9   : > { %5020 = vrcp.f32 %v4096_v61 }
 0x9fa   : > { %5022 = vrcp.f32 %v4095_v11 }
 0x9fb   : > { %v5013_v29 = vpop.eup %5012 }
 0x9fc   : > { %v5015_v4 = vpop.eup %5014  ;;  %4132 = vperm.xlu0 %4991, %v5013_v29  }
 0x9fd   : > { %v5017_v25 = vpop.eup %5016  ;;  %4127 = vperm.xlu1 %4990, %v5015_v4  }
 0x9fe   : > { %v5019_v27 = vpop.eup %5018  ;;  %v4098_v22 = vadd.f32 1.0, %v5017_v25 }
 0x9ff   : > { %v4097_v23 = vadd.f32 1.0, %v5019_v27 }
 0xa00   : > { %5024 = vrcp.f32 %v4098_v22 }
 0xa01   : > { %5026 = vrcp.f32 %v4097_v23 }
 0xa03   : > { %v5021_v17 = vpop.eup %5020 }
 0xa04   : > { %v5023_v59 = vpop.eup %5022  ;;  %4142 = vperm.xlu0 %4991, %v5021_v17  }
 0xa05   : > { %4137 = vperm.xlu1 %4990, %v5023_v59  }
 0xa0a   : > { %v5025_v32 = vpop.eup %5024 }
 0xa0b   : > { %v5027_v5 = vpop.eup %5026  ;;  %4152 = vperm.xlu0 %4991, %v5025_v32  }
 0xa0c   : > { %4147 = vperm.xlu1 %4990, %v5027_v5  }
 0xa73   : > { %v4123_v26 = vpop.permute.xlu1 %4122 }
 0xa74   : > { %v4156_v62 = vmul.f32 %v4123_v26, %v9645_v2  ;;  %v4118_v57 = vpop.permute.xlu0 %4117 }
 0xa75   : > { %v4155_v36 = vmul.f32 %v4118_v57, %v9646_v18 }
 0xa76   : > { %v4164_v60 = vadd.f32 %v4156_v62, %v9647_v38 }
 0xa77   : > { %v4163_v28 = vadd.f32 %v4155_v36, %v9648_v8 }
 0xa78   : > { %v4172_v37 = vmax.f32 %v4164_v60, 0.0 }
 0xa79   : > { %v4171_v31 = vmax.f32 %v4163_v28, 0.0 }
 0xa7a   : > { %4180 = vst.msk [vmem:[%s8875_s15 + $0x8] sm:$0xff] %vm9649_vm0, %v4172_v37 }
 0xa7b   : > { %4179 = vst.msk [vmem:[%s8875_s15] sm:$0xff] %vm9650_vm10, %v4171_v31  ;;  %v4133_v56 = vpop.permute.xlu0 %4132 }
 0xa7c   : > { %v4158_v16 = vmul.f32 %v4133_v56, %v9651_v44  ;;  %v4128_v49 = vpop.permute.xlu1 %4127 }
 0xa7d   : > { %v4157_v53 = vmul.f32 %v4128_v49, %v9652_v1 }
 0xa7e   : > { %v4166_v50 = vadd.f32 %v4158_v16, %v9653_v21 }
 0xa7f   : > { %v4165_v3 = vadd.f32 %v4157_v53, %v9654_v13 }
 0xa80   : > { %v4174_v55 = vmax.f32 %v4166_v50, 0.0 }
 0xa81   : > { %v4173_v15 = vmax.f32 %v4165_v3, 0.0 }
 0xa82   : > { %4182 = vst.msk [vmem:[%s8875_s15 + $0x18] sm:$0xff] %vm9655_vm13, %v4174_v55 }
 0xa83   : > { %4181 = vst.msk [vmem:[%s8875_s15 + $0x10] sm:$0xff] %vm9656_vm11, %v4173_v15  ;;  %v4143_v6 = vpop.permute.xlu0 %4142 }
 0xa84   : > { %v4160_v12 = vmul.f32 %v4143_v6, %v9657_v34  ;;  %v4138_v45 = vpop.permute.xlu1 %4137 }
 0xa85   : > { %v4159_v0 = vmul.f32 %v4138_v45, %v9658_v46 }
 0xa86   : > { %v4168_v24 = vadd.f32 %v4160_v12, %v9659_v14 }
 0xa87   : > { %v4167_v51 = vadd.f32 %v4159_v0, %v9660_v54 }
 0xa88   : > { %v4176_v33 = vmax.f32 %v4168_v24, 0.0 }
 0xa89   : > { %v4175_v9 = vmax.f32 %v4167_v51, 0.0 }
 0xa8a   : > { %4184 = vst.msk [vmem:[%s8875_s15 + $0x28] sm:$0xff] %vm9661_vm1, %v4176_v33  ;;  %v4153_v58 = vpop.permute.xlu0 %4152 }
 0xa8b   : > { %4183 = vst.msk [vmem:[%s8875_s15 + $0x20] sm:$0xff] %vm9662_vm2, %v4175_v9  ;;  %v4162_v47 = vmul.f32 %v4153_v58, %v9663_v52  ;;  %v4148_v7 = vpop.permute.xlu1 %4147 }
 0xa8c   : > { %v4161_v40 = vmul.f32 %v4148_v7, %v9664_v35 }
 0xa8d   : > { %v4170_v42 = vadd.f32 %v4162_v47, %v9665_v39 }
 0xa8e   : > { %v4169_v41 = vadd.f32 %v4161_v40, %v9666_v20 }
 0xa8f   : > { %v4178_v48 = vmax.f32 %v4170_v42, 0.0 }
 0xa90   : > { %v4177_v63 = vmax.f32 %v4169_v41, 0.0 }
 0xa91   : > { %4186 = vst.msk [vmem:[%s8875_s15 + $0x38] sm:$0xff] %vm9667_vm7, %v4178_v48 }
 0xa92   : > { %4185 = vst.msk [vmem:[%s8875_s15 + $0x30] sm:$0xff] %vm9668_vm12, %v4177_v63 }
 0xa93   : > { %5052 = shalt.err (!%p5049_p3)
}
 0xa94   : > { %s5053_s17 = scalar_lea.hbm %s8906_s26, 1024  ;;  %s5057_s0 = scalar_lea.hbm %s8971_s13, 2048 }
 0xa95   : > { %p5054_p4 = scmp.ne.s32.totalorder %s8906_s26, %s5053_s17  ;;  %p5058_p9 = scmp.lt.u32.totalorder %s8906_s26, %s8971_s13 }
 0xa96   : > { %p5059_p10 = scmp.lt.u32.totalorder %s5057_s0, %s5053_s17  ;;  %p5061_p12 = scmp.lt.u32.totalorder %s5053_s17, %s8906_s26 }
 0xa97   : > { %p5055_p7 = pnand %p5054_p4, %p5238_p5 }
 0xa98   : > { %p5060_p11 = por %p5059_p10, %p5058_p9 }
 0xa99   : > { %p5056_p8 = pneg %p5055_p7 }
 0xa9a   : > { %p5062_p13 = por %p5061_p12, %p5060_p11 }
 0xa9c   : > { %p5063_p0 = pnand %p5062_p13, %p5056_p8 }
 0xa9e   : > { %5066 = shalt.err (!%p5063_p0)
}
 0xa9f   : > { %s5126_s24 = smov 128  }
 0xaa0   : > { %4688 = dma.vmem_to_hbm [thread:$0]  (%p5238_p5), %s8908_s23, 1024, %s8906_s26, %s8916_s12, %s5126_s24, %s5126_s24, %s9155_s18  }
 0xaa1 PF: > { %p4694_p1 = scmp.ge.s32.totalorder %s5101_s30, 2  ;;  %s4216_s14 = sand.u32 1, %s5089_s27  }
 0xaa2   : > { %s4217_s22 = scalar_lea.sflag [#allocation6], %s4216_s14 }
 0xaa3   : > { %p4691_p2 = pnand %p4694_p1, %p5242_p6 }
 0xaa5   : > { %5084 = dma.done.wait (!%p4691_p2), %s4217_s22, 1024  }
 0xaa6   : > { %5086 = vsyncadd (!%p4691_p2), %s4217_s22, 4294966272  ;;  %s9670_s30 = sld [smem:[#allocation9_spill]]  ;;  %s9671_s29 = sld [smem:[#allocation8_spill]] }
 0xaa7   : > { %s9672_s19 = sld [smem:[#allocation10_spill]]  ;;  %s9673_s27 = smov %s5093_s28 }
 0xaac   : > { %p24_p3 = scmp.ge.s32.totalorder %s9670_s30, 4   ;;  %s9674_s28 = smov %s9671_s29 }
 0xaad   : > { %s9675_s29 = smov %s9672_s19 }
 0xaae   :  { %26 = sbr.rel (!%p24_p3) target bundleno = 7 (0x7), region = 109 }
 0xab5   :  { %4222 = vsyncpa [#allocation6], 1 }
 0xab6   :  { %4224 = vsyncpa [#allocation6 + $0x1], 1 }

</bundles_post_ra>
